<compile_context>
chip_gen: v6e
topology: v6e:2x2x1
jax: 0.10.0
libtpu: 0.0.40
codegen_flags: <defaults>
</compile_context>

<pallas_src>
import jax
import jax.numpy as jnp
from jax import lax
from jax.experimental import pallas as pl
from jax.experimental.pallas import tpu as pltpu

NORMALMAX = 90
IN1, HID1 = 4, 16
HID2 = NORMALMAX

GW1 = 4 * HID1          # 64   layer-1 fused gate width [i|f|g|o], 16 lanes each
GP2 = 128               # layer-2 per-gate lane group (90 padded to 128)
GW2 = 4 * GP2           # 512  layer-2 fused gate width, lane-group aligned


def _lstm2_kernel(x_ref, wih1_ref, b1_ref, whh1_ref, wih2_ref, whh2_ref,
                  b2_ref, out_ref, zih1_ref):
    """Whole-sequence 2-layer LSTM; everything is VMEM-resident.

    x_ref    : (L*Bp, 4)    bf16  time-major inputs (batch padded to Bp)
    wih1_ref : (4, 64)      bf16  layer-1 input weight, gates fused [i|f|g|o]
    b1_ref   : (1, 64)      f32   layer-1 fused bias (b_ih + b_hh)
    whh1_ref : (16, 64)     bf16  layer-1 recurrent weight
    wih2_ref : (16, 512)    bf16  layer-2 input weight (per gate 90->128 lanes)
    whh2_ref : (128, 512)   bf16  layer-2 recurrent weight (rows = padded h2)
    b2_ref   : (1, 512)     f32   layer-2 fused bias
    out_ref  : (L, Bp, 128) f32   h2 per timestep (real lanes [:90])
    zih1_ref : (L*Bp, 64)   f32   VMEM scratch: x @ Wih1 + b1 for all steps
    """
    L, Bp, _ = out_ref.shape
    H1 = HID1            # 16  layer-1 per-gate width
    GP = GP2             # 128 layer-2 per-gate lane group

    # Layer-1 input projection for the whole sequence: one matmul, hoisted off
    # the recurrence (only h1 @ Whh1 stays on the serial critical path).
    zih1_ref[...] = (
        jnp.dot(x_ref[...], wih1_ref[...], preferred_element_type=jnp.float32)
        + b1_ref[...])

    # Hoisted out of the time loop (broadcast_in_dim is not CSE'd in loops).
    b2 = jnp.broadcast_to(b2_ref[...], (Bp, GW2))

    def sig(z):
        # logistic as a single EUP push: sigmoid(z) = 0.5*tanh(z/2) + 0.5
        return 0.5 * jnp.tanh(0.5 * z) + 0.5

    def step(t, carry):
        h1, c1, h2, c2 = carry

        # Depends only on state from step t-1 (bias folded in here too), so
        # the unrolled schedule can overlap it with layer-1's work.
        z2_hh = jnp.dot(h2.astype(jnp.bfloat16), whh2_ref[...],
                        preferred_element_type=jnp.float32) + b2

        # Layer 1: recurrent matmul + precomputed input projection.
        row0 = pl.multiple_of(t * Bp, 8)
        z1 = zih1_ref[pl.ds(row0, Bp), :] + jnp.dot(
            h1.astype(jnp.bfloat16), whh1_ref[...],
            preferred_element_type=jnp.float32)
        i1 = sig(z1[:, 0 * H1:1 * H1])
        f1 = sig(z1[:, 1 * H1:2 * H1])
        g1 = jnp.tanh(z1[:, 2 * H1:3 * H1])
        o1 = sig(z1[:, 3 * H1:4 * H1])
        c1 = f1 * c1 + i1 * g1
        h1 = o1 * jnp.tanh(c1)

        # Layer 2.
        z2 = jnp.dot(h1.astype(jnp.bfloat16), wih2_ref[...],
                     preferred_element_type=jnp.float32) + z2_hh
        i2 = sig(z2[:, 0 * GP:1 * GP])
        f2 = sig(z2[:, 1 * GP:2 * GP])
        g2 = jnp.tanh(z2[:, 2 * GP:3 * GP])
        o2 = sig(z2[:, 3 * GP:4 * GP])
        c2 = f2 * c2 + i2 * g2
        h2 = o2 * jnp.tanh(c2)

        out_ref[t] = h2
        return (h1, c1, h2, c2)

    s1 = jnp.zeros((Bp, H1), jnp.float32)
    s2 = jnp.zeros((Bp, GP), jnp.float32)
    # unroll gives the LLO scheduler cross-step visibility (hides MXU/EUP
    # latency); capped so long sequences don't explode code size / vregs.
    lax.fori_loop(0, L, step, (s1, s1, s2, s2), unroll=min(L, 8))


def pack_params(params):
    """One-time packing (called OUTSIDE the jitted forward).

    Gate-fuses, lane-pads and bf16-casts the logical LSTM weights.
    Layer 1: 4 gates x 16 stacked along lanes -> width 64.
    Layer 2: each 90-wide gate padded to a full 128-lane group -> width 512;
             whh2 rows padded 90 -> 128 to match the lane-padded h2 state.
    Padded rows/cols/bias are zero, so padded state lanes stay exactly zero.
    """
    wih1, whh1, b1, wih2, whh2, b2 = params

    wih1_f = jnp.concatenate([wih1[g] for g in range(4)], 1).astype(jnp.bfloat16)
    whh1_f = jnp.concatenate([whh1[g] for g in range(4)], 1).astype(jnp.bfloat16)
    b1_f = jnp.concatenate([b1[g] for g in range(4)], 0).reshape(1, GW1)

    def padl(w):  # pad gate lanes 90 -> 128
        return jnp.pad(w, ((0, 0), (0, GP2 - HID2)))

    wih2_f = jnp.concatenate([padl(wih2[g]) for g in range(4)], 1).astype(jnp.bfloat16)
    whh2_f = jnp.concatenate(
        [jnp.pad(whh2[g], ((0, GP2 - HID2), (0, GP2 - HID2))) for g in range(4)],
        1).astype(jnp.bfloat16)
    b2_f = jnp.concatenate([jnp.pad(b2[g], (0, GP2 - HID2)) for g in range(4)],
                           0).reshape(1, GW2)

    return wih1_f, b1_f, whh1_f, wih2_f, whh2_f, b2_f


@jax.jit
def lstm_decoder_forward(x, packed):
    """x: (seq_len, batch, 4) f32 -> (seq_len, 90, batch) f32.

    `packed` = pack_params(params): built once at init, NOT re-packed per call.
    """
    wih1_f, b1_f, whh1_f, wih2_f, whh2_f, b2_f = packed
    L, B, _ = x.shape
    Bp = max(8, ((B + 7) // 8) * 8)   # pad batch to full sublanes
    # Perf note: per-step MXU/EUP cost is identical for B=2 and B=8, so stack
    # independent decode streams so B fills (multiples of) 8 sublanes.
    xp = jnp.pad(x.astype(jnp.bfloat16), ((0, 0), (0, Bp - B), (0, 0)))
    x2d = xp.reshape(L * Bp, IN1)

    out = pl.pallas_call(
        _lstm2_kernel,
        out_shape=jax.ShapeDtypeStruct((L, Bp, GP2), jnp.float32),
        grid_spec=pltpu.PrefetchScalarGridSpec(
            num_scalar_prefetch=0,
            grid=(1,),   # single launch; the time loop lives inside the kernel
            in_specs=[
                pl.BlockSpec((L * Bp, IN1), lambda i: (0, 0)),
                pl.BlockSpec((IN1, GW1), lambda i: (0, 0)),
                pl.BlockSpec((1, GW1), lambda i: (0, 0)),
                pl.BlockSpec((HID1, GW1), lambda i: (0, 0)),
                pl.BlockSpec((HID1, GW2), lambda i: (0, 0)),
                pl.BlockSpec((GP2, GW2), lambda i: (0, 0)),
                pl.BlockSpec((1, GW2), lambda i: (0, 0)),
            ],
            out_specs=pl.BlockSpec((L, Bp, GP2), lambda i: (0, 0, 0)),
            scratch_shapes=[pltpu.VMEM((L * Bp, GW1), jnp.float32)],
        ),
        compiler_params=pltpu.CompilerParams(
            dimension_semantics=("arbitrary",)),
    )(x2d, wih1_f, b1_f, whh1_f, wih2_f, whh2_f, b2_f)

    # Slice off batch / lane padding, then output.permute(0, 2, 1).
    return jnp.transpose(out[:, :B, :HID2], (0, 2, 1))


def init_params(key):
    """Deterministic params mirroring nn.LSTM shapes.

    PyTorch stores weight_ih as (4*hidden, in); we keep them gate-stacked and
    pre-transposed as (4, in, hidden) so layers compute x @ W directly."""
    def u(key, shape, bound):
        return jax.random.uniform(key, shape, jnp.float32, -bound, bound)

    ks = jax.random.split(key, 8)
    b1_bound = 1.0 / jnp.sqrt(HID1)
    b2_bound = 1.0 / jnp.sqrt(HID2)

    wih1 = u(ks[0], (4, IN1, HID1), b1_bound)
    whh1 = u(ks[1], (4, HID1, HID1), b1_bound)
    b1 = u(ks[2], (4, HID1), b1_bound) + u(ks[3], (4, HID1), b1_bound)   # b_ih+b_hh

    wih2 = u(ks[4], (4, HID1, HID2), b2_bound)
    whh2 = u(ks[5], (4, HID2, HID2), b2_bound)
    b2 = u(ks[6], (4, HID2), b2_bound) + u(ks[7], (4, HID2), b2_bound)

    return wih1, whh1, b1, wih2, whh2, b2


def _lstm_layer_ref(x, wih, whh, b, hidden, operand_dtype):
    """Pure-JAX reference LSTM layer (time-major), PyTorch gate order."""
    _, B, _ = x.shape
    prec = lax.Precision.HIGHEST if operand_dtype == jnp.float32 else None

    def mm(a, w):
        return jnp.dot(a.astype(operand_dtype), w.astype(operand_dtype),
                       precision=prec, preferred_element_type=jnp.float32)

    def step(carry, x_t):
        h, c = carry
        zi = mm(x_t, wih[0]) + mm(h, whh[0]) + b[0]
        zf = mm(x_t, wih[1]) + mm(h, whh[1]) + b[1]
        zg = mm(x_t, wih[2]) + mm(h, whh[2]) + b[2]
        zo = mm(x_t, wih[3]) + mm(h, whh[3]) + b[3]
        i = jax.nn.sigmoid(zi)
        f = jax.nn.sigmoid(zf)
        g = jnp.tanh(zg)
        o = jax.nn.sigmoid(zo)
        c_new = f * c + i * g
        h_new = o * jnp.tanh(c_new)
        return (h_new, c_new), h_new

    init = (jnp.zeros((B, hidden), jnp.float32),
            jnp.zeros((B, hidden), jnp.float32))
    _, hs = lax.scan(step, init, x)
    return hs


def lstm_decoder_ref(x, params, operand_dtype=jnp.float32):
    wih1, whh1, b1, wih2, whh2, b2 = params
    h1 = _lstm_layer_ref(x, wih1, whh1, b1, HID1, operand_dtype)
    h2 = _lstm_layer_ref(h1, wih2, whh2, b2, HID2, operand_dtype)
    return jnp.transpose(h2, (0, 2, 1))


if __name__ == "__main__":
    key = jax.random.PRNGKey(0)
    k_x, k_p = jax.random.split(key)

    SEQ, BATCH = 8, 2
    x = jax.random.normal(k_x, (SEQ, BATCH, IN1), jnp.float32)
    params = init_params(k_p)
    packed = pack_params(params)            # one-time; outside the hot path

    out = lstm_decoder_forward(x, packed)
    out = jax.block_until_ready(out)
    assert out.shape == (SEQ, NORMALMAX, BATCH), out.shape

    # Tight check vs a matched-precision reference (bf16 MXU operands, f32
    # accumulation/state) — same arithmetic as the kernel, summation order may
    # differ slightly.
    ref_bf16 = lstm_decoder_ref(x, params, operand_dtype=jnp.bfloat16)
    assert jnp.allclose(out, ref_bf16, atol=5e-3, rtol=0.0), \
        "mismatch vs matched-precision reference"

    # Looser check vs the full-fp32 (PyTorch-semantics) reference; tolerance is
    # loosened because the kernel uses bf16 MXU operands per the perf feedback.
    ref_f32 = lstm_decoder_ref(x, params, operand_dtype=jnp.float32)
    assert jnp.allclose(out, ref_f32, atol=5e-2, rtol=0.0), \
        "mismatch vs fp32 reference"

    print("KERNEL_OK")
</pallas_src>

<mosaic_0001>
module attributes {stable_mosaic.version = 11 : i64} {
  func.func @_lstm2_kernel(%arg0: i32, %arg1: memref<64x4xbf16, #tpu.memory_space<vmem>>, %arg2: memref<4x64xbf16, #tpu.memory_space<vmem>>, %arg3: memref<1x64xf32, #tpu.memory_space<vmem>>, %arg4: memref<16x64xbf16, #tpu.memory_space<vmem>>, %arg5: memref<16x512xbf16, #tpu.memory_space<vmem>>, %arg6: memref<128x512xbf16, #tpu.memory_space<vmem>>, %arg7: memref<1x512xf32, #tpu.memory_space<vmem>>, %arg8: memref<8x8x128xf32, #tpu.memory_space<vmem>>, %arg9: memref<64x64xf32, #tpu.memory_space<vmem>>) attributes {dimension_semantics = [#tpu.dimension_semantics<arbitrary>], iteration_bounds = array<i64: 1>, scalar_prefetch = 0 : i64, scratch_operands = 1 : i64, tpu.core_type = #tpu.core_type<tc>, window_params = [{pipeline_mode = #tpu.pipeline_mode<synchronous>, transform_indices = @transform_0, window_bounds = array<i64: 64, 4>}, {pipeline_mode = #tpu.pipeline_mode<synchronous>, transform_indices = @transform_1, window_bounds = array<i64: 4, 64>}, {pipeline_mode = #tpu.pipeline_mode<synchronous>, transform_indices = @transform_2, window_bounds = array<i64: 1, 64>}, {pipeline_mode = #tpu.pipeline_mode<synchronous>, transform_indices = @transform_3, window_bounds = array<i64: 16, 64>}, {pipeline_mode = #tpu.pipeline_mode<synchronous>, transform_indices = @transform_4, window_bounds = array<i64: 16, 512>}, {pipeline_mode = #tpu.pipeline_mode<synchronous>, transform_indices = @transform_5, window_bounds = array<i64: 128, 512>}, {pipeline_mode = #tpu.pipeline_mode<synchronous>, transform_indices = @transform_6, window_bounds = array<i64: 1, 512>}, {pipeline_mode = #tpu.pipeline_mode<synchronous>, transform_indices = @transform_7, window_bounds = array<i64: 8, 8, 128>}]} {
    %c0 = arith.constant 0 : index
    %c0_0 = arith.constant 0 : index
    %0 = vector.load %arg1[%c0, %c0_0] : memref<64x4xbf16, #tpu.memory_space<vmem>>, vector<64x4xbf16>
    %c0_1 = arith.constant 0 : index
    %c0_2 = arith.constant 0 : index
    %1 = vector.load %arg2[%c0_1, %c0_2] : memref<4x64xbf16, #tpu.memory_space<vmem>>, vector<4x64xbf16>
    %cst = arith.constant dense<0.000000e+00> : vector<64x64xf32>
    %2 = tpu.matmul %0, %1, %cst {dimension_numbers = #tpu.dot_dimension_numbers<[1], [0], [0], [1], [0, 0, 1, 1], [], []>} : vector<64x4xbf16>, vector<4x64xbf16>, vector<64x64xf32> -> vector<64x64xf32>
    %c0_3 = arith.constant 0 : index
    %c0_4 = arith.constant 0 : index
    %3 = vector.load %arg3[%c0_3, %c0_4] : memref<1x64xf32, #tpu.memory_space<vmem>>, vector<1x64xf32>
    %4 = vector.broadcast %3 : vector<1x64xf32> to vector<64x64xf32>
    %5 = arith.addf %2, %4 : vector<64x64xf32>
    %c0_5 = arith.constant 0 : index
    %c0_6 = arith.constant 0 : index
    %6 = vector.load %arg9[%c0_5, %c0_6] : memref<64x64xf32, #tpu.memory_space<vmem>>, vector<64x64xf32>
    tpu.vector_store %arg9[%c0_5, %c0_6], %5 {strides = array<i32>} : memref<64x64xf32, #tpu.memory_space<vmem>>, vector<64x64xf32>,
    %c0_7 = arith.constant 0 : index
    %c0_8 = arith.constant 0 : index
    %7 = vector.load %arg7[%c0_7, %c0_8] : memref<1x512xf32, #tpu.memory_space<vmem>>, vector<1x512xf32>
    %8 = vector.shape_cast %7 : vector<1x512xf32> to vector<1x512xf32>
    %9 = vector.broadcast %8 : vector<1x512xf32> to vector<8x512xf32>
    %cst_9 = arith.constant 0.000000e+00 : f32
    %10 = vector.broadcast %cst_9 : f32 to vector<8x16xf32>
    %cst_10 = arith.constant 0.000000e+00 : f32
    %11 = vector.broadcast %cst_10 : f32 to vector<8x128xf32>
    %c0_i32 = arith.constant 0 : i32
    %12 = arith.truncf %11 : vector<8x128xf32> to vector<8x128xbf16>
    %c0_11 = arith.constant 0 : index
    %c0_12 = arith.constant 0 : index
    %13 = vector.load %arg6[%c0_11, %c0_12] : memref<128x512xbf16, #tpu.memory_space<vmem>>, vector<128x512xbf16>
    %cst_13 = arith.constant dense<0.000000e+00> : vector<8x512xf32>
    %14 = tpu.matmul %12, %13, %cst_13 {dimension_numbers = #tpu.dot_dimension_numbers<[1], [0], [0], [1], [0, 0, 1, 1], [], []>} : vector<8x128xbf16>, vector<128x512xbf16>, vector<8x512xf32> -> vector<8x512xf32>
    %15 = arith.addf %14, %9 : vector<8x512xf32>
    %c8_i32 = arith.constant 8 : i32
    %16 = arith.muli %c0_i32, %c8_i32 : i32
    %17 = tpu.assume_multiple %16, 8 : i32
    %18 = arith.index_cast %17 : i32 to index
    %c0_14 = arith.constant 0 : index
    %19 = vector.load %arg9[%18, %c0_14] : memref<64x64xf32, #tpu.memory_space<vmem>>, vector<8x64xf32>
    %20 = arith.truncf %10 : vector<8x16xf32> to vector<8x16xbf16>
    %c0_15 = arith.constant 0 : index
    %c0_16 = arith.constant 0 : index
    %21 = vector.load %arg4[%c0_15, %c0_16] : memref<16x64xbf16, #tpu.memory_space<vmem>>, vector<16x64xbf16>
    %cst_17 = arith.constant dense<0.000000e+00> : vector<8x64xf32>
    %22 = tpu.matmul %20, %21, %cst_17 {dimension_numbers = #tpu.dot_dimension_numbers<[1], [0], [0], [1], [0, 0, 1, 1], [], []>} : vector<8x16xbf16>, vector<16x64xbf16>, vector<8x64xf32> -> vector<8x64xf32>
    %23 = arith.addf %19, %22 : vector<8x64xf32>
    %24 = vector.extract_strided_slice %23 {offsets = [0, 0], sizes = [8, 16], strides = [1, 1]} : vector<8x64xf32> to vector<8x16xf32>
    %cst_18 = arith.constant 5.000000e-01 : f32
    %25 = vector.broadcast %cst_18 : f32 to vector<8x16xf32>
    %26 = arith.mulf %25, %24 : vector<8x16xf32>
    %27 = math.tanh %26 : vector<8x16xf32>
    %cst_19 = arith.constant 5.000000e-01 : f32
    %28 = vector.broadcast %cst_19 : f32 to vector<8x16xf32>
    %29 = arith.mulf %28, %27 : vector<8x16xf32>
    %cst_20 = arith.constant 5.000000e-01 : f32
    %30 = vector.broadcast %cst_20 : f32 to vector<8x16xf32>
    %31 = arith.addf %29, %30 : vector<8x16xf32>
    %32 = vector.extract_strided_slice %23 {offsets = [0, 16], sizes = [8, 16], strides = [1, 1]} : vector<8x64xf32> to vector<8x16xf32>
    %cst_21 = arith.constant 5.000000e-01 : f32
    %33 = vector.broadcast %cst_21 : f32 to vector<8x16xf32>
    %34 = arith.mulf %33, %32 : vector<8x16xf32>
    %35 = math.tanh %34 : vector<8x16xf32>
    %cst_22 = arith.constant 5.000000e-01 : f32
    %36 = vector.broadcast %cst_22 : f32 to vector<8x16xf32>
    %37 = arith.mulf %36, %35 : vector<8x16xf32>
    %cst_23 = arith.constant 5.000000e-01 : f32
    %38 = vector.broadcast %cst_23 : f32 to vector<8x16xf32>
    %39 = arith.addf %37, %38 : vector<8x16xf32>
    %40 = vector.extract_strided_slice %23 {offsets = [0, 32], sizes = [8, 16], strides = [1, 1]} : vector<8x64xf32> to vector<8x16xf32>
    %41 = math.tanh %40 : vector<8x16xf32>
    %42 = vector.extract_strided_slice %23 {offsets = [0, 48], sizes = [8, 16], strides = [1, 1]} : vector<8x64xf32> to vector<8x16xf32>
    %cst_24 = arith.constant 5.000000e-01 : f32
    %43 = vector.broadcast %cst_24 : f32 to vector<8x16xf32>
    %44 = arith.mulf %43, %42 : vector<8x16xf32>
    %45 = math.tanh %44 : vector<8x16xf32>
    %cst_25 = arith.constant 5.000000e-01 : f32
    %46 = vector.broadcast %cst_25 : f32 to vector<8x16xf32>
    %47 = arith.mulf %46, %45 : vector<8x16xf32>
    %cst_26 = arith.constant 5.000000e-01 : f32
    %48 = vector.broadcast %cst_26 : f32 to vector<8x16xf32>
    %49 = arith.addf %47, %48 : vector<8x16xf32>
    %50 = arith.mulf %39, %10 : vector<8x16xf32>
    %51 = arith.mulf %31, %41 : vector<8x16xf32>
    %52 = arith.addf %50, %51 : vector<8x16xf32>
    %53 = math.tanh %52 : vector<8x16xf32>
    %54 = arith.mulf %49, %53 : vector<8x16xf32>
    %55 = arith.truncf %54 : vector<8x16xf32> to vector<8x16xbf16>
    %c0_27 = arith.constant 0 : index
    %c0_28 = arith.constant 0 : index
    %56 = vector.load %arg5[%c0_27, %c0_28] : memref<16x512xbf16, #tpu.memory_space<vmem>>, vector<16x512xbf16>
    %cst_29 = arith.constant dense<0.000000e+00> : vector<8x512xf32>
    %57 = tpu.matmul %55, %56, %cst_29 {dimension_numbers = #tpu.dot_dimension_numbers<[1], [0], [0], [1], [0, 0, 1, 1], [], []>} : vector<8x16xbf16>, vector<16x512xbf16>, vector<8x512xf32> -> vector<8x512xf32>
    %58 = arith.addf %57, %15 : vector<8x512xf32>
    %59 = vector.extract_strided_slice %58 {offsets = [0, 0], sizes = [8, 128], strides = [1, 1]} : vector<8x512xf32> to vector<8x128xf32>
    %cst_30 = arith.constant 5.000000e-01 : f32
    %60 = vector.broadcast %cst_30 : f32 to vector<8x128xf32>
    %61 = arith.mulf %60, %59 : vector<8x128xf32>
    %62 = math.tanh %61 : vector<8x128xf32>
    %cst_31 = arith.constant 5.000000e-01 : f32
    %63 = vector.broadcast %cst_31 : f32 to vector<8x128xf32>
    %64 = arith.mulf %63, %62 : vector<8x128xf32>
    %cst_32 = arith.constant 5.000000e-01 : f32
    %65 = vector.broadcast %cst_32 : f32 to vector<8x128xf32>
    %66 = arith.addf %64, %65 : vector<8x128xf32>
    %67 = vector.extract_strided_slice %58 {offsets = [0, 128], sizes = [8, 128], strides = [1, 1]} : vector<8x512xf32> to vector<8x128xf32>
    %cst_33 = arith.constant 5.000000e-01 : f32
    %68 = vector.broadcast %cst_33 : f32 to vector<8x128xf32>
    %69 = arith.mulf %68, %67 : vector<8x128xf32>
    %70 = math.tanh %69 : vector<8x128xf32>
    %cst_34 = arith.constant 5.000000e-01 : f32
    %71 = vector.broadcast %cst_34 : f32 to vector<8x128xf32>
    %72 = arith.mulf %71, %70 : vector<8x128xf32>
    %cst_35 = arith.constant 5.000000e-01 : f32
    %73 = vector.broadcast %cst_35 : f32 to vector<8x128xf32>
    %74 = arith.addf %72, %73 : vector<8x128xf32>
    %75 = vector.extract_strided_slice %58 {offsets = [0, 256], sizes = [8, 128], strides = [1, 1]} : vector<8x512xf32> to vector<8x128xf32>
    %76 = math.tanh %75 : vector<8x128xf32>
    %77 = vector.extract_strided_slice %58 {offsets = [0, 384], sizes = [8, 128], strides = [1, 1]} : vector<8x512xf32> to vector<8x128xf32>
    %cst_36 = arith.constant 5.000000e-01 : f32
    %78 = vector.broadcast %cst_36 : f32 to vector<8x128xf32>
    %79 = arith.mulf %78, %77 : vector<8x128xf32>
    %80 = math.tanh %79 : vector<8x128xf32>
    %cst_37 = arith.constant 5.000000e-01 : f32
    %81 = vector.broadcast %cst_37 : f32 to vector<8x128xf32>
    %82 = arith.mulf %81, %80 : vector<8x128xf32>
    %cst_38 = arith.constant 5.000000e-01 : f32
    %83 = vector.broadcast %cst_38 : f32 to vector<8x128xf32>
    %84 = arith.addf %82, %83 : vector<8x128xf32>
    %85 = arith.mulf %74, %11 : vector<8x128xf32>
    %86 = arith.mulf %66, %76 : vector<8x128xf32>
    %87 = arith.addf %85, %86 : vector<8x128xf32>
    %88 = math.tanh %87 : vector<8x128xf32>
    %89 = arith.mulf %84, %88 : vector<8x128xf32>
    %90 = arith.index_cast %c0_i32 : i32 to index
    %c0_39 = arith.constant 0 : index
    %c0_40 = arith.constant 0 : index
    %91 = vector.load %arg8[%90, %c0_39, %c0_40] : memref<8x8x128xf32, #tpu.memory_space<vmem>>, vector<1x8x128xf32>
    %92 = vector.shape_cast %91 : vector<1x8x128xf32> to vector<8x128xf32>
    %93 = vector.shape_cast %89 : vector<8x128xf32> to vector<1x8x128xf32>
    tpu.vector_store %arg8[%90, %c0_39, %c0_40], %93 {strides = array<i32>} : memref<8x8x128xf32, #tpu.memory_space<vmem>>, vector<1x8x128xf32>,
    %c1_i32 = arith.constant 1 : i32
    %94 = arith.truncf %89 : vector<8x128xf32> to vector<8x128xbf16>
    %c0_41 = arith.constant 0 : index
    %c0_42 = arith.constant 0 : index
    %95 = vector.load %arg6[%c0_41, %c0_42] : memref<128x512xbf16, #tpu.memory_space<vmem>>, vector<128x512xbf16>
    %cst_43 = arith.constant dense<0.000000e+00> : vector<8x512xf32>
    %96 = tpu.matmul %94, %95, %cst_43 {dimension_numbers = #tpu.dot_dimension_numbers<[1], [0], [0], [1], [0, 0, 1, 1], [], []>} : vector<8x128xbf16>, vector<128x512xbf16>, vector<8x512xf32> -> vector<8x512xf32>
    %97 = arith.addf %96, %9 : vector<8x512xf32>
    %c8_i32_44 = arith.constant 8 : i32
    %98 = arith.muli %c1_i32, %c8_i32_44 : i32
    %99 = tpu.assume_multiple %98, 8 : i32
    %100 = arith.index_cast %99 : i32 to index
    %c0_45 = arith.constant 0 : index
    %101 = vector.load %arg9[%100, %c0_45] : memref<64x64xf32, #tpu.memory_space<vmem>>, vector<8x64xf32>
    %102 = arith.truncf %54 : vector<8x16xf32> to vector<8x16xbf16>
    %c0_46 = arith.constant 0 : index
    %c0_47 = arith.constant 0 : index
    %103 = vector.load %arg4[%c0_46, %c0_47] : memref<16x64xbf16, #tpu.memory_space<vmem>>, vector<16x64xbf16>
    %cst_48 = arith.constant dense<0.000000e+00> : vector<8x64xf32>
    %104 = tpu.matmul %102, %103, %cst_48 {dimension_numbers = #tpu.dot_dimension_numbers<[1], [0], [0], [1], [0, 0, 1, 1], [], []>} : vector<8x16xbf16>, vector<16x64xbf16>, vector<8x64xf32> -> vector<8x64xf32>
    %105 = arith.addf %101, %104 : vector<8x64xf32>
    %106 = vector.extract_strided_slice %105 {offsets = [0, 0], sizes = [8, 16], strides = [1, 1]} : vector<8x64xf32> to vector<8x16xf32>
    %cst_49 = arith.constant 5.000000e-01 : f32
    %107 = vector.broadcast %cst_49 : f32 to vector<8x16xf32>
    %108 = arith.mulf %107, %106 : vector<8x16xf32>
    %109 = math.tanh %108 : vector<8x16xf32>
    %cst_50 = arith.constant 5.000000e-01 : f32
    %110 = vector.broadcast %cst_50 : f32 to vector<8x16xf32>
    %111 = arith.mulf %110, %109 : vector<8x16xf32>
    %cst_51 = arith.constant 5.000000e-01 : f32
    %112 = vector.broadcast %cst_51 : f32 to vector<8x16xf32>
    %113 = arith.addf %111, %112 : vector<8x16xf32>
    %114 = vector.extract_strided_slice %105 {offsets = [0, 16], sizes = [8, 16], strides = [1, 1]} : vector<8x64xf32> to vector<8x16xf32>
    %cst_52 = arith.constant 5.000000e-01 : f32
    %115 = vector.broadcast %cst_52 : f32 to vector<8x16xf32>
    %116 = arith.mulf %115, %114 : vector<8x16xf32>
    %117 = math.tanh %116 : vector<8x16xf32>
    %cst_53 = arith.constant 5.000000e-01 : f32
    %118 = vector.broadcast %cst_53 : f32 to vector<8x16xf32>
    %119 = arith.mulf %118, %117 : vector<8x16xf32>
    %cst_54 = arith.constant 5.000000e-01 : f32
    %120 = vector.broadcast %cst_54 : f32 to vector<8x16xf32>
    %121 = arith.addf %119, %120 : vector<8x16xf32>
    %122 = vector.extract_strided_slice %105 {offsets = [0, 32], sizes = [8, 16], strides = [1, 1]} : vector<8x64xf32> to vector<8x16xf32>
    %123 = math.tanh %122 : vector<8x16xf32>
    %124 = vector.extract_strided_slice %105 {offsets = [0, 48], sizes = [8, 16], strides = [1, 1]} : vector<8x64xf32> to vector<8x16xf32>
    %cst_55 = arith.constant 5.000000e-01 : f32
    %125 = vector.broadcast %cst_55 : f32 to vector<8x16xf32>
    %126 = arith.mulf %125, %124 : vector<8x16xf32>
    %127 = math.tanh %126 : vector<8x16xf32>
    %cst_56 = arith.constant 5.000000e-01 : f32
    %128 = vector.broadcast %cst_56 : f32 to vector<8x16xf32>
    %129 = arith.mulf %128, %127 : vector<8x16xf32>
    %cst_57 = arith.constant 5.000000e-01 : f32
    %130 = vector.broadcast %cst_57 : f32 to vector<8x16xf32>
    %131 = arith.addf %129, %130 : vector<8x16xf32>
    %132 = arith.mulf %121, %52 : vector<8x16xf32>
    %133 = arith.mulf %113, %123 : vector<8x16xf32>
    %134 = arith.addf %132, %133 : vector<8x16xf32>
    %135 = math.tanh %134 : vector<8x16xf32>
    %136 = arith.mulf %131, %135 : vector<8x16xf32>
    %137 = arith.truncf %136 : vector<8x16xf32> to vector<8x16xbf16>
    %c0_58 = arith.constant 0 : index
    %c0_59 = arith.constant 0 : index
    %138 = vector.load %arg5[%c0_58, %c0_59] : memref<16x512xbf16, #tpu.memory_space<vmem>>, vector<16x512xbf16>
    %cst_60 = arith.constant dense<0.000000e+00> : vector<8x512xf32>
    %139 = tpu.matmul %137, %138, %cst_60 {dimension_numbers = #tpu.dot_dimension_numbers<[1], [0], [0], [1], [0, 0, 1, 1], [], []>} : vector<8x16xbf16>, vector<16x512xbf16>, vector<8x512xf32> -> vector<8x512xf32>
    %140 = arith.addf %139, %97 : vector<8x512xf32>
    %141 = vector.extract_strided_slice %140 {offsets = [0, 0], sizes = [8, 128], strides = [1, 1]} : vector<8x512xf32> to vector<8x128xf32>
    %cst_61 = arith.constant 5.000000e-01 : f32
    %142 = vector.broadcast %cst_61 : f32 to vector<8x128xf32>
    %143 = arith.mulf %142, %141 : vector<8x128xf32>
    %144 = math.tanh %143 : vector<8x128xf32>
    %cst_62 = arith.constant 5.000000e-01 : f32
    %145 = vector.broadcast %cst_62 : f32 to vector<8x128xf32>
    %146 = arith.mulf %145, %144 : vector<8x128xf32>
    %cst_63 = arith.constant 5.000000e-01 : f32
    %147 = vector.broadcast %cst_63 : f32 to vector<8x128xf32>
    %148 = arith.addf %146, %147 : vector<8x128xf32>
    %149 = vector.extract_strided_slice %140 {offsets = [0, 128], sizes = [8, 128], strides = [1, 1]} : vector<8x512xf32> to vector<8x128xf32>
    %cst_64 = arith.constant 5.000000e-01 : f32
    %150 = vector.broadcast %cst_64 : f32 to vector<8x128xf32>
    %151 = arith.mulf %150, %149 : vector<8x128xf32>
    %152 = math.tanh %151 : vector<8x128xf32>
    %cst_65 = arith.constant 5.000000e-01 : f32
    %153 = vector.broadcast %cst_65 : f32 to vector<8x128xf32>
    %154 = arith.mulf %153, %152 : vector<8x128xf32>
    %cst_66 = arith.constant 5.000000e-01 : f32
    %155 = vector.broadcast %cst_66 : f32 to vector<8x128xf32>
    %156 = arith.addf %154, %155 : vector<8x128xf32>
    %157 = vector.extract_strided_slice %140 {offsets = [0, 256], sizes = [8, 128], strides = [1, 1]} : vector<8x512xf32> to vector<8x128xf32>
    %158 = math.tanh %157 : vector<8x128xf32>
    %159 = vector.extract_strided_slice %140 {offsets = [0, 384], sizes = [8, 128], strides = [1, 1]} : vector<8x512xf32> to vector<8x128xf32>
    %cst_67 = arith.constant 5.000000e-01 : f32
    %160 = vector.broadcast %cst_67 : f32 to vector<8x128xf32>
    %161 = arith.mulf %160, %159 : vector<8x128xf32>
    %162 = math.tanh %161 : vector<8x128xf32>
    %cst_68 = arith.constant 5.000000e-01 : f32
    %163 = vector.broadcast %cst_68 : f32 to vector<8x128xf32>
    %164 = arith.mulf %163, %162 : vector<8x128xf32>
    %cst_69 = arith.constant 5.000000e-01 : f32
    %165 = vector.broadcast %cst_69 : f32 to vector<8x128xf32>
    %166 = arith.addf %164, %165 : vector<8x128xf32>
    %167 = arith.mulf %156, %87 : vector<8x128xf32>
    %168 = arith.mulf %148, %158 : vector<8x128xf32>
    %169 = arith.addf %167, %168 : vector<8x128xf32>
    %170 = math.tanh %169 : vector<8x128xf32>
    %171 = arith.mulf %166, %170 : vector<8x128xf32>
    %172 = arith.index_cast %c1_i32 : i32 to index
    %c0_70 = arith.constant 0 : index
    %c0_71 = arith.constant 0 : index
    %173 = vector.load %arg8[%172, %c0_70, %c0_71] : memref<8x8x128xf32, #tpu.memory_space<vmem>>, vector<1x8x128xf32>
    %174 = vector.shape_cast %173 : vector<1x8x128xf32> to vector<8x128xf32>
    %175 = vector.shape_cast %171 : vector<8x128xf32> to vector<1x8x128xf32>
    tpu.vector_store %arg8[%172, %c0_70, %c0_71], %175 {strides = array<i32>} : memref<8x8x128xf32, #tpu.memory_space<vmem>>, vector<1x8x128xf32>,
    %c2_i32 = arith.constant 2 : i32
    %176 = arith.truncf %171 : vector<8x128xf32> to vector<8x128xbf16>
    %c0_72 = arith.constant 0 : index
    %c0_73 = arith.constant 0 : index
    %177 = vector.load %arg6[%c0_72, %c0_73] : memref<128x512xbf16, #tpu.memory_space<vmem>>, vector<128x512xbf16>
    %cst_74 = arith.constant dense<0.000000e+00> : vector<8x512xf32>
    %178 = tpu.matmul %176, %177, %cst_74 {dimension_numbers = #tpu.dot_dimension_numbers<[1], [0], [0], [1], [0, 0, 1, 1], [], []>} : vector<8x128xbf16>, vector<128x512xbf16>, vector<8x512xf32> -> vector<8x512xf32>
    %179 = arith.addf %178, %9 : vector<8x512xf32>
    %c8_i32_75 = arith.constant 8 : i32
    %180 = arith.muli %c2_i32, %c8_i32_75 : i32
    %181 = tpu.assume_multiple %180, 8 : i32
    %182 = arith.index_cast %181 : i32 to index
    %c0_76 = arith.constant 0 : index
    %183 = vector.load %arg9[%182, %c0_76] : memref<64x64xf32, #tpu.memory_space<vmem>>, vector<8x64xf32>
    %184 = arith.truncf %136 : vector<8x16xf32> to vector<8x16xbf16>
    %c0_77 = arith.constant 0 : index
    %c0_78 = arith.constant 0 : index
    %185 = vector.load %arg4[%c0_77, %c0_78] : memref<16x64xbf16, #tpu.memory_space<vmem>>, vector<16x64xbf16>
    %cst_79 = arith.constant dense<0.000000e+00> : vector<8x64xf32>
    %186 = tpu.matmul %184, %185, %cst_79 {dimension_numbers = #tpu.dot_dimension_numbers<[1], [0], [0], [1], [0, 0, 1, 1], [], []>} : vector<8x16xbf16>, vector<16x64xbf16>, vector<8x64xf32> -> vector<8x64xf32>
    %187 = arith.addf %183, %186 : vector<8x64xf32>
    %188 = vector.extract_strided_slice %187 {offsets = [0, 0], sizes = [8, 16], strides = [1, 1]} : vector<8x64xf32> to vector<8x16xf32>
    %cst_80 = arith.constant 5.000000e-01 : f32
    %189 = vector.broadcast %cst_80 : f32 to vector<8x16xf32>
    %190 = arith.mulf %189, %188 : vector<8x16xf32>
    %191 = math.tanh %190 : vector<8x16xf32>
    %cst_81 = arith.constant 5.000000e-01 : f32
    %192 = vector.broadcast %cst_81 : f32 to vector<8x16xf32>
    %193 = arith.mulf %192, %191 : vector<8x16xf32>
    %cst_82 = arith.constant 5.000000e-01 : f32
    %194 = vector.broadcast %cst_82 : f32 to vector<8x16xf32>
    %195 = arith.addf %193, %194 : vector<8x16xf32>
    %196 = vector.extract_strided_slice %187 {offsets = [0, 16], sizes = [8, 16], strides = [1, 1]} : vector<8x64xf32> to vector<8x16xf32>
    %cst_83 = arith.constant 5.000000e-01 : f32
    %197 = vector.broadcast %cst_83 : f32 to vector<8x16xf32>
    %198 = arith.mulf %197, %196 : vector<8x16xf32>
    %199 = math.tanh %198 : vector<8x16xf32>
    %cst_84 = arith.constant 5.000000e-01 : f32
    %200 = vector.broadcast %cst_84 : f32 to vector<8x16xf32>
    %201 = arith.mulf %200, %199 : vector<8x16xf32>
    %cst_85 = arith.constant 5.000000e-01 : f32
    %202 = vector.broadcast %cst_85 : f32 to vector<8x16xf32>
    %203 = arith.addf %201, %202 : vector<8x16xf32>
    %204 = vector.extract_strided_slice %187 {offsets = [0, 32], sizes = [8, 16], strides = [1, 1]} : vector<8x64xf32> to vector<8x16xf32>
    %205 = math.tanh %204 : vector<8x16xf32>
    %206 = vector.extract_strided_slice %187 {offsets = [0, 48], sizes = [8, 16], strides = [1, 1]} : vector<8x64xf32> to vector<8x16xf32>
    %cst_86 = arith.constant 5.000000e-01 : f32
    %207 = vector.broadcast %cst_86 : f32 to vector<8x16xf32>
    %208 = arith.mulf %207, %206 : vector<8x16xf32>
    %209 = math.tanh %208 : vector<8x16xf32>
    %cst_87 = arith.constant 5.000000e-01 : f32
    %210 = vector.broadcast %cst_87 : f32 to vector<8x16xf32>
    %211 = arith.mulf %210, %209 : vector<8x16xf32>
    %cst_88 = arith.constant 5.000000e-01 : f32
    %212 = vector.broadcast %cst_88 : f32 to vector<8x16xf32>
    %213 = arith.addf %211, %212 : vector<8x16xf32>
    %214 = arith.mulf %203, %134 : vector<8x16xf32>
    %215 = arith.mulf %195, %205 : vector<8x16xf32>
    %216 = arith.addf %214, %215 : vector<8x16xf32>
    %217 = math.tanh %216 : vector<8x16xf32>
    %218 = arith.mulf %213, %217 : vector<8x16xf32>
    %219 = arith.truncf %218 : vector<8x16xf32> to vector<8x16xbf16>
    %c0_89 = arith.constant 0 : index
    %c0_90 = arith.constant 0 : index
    %220 = vector.load %arg5[%c0_89, %c0_90] : memref<16x512xbf16, #tpu.memory_space<vmem>>, vector<16x512xbf16>
    %cst_91 = arith.constant dense<0.000000e+00> : vector<8x512xf32>
    %221 = tpu.matmul %219, %220, %cst_91 {dimension_numbers = #tpu.dot_dimension_numbers<[1], [0], [0], [1], [0, 0, 1, 1], [], []>} : vector<8x16xbf16>, vector<16x512xbf16>, vector<8x512xf32> -> vector<8x512xf32>
    %222 = arith.addf %221, %179 : vector<8x512xf32>
    %223 = vector.extract_strided_slice %222 {offsets = [0, 0], sizes = [8, 128], strides = [1, 1]} : vector<8x512xf32> to vector<8x128xf32>
    %cst_92 = arith.constant 5.000000e-01 : f32
    %224 = vector.broadcast %cst_92 : f32 to vector<8x128xf32>
    %225 = arith.mulf %224, %223 : vector<8x128xf32>
    %226 = math.tanh %225 : vector<8x128xf32>
    %cst_93 = arith.constant 5.000000e-01 : f32
    %227 = vector.broadcast %cst_93 : f32 to vector<8x128xf32>
    %228 = arith.mulf %227, %226 : vector<8x128xf32>
    %cst_94 = arith.constant 5.000000e-01 : f32
    %229 = vector.broadcast %cst_94 : f32 to vector<8x128xf32>
    %230 = arith.addf %228, %229 : vector<8x128xf32>
    %231 = vector.extract_strided_slice %222 {offsets = [0, 128], sizes = [8, 128], strides = [1, 1]} : vector<8x512xf32> to vector<8x128xf32>
    %cst_95 = arith.constant 5.000000e-01 : f32
    %232 = vector.broadcast %cst_95 : f32 to vector<8x128xf32>
    %233 = arith.mulf %232, %231 : vector<8x128xf32>
    %234 = math.tanh %233 : vector<8x128xf32>
    %cst_96 = arith.constant 5.000000e-01 : f32
    %235 = vector.broadcast %cst_96 : f32 to vector<8x128xf32>
    %236 = arith.mulf %235, %234 : vector<8x128xf32>
    %cst_97 = arith.constant 5.000000e-01 : f32
    %237 = vector.broadcast %cst_97 : f32 to vector<8x128xf32>
    %238 = arith.addf %236, %237 : vector<8x128xf32>
    %239 = vector.extract_strided_slice %222 {offsets = [0, 256], sizes = [8, 128], strides = [1, 1]} : vector<8x512xf32> to vector<8x128xf32>
    %240 = math.tanh %239 : vector<8x128xf32>
    %241 = vector.extract_strided_slice %222 {offsets = [0, 384], sizes = [8, 128], strides = [1, 1]} : vector<8x512xf32> to vector<8x128xf32>
    %cst_98 = arith.constant 5.000000e-01 : f32
    %242 = vector.broadcast %cst_98 : f32 to vector<8x128xf32>
    %243 = arith.mulf %242, %241 : vector<8x128xf32>
    %244 = math.tanh %243 : vector<8x128xf32>
    %cst_99 = arith.constant 5.000000e-01 : f32
    %245 = vector.broadcast %cst_99 : f32 to vector<8x128xf32>
    %246 = arith.mulf %245, %244 : vector<8x128xf32>
    %cst_100 = arith.constant 5.000000e-01 : f32
    %247 = vector.broadcast %cst_100 : f32 to vector<8x128xf32>
    %248 = arith.addf %246, %247 : vector<8x128xf32>
    %249 = arith.mulf %238, %169 : vector<8x128xf32>
    %250 = arith.mulf %230, %240 : vector<8x128xf32>
    %251 = arith.addf %249, %250 : vector<8x128xf32>
    %252 = math.tanh %251 : vector<8x128xf32>
    %253 = arith.mulf %248, %252 : vector<8x128xf32>
    %254 = arith.index_cast %c2_i32 : i32 to index
    %c0_101 = arith.constant 0 : index
    %c0_102 = arith.constant 0 : index
    %255 = vector.load %arg8[%254, %c0_101, %c0_102] : memref<8x8x128xf32, #tpu.memory_space<vmem>>, vector<1x8x128xf32>
    %256 = vector.shape_cast %255 : vector<1x8x128xf32> to vector<8x128xf32>
    %257 = vector.shape_cast %253 : vector<8x128xf32> to vector<1x8x128xf32>
    tpu.vector_store %arg8[%254, %c0_101, %c0_102], %257 {strides = array<i32>} : memref<8x8x128xf32, #tpu.memory_space<vmem>>, vector<1x8x128xf32>,
    %c3_i32 = arith.constant 3 : i32
    %258 = arith.truncf %253 : vector<8x128xf32> to vector<8x128xbf16>
    %c0_103 = arith.constant 0 : index
    %c0_104 = arith.constant 0 : index
    %259 = vector.load %arg6[%c0_103, %c0_104] : memref<128x512xbf16, #tpu.memory_space<vmem>>, vector<128x512xbf16>
    %cst_105 = arith.constant dense<0.000000e+00> : vector<8x512xf32>
    %260 = tpu.matmul %258, %259, %cst_105 {dimension_numbers = #tpu.dot_dimension_numbers<[1], [0], [0], [1], [0, 0, 1, 1], [], []>} : vector<8x128xbf16>, vector<128x512xbf16>, vector<8x512xf32> -> vector<8x512xf32>
    %261 = arith.addf %260, %9 : vector<8x512xf32>
    %c8_i32_106 = arith.constant 8 : i32
    %262 = arith.muli %c3_i32, %c8_i32_106 : i32
    %263 = tpu.assume_multiple %262, 8 : i32
    %264 = arith.index_cast %263 : i32 to index
    %c0_107 = arith.constant 0 : index
    %265 = vector.load %arg9[%264, %c0_107] : memref<64x64xf32, #tpu.memory_space<vmem>>, vector<8x64xf32>
    %266 = arith.truncf %218 : vector<8x16xf32> to vector<8x16xbf16>
    %c0_108 = arith.constant 0 : index
    %c0_109 = arith.constant 0 : index
    %267 = vector.load %arg4[%c0_108, %c0_109] : memref<16x64xbf16, #tpu.memory_space<vmem>>, vector<16x64xbf16>
    %cst_110 = arith.constant dense<0.000000e+00> : vector<8x64xf32>
    %268 = tpu.matmul %266, %267, %cst_110 {dimension_numbers = #tpu.dot_dimension_numbers<[1], [0], [0], [1], [0, 0, 1, 1], [], []>} : vector<8x16xbf16>, vector<16x64xbf16>, vector<8x64xf32> -> vector<8x64xf32>
    %269 = arith.addf %265, %268 : vector<8x64xf32>
    %270 = vector.extract_strided_slice %269 {offsets = [0, 0], sizes = [8, 16], strides = [1, 1]} : vector<8x64xf32> to vector<8x16xf32>
    %cst_111 = arith.constant 5.000000e-01 : f32
    %271 = vector.broadcast %cst_111 : f32 to vector<8x16xf32>
    %272 = arith.mulf %271, %270 : vector<8x16xf32>
    %273 = math.tanh %272 : vector<8x16xf32>
    %cst_112 = arith.constant 5.000000e-01 : f32
    %274 = vector.broadcast %cst_112 : f32 to vector<8x16xf32>
    %275 = arith.mulf %274, %273 : vector<8x16xf32>
    %cst_113 = arith.constant 5.000000e-01 : f32
    %276 = vector.broadcast %cst_113 : f32 to vector<8x16xf32>
    %277 = arith.addf %275, %276 : vector<8x16xf32>
    %278 = vector.extract_strided_slice %269 {offsets = [0, 16], sizes = [8, 16], strides = [1, 1]} : vector<8x64xf32> to vector<8x16xf32>
    %cst_114 = arith.constant 5.000000e-01 : f32
    %279 = vector.broadcast %cst_114 : f32 to vector<8x16xf32>
    %280 = arith.mulf %279, %278 : vector<8x16xf32>
    %281 = math.tanh %280 : vector<8x16xf32>
    %cst_115 = arith.constant 5.000000e-01 : f32
    %282 = vector.broadcast %cst_115 : f32 to vector<8x16xf32>
    %283 = arith.mulf %282, %281 : vector<8x16xf32>
    %cst_116 = arith.constant 5.000000e-01 : f32
    %284 = vector.broadcast %cst_116 : f32 to vector<8x16xf32>
    %285 = arith.addf %283, %284 : vector<8x16xf32>
    %286 = vector.extract_strided_slice %269 {offsets = [0, 32], sizes = [8, 16], strides = [1, 1]} : vector<8x64xf32> to vector<8x16xf32>
    %287 = math.tanh %286 : vector<8x16xf32>
    %288 = vector.extract_strided_slice %269 {offsets = [0, 48], sizes = [8, 16], strides = [1, 1]} : vector<8x64xf32> to vector<8x16xf32>
    %cst_117 = arith.constant 5.000000e-01 : f32
    %289 = vector.broadcast %cst_117 : f32 to vector<8x16xf32>
    %290 = arith.mulf %289, %288 : vector<8x16xf32>
    %291 = math.tanh %290 : vector<8x16xf32>
    %cst_118 = arith.constant 5.000000e-01 : f32
    %292 = vector.broadcast %cst_118 : f32 to vector<8x16xf32>
    %293 = arith.mulf %292, %291 : vector<8x16xf32>
    %cst_119 = arith.constant 5.000000e-01 : f32
    %294 = vector.broadcast %cst_119 : f32 to vector<8x16xf32>
    %295 = arith.addf %293, %294 : vector<8x16xf32>
    %296 = arith.mulf %285, %216 : vector<8x16xf32>
    %297 = arith.mulf %277, %287 : vector<8x16xf32>
    %298 = arith.addf %296, %297 : vector<8x16xf32>
    %299 = math.tanh %298 : vector<8x16xf32>
    %300 = arith.mulf %295, %299 : vector<8x16xf32>
    %301 = arith.truncf %300 : vector<8x16xf32> to vector<8x16xbf16>
    %c0_120 = arith.constant 0 : index
    %c0_121 = arith.constant 0 : index
    %302 = vector.load %arg5[%c0_120, %c0_121] : memref<16x512xbf16, #tpu.memory_space<vmem>>, vector<16x512xbf16>
    %cst_122 = arith.constant dense<0.000000e+00> : vector<8x512xf32>
    %303 = tpu.matmul %301, %302, %cst_122 {dimension_numbers = #tpu.dot_dimension_numbers<[1], [0], [0], [1], [0, 0, 1, 1], [], []>} : vector<8x16xbf16>, vector<16x512xbf16>, vector<8x512xf32> -> vector<8x512xf32>
    %304 = arith.addf %303, %261 : vector<8x512xf32>
    %305 = vector.extract_strided_slice %304 {offsets = [0, 0], sizes = [8, 128], strides = [1, 1]} : vector<8x512xf32> to vector<8x128xf32>
    %cst_123 = arith.constant 5.000000e-01 : f32
    %306 = vector.broadcast %cst_123 : f32 to vector<8x128xf32>
    %307 = arith.mulf %306, %305 : vector<8x128xf32>
    %308 = math.tanh %307 : vector<8x128xf32>
    %cst_124 = arith.constant 5.000000e-01 : f32
    %309 = vector.broadcast %cst_124 : f32 to vector<8x128xf32>
    %310 = arith.mulf %309, %308 : vector<8x128xf32>
    %cst_125 = arith.constant 5.000000e-01 : f32
    %311 = vector.broadcast %cst_125 : f32 to vector<8x128xf32>
    %312 = arith.addf %310, %311 : vector<8x128xf32>
    %313 = vector.extract_strided_slice %304 {offsets = [0, 128], sizes = [8, 128], strides = [1, 1]} : vector<8x512xf32> to vector<8x128xf32>
    %cst_126 = arith.constant 5.000000e-01 : f32
    %314 = vector.broadcast %cst_126 : f32 to vector<8x128xf32>
    %315 = arith.mulf %314, %313 : vector<8x128xf32>
    %316 = math.tanh %315 : vector<8x128xf32>
    %cst_127 = arith.constant 5.000000e-01 : f32
    %317 = vector.broadcast %cst_127 : f32 to vector<8x128xf32>
    %318 = arith.mulf %317, %316 : vector<8x128xf32>
    %cst_128 = arith.constant 5.000000e-01 : f32
    %319 = vector.broadcast %cst_128 : f32 to vector<8x128xf32>
    %320 = arith.addf %318, %319 : vector<8x128xf32>
    %321 = vector.extract_strided_slice %304 {offsets = [0, 256], sizes = [8, 128], strides = [1, 1]} : vector<8x512xf32> to vector<8x128xf32>
    %322 = math.tanh %321 : vector<8x128xf32>
    %323 = vector.extract_strided_slice %304 {offsets = [0, 384], sizes = [8, 128], strides = [1, 1]} : vector<8x512xf32> to vector<8x128xf32>
    %cst_129 = arith.constant 5.000000e-01 : f32
    %324 = vector.broadcast %cst_129 : f32 to vector<8x128xf32>
    %325 = arith.mulf %324, %323 : vector<8x128xf32>
    %326 = math.tanh %325 : vector<8x128xf32>
    %cst_130 = arith.constant 5.000000e-01 : f32
    %327 = vector.broadcast %cst_130 : f32 to vector<8x128xf32>
    %328 = arith.mulf %327, %326 : vector<8x128xf32>
    %cst_131 = arith.constant 5.000000e-01 : f32
    %329 = vector.broadcast %cst_131 : f32 to vector<8x128xf32>
    %330 = arith.addf %328, %329 : vector<8x128xf32>
    %331 = arith.mulf %320, %251 : vector<8x128xf32>
    %332 = arith.mulf %312, %322 : vector<8x128xf32>
    %333 = arith.addf %331, %332 : vector<8x128xf32>
    %334 = math.tanh %333 : vector<8x128xf32>
    %335 = arith.mulf %330, %334 : vector<8x128xf32>
    %336 = arith.index_cast %c3_i32 : i32 to index
    %c0_132 = arith.constant 0 : index
    %c0_133 = arith.constant 0 : index
    %337 = vector.load %arg8[%336, %c0_132, %c0_133] : memref<8x8x128xf32, #tpu.memory_space<vmem>>, vector<1x8x128xf32>
    %338 = vector.shape_cast %337 : vector<1x8x128xf32> to vector<8x128xf32>
    %339 = vector.shape_cast %335 : vector<8x128xf32> to vector<1x8x128xf32>
    tpu.vector_store %arg8[%336, %c0_132, %c0_133], %339 {strides = array<i32>} : memref<8x8x128xf32, #tpu.memory_space<vmem>>, vector<1x8x128xf32>,
    %c4_i32 = arith.constant 4 : i32
    %340 = arith.truncf %335 : vector<8x128xf32> to vector<8x128xbf16>
    %c0_134 = arith.constant 0 : index
    %c0_135 = arith.constant 0 : index
    %341 = vector.load %arg6[%c0_134, %c0_135] : memref<128x512xbf16, #tpu.memory_space<vmem>>, vector<128x512xbf16>
    %cst_136 = arith.constant dense<0.000000e+00> : vector<8x512xf32>
    %342 = tpu.matmul %340, %341, %cst_136 {dimension_numbers = #tpu.dot_dimension_numbers<[1], [0], [0], [1], [0, 0, 1, 1], [], []>} : vector<8x128xbf16>, vector<128x512xbf16>, vector<8x512xf32> -> vector<8x512xf32>
    %343 = arith.addf %342, %9 : vector<8x512xf32>
    %c8_i32_137 = arith.constant 8 : i32
    %344 = arith.muli %c4_i32, %c8_i32_137 : i32
    %345 = tpu.assume_multiple %344, 8 : i32
    %346 = arith.index_cast %345 : i32 to index
    %c0_138 = arith.constant 0 : index
    %347 = vector.load %arg9[%346, %c0_138] : memref<64x64xf32, #tpu.memory_space<vmem>>, vector<8x64xf32>
    %348 = arith.truncf %300 : vector<8x16xf32> to vector<8x16xbf16>
    %c0_139 = arith.constant 0 : index
    %c0_140 = arith.constant 0 : index
    %349 = vector.load %arg4[%c0_139, %c0_140] : memref<16x64xbf16, #tpu.memory_space<vmem>>, vector<16x64xbf16>
    %cst_141 = arith.constant dense<0.000000e+00> : vector<8x64xf32>
    %350 = tpu.matmul %348, %349, %cst_141 {dimension_numbers = #tpu.dot_dimension_numbers<[1], [0], [0], [1], [0, 0, 1, 1], [], []>} : vector<8x16xbf16>, vector<16x64xbf16>, vector<8x64xf32> -> vector<8x64xf32>
    %351 = arith.addf %347, %350 : vector<8x64xf32>
    %352 = vector.extract_strided_slice %351 {offsets = [0, 0], sizes = [8, 16], strides = [1, 1]} : vector<8x64xf32> to vector<8x16xf32>
    %cst_142 = arith.constant 5.000000e-01 : f32
    %353 = vector.broadcast %cst_142 : f32 to vector<8x16xf32>
    %354 = arith.mulf %353, %352 : vector<8x16xf32>
    %355 = math.tanh %354 : vector<8x16xf32>
    %cst_143 = arith.constant 5.000000e-01 : f32
    %356 = vector.broadcast %cst_143 : f32 to vector<8x16xf32>
    %357 = arith.mulf %356, %355 : vector<8x16xf32>
    %cst_144 = arith.constant 5.000000e-01 : f32
    %358 = vector.broadcast %cst_144 : f32 to vector<8x16xf32>
    %359 = arith.addf %357, %358 : vector<8x16xf32>
    %360 = vector.extract_strided_slice %351 {offsets = [0, 16], sizes = [8, 16], strides = [1, 1]} : vector<8x64xf32> to vector<8x16xf32>
    %cst_145 = arith.constant 5.000000e-01 : f32
    %361 = vector.broadcast %cst_145 : f32 to vector<8x16xf32>
    %362 = arith.mulf %361, %360 : vector<8x16xf32>
    %363 = math.tanh %362 : vector<8x16xf32>
    %cst_146 = arith.constant 5.000000e-01 : f32
    %364 = vector.broadcast %cst_146 : f32 to vector<8x16xf32>
    %365 = arith.mulf %364, %363 : vector<8x16xf32>
    %cst_147 = arith.constant 5.000000e-01 : f32
    %366 = vector.broadcast %cst_147 : f32 to vector<8x16xf32>
    %367 = arith.addf %365, %366 : vector<8x16xf32>
    %368 = vector.extract_strided_slice %351 {offsets = [0, 32], sizes = [8, 16], strides = [1, 1]} : vector<8x64xf32> to vector<8x16xf32>
    %369 = math.tanh %368 : vector<8x16xf32>
    %370 = vector.extract_strided_slice %351 {offsets = [0, 48], sizes = [8, 16], strides = [1, 1]} : vector<8x64xf32> to vector<8x16xf32>
    %cst_148 = arith.constant 5.000000e-01 : f32
    %371 = vector.broadcast %cst_148 : f32 to vector<8x16xf32>
    %372 = arith.mulf %371, %370 : vector<8x16xf32>
    %373 = math.tanh %372 : vector<8x16xf32>
    %cst_149 = arith.constant 5.000000e-01 : f32
    %374 = vector.broadcast %cst_149 : f32 to vector<8x16xf32>
    %375 = arith.mulf %374, %373 : vector<8x16xf32>
    %cst_150 = arith.constant 5.000000e-01 : f32
    %376 = vector.broadcast %cst_150 : f32 to vector<8x16xf32>
    %377 = arith.addf %375, %376 : vector<8x16xf32>
    %378 = arith.mulf %367, %298 : vector<8x16xf32>
    %379 = arith.mulf %359, %369 : vector<8x16xf32>
    %380 = arith.addf %378, %379 : vector<8x16xf32>
    %381 = math.tanh %380 : vector<8x16xf32>
    %382 = arith.mulf %377, %381 : vector<8x16xf32>
    %383 = arith.truncf %382 : vector<8x16xf32> to vector<8x16xbf16>
    %c0_151 = arith.constant 0 : index
    %c0_152 = arith.constant 0 : index
    %384 = vector.load %arg5[%c0_151, %c0_152] : memref<16x512xbf16, #tpu.memory_space<vmem>>, vector<16x512xbf16>
    %cst_153 = arith.constant dense<0.000000e+00> : vector<8x512xf32>
    %385 = tpu.matmul %383, %384, %cst_153 {dimension_numbers = #tpu.dot_dimension_numbers<[1], [0], [0], [1], [0, 0, 1, 1], [], []>} : vector<8x16xbf16>, vector<16x512xbf16>, vector<8x512xf32> -> vector<8x512xf32>
    %386 = arith.addf %385, %343 : vector<8x512xf32>
    %387 = vector.extract_strided_slice %386 {offsets = [0, 0], sizes = [8, 128], strides = [1, 1]} : vector<8x512xf32> to vector<8x128xf32>
    %cst_154 = arith.constant 5.000000e-01 : f32
    %388 = vector.broadcast %cst_154 : f32 to vector<8x128xf32>
    %389 = arith.mulf %388, %387 : vector<8x128xf32>
    %390 = math.tanh %389 : vector<8x128xf32>
    %cst_155 = arith.constant 5.000000e-01 : f32
    %391 = vector.broadcast %cst_155 : f32 to vector<8x128xf32>
    %392 = arith.mulf %391, %390 : vector<8x128xf32>
    %cst_156 = arith.constant 5.000000e-01 : f32
    %393 = vector.broadcast %cst_156 : f32 to vector<8x128xf32>
    %394 = arith.addf %392, %393 : vector<8x128xf32>
    %395 = vector.extract_strided_slice %386 {offsets = [0, 128], sizes = [8, 128], strides = [1, 1]} : vector<8x512xf32> to vector<8x128xf32>
    %cst_157 = arith.constant 5.000000e-01 : f32
    %396 = vector.broadcast %cst_157 : f32 to vector<8x128xf32>
    %397 = arith.mulf %396, %395 : vector<8x128xf32>
    %398 = math.tanh %397 : vector<8x128xf32>
    %cst_158 = arith.constant 5.000000e-01 : f32
    %399 = vector.broadcast %cst_158 : f32 to vector<8x128xf32>
    %400 = arith.mulf %399, %398 : vector<8x128xf32>
    %cst_159 = arith.constant 5.000000e-01 : f32
    %401 = vector.broadcast %cst_159 : f32 to vector<8x128xf32>
    %402 = arith.addf %400, %401 : vector<8x128xf32>
    %403 = vector.extract_strided_slice %386 {offsets = [0, 256], sizes = [8, 128], strides = [1, 1]} : vector<8x512xf32> to vector<8x128xf32>
    %404 = math.tanh %403 : vector<8x128xf32>
    %405 = vector.extract_strided_slice %386 {offsets = [0, 384], sizes = [8, 128], strides = [1, 1]} : vector<8x512xf32> to vector<8x128xf32>
    %cst_160 = arith.constant 5.000000e-01 : f32
    %406 = vector.broadcast %cst_160 : f32 to vector<8x128xf32>
    %407 = arith.mulf %406, %405 : vector<8x128xf32>
    %408 = math.tanh %407 : vector<8x128xf32>
    %cst_161 = arith.constant 5.000000e-01 : f32
    %409 = vector.broadcast %cst_161 : f32 to vector<8x128xf32>
    %410 = arith.mulf %409, %408 : vector<8x128xf32>
    %cst_162 = arith.constant 5.000000e-01 : f32
    %411 = vector.broadcast %cst_162 : f32 to vector<8x128xf32>
    %412 = arith.addf %410, %411 : vector<8x128xf32>
    %413 = arith.mulf %402, %333 : vector<8x128xf32>
    %414 = arith.mulf %394, %404 : vector<8x128xf32>
    %415 = arith.addf %413, %414 : vector<8x128xf32>
    %416 = math.tanh %415 : vector<8x128xf32>
    %417 = arith.mulf %412, %416 : vector<8x128xf32>
    %418 = arith.index_cast %c4_i32 : i32 to index
    %c0_163 = arith.constant 0 : index
    %c0_164 = arith.constant 0 : index
    %419 = vector.load %arg8[%418, %c0_163, %c0_164] : memref<8x8x128xf32, #tpu.memory_space<vmem>>, vector<1x8x128xf32>
    %420 = vector.shape_cast %419 : vector<1x8x128xf32> to vector<8x128xf32>
    %421 = vector.shape_cast %417 : vector<8x128xf32> to vector<1x8x128xf32>
    tpu.vector_store %arg8[%418, %c0_163, %c0_164], %421 {strides = array<i32>} : memref<8x8x128xf32, #tpu.memory_space<vmem>>, vector<1x8x128xf32>,
    %c5_i32 = arith.constant 5 : i32
    %422 = arith.truncf %417 : vector<8x128xf32> to vector<8x128xbf16>
    %c0_165 = arith.constant 0 : index
    %c0_166 = arith.constant 0 : index
    %423 = vector.load %arg6[%c0_165, %c0_166] : memref<128x512xbf16, #tpu.memory_space<vmem>>, vector<128x512xbf16>
    %cst_167 = arith.constant dense<0.000000e+00> : vector<8x512xf32>
    %424 = tpu.matmul %422, %423, %cst_167 {dimension_numbers = #tpu.dot_dimension_numbers<[1], [0], [0], [1], [0, 0, 1, 1], [], []>} : vector<8x128xbf16>, vector<128x512xbf16>, vector<8x512xf32> -> vector<8x512xf32>
    %425 = arith.addf %424, %9 : vector<8x512xf32>
    %c8_i32_168 = arith.constant 8 : i32
    %426 = arith.muli %c5_i32, %c8_i32_168 : i32
    %427 = tpu.assume_multiple %426, 8 : i32
    %428 = arith.index_cast %427 : i32 to index
    %c0_169 = arith.constant 0 : index
    %429 = vector.load %arg9[%428, %c0_169] : memref<64x64xf32, #tpu.memory_space<vmem>>, vector<8x64xf32>
    %430 = arith.truncf %382 : vector<8x16xf32> to vector<8x16xbf16>
    %c0_170 = arith.constant 0 : index
    %c0_171 = arith.constant 0 : index
    %431 = vector.load %arg4[%c0_170, %c0_171] : memref<16x64xbf16, #tpu.memory_space<vmem>>, vector<16x64xbf16>
    %cst_172 = arith.constant dense<0.000000e+00> : vector<8x64xf32>
    %432 = tpu.matmul %430, %431, %cst_172 {dimension_numbers = #tpu.dot_dimension_numbers<[1], [0], [0], [1], [0, 0, 1, 1], [], []>} : vector<8x16xbf16>, vector<16x64xbf16>, vector<8x64xf32> -> vector<8x64xf32>
    %433 = arith.addf %429, %432 : vector<8x64xf32>
    %434 = vector.extract_strided_slice %433 {offsets = [0, 0], sizes = [8, 16], strides = [1, 1]} : vector<8x64xf32> to vector<8x16xf32>
    %cst_173 = arith.constant 5.000000e-01 : f32
    %435 = vector.broadcast %cst_173 : f32 to vector<8x16xf32>
    %436 = arith.mulf %435, %434 : vector<8x16xf32>
    %437 = math.tanh %436 : vector<8x16xf32>
    %cst_174 = arith.constant 5.000000e-01 : f32
    %438 = vector.broadcast %cst_174 : f32 to vector<8x16xf32>
    %439 = arith.mulf %438, %437 : vector<8x16xf32>
    %cst_175 = arith.constant 5.000000e-01 : f32
    %440 = vector.broadcast %cst_175 : f32 to vector<8x16xf32>
    %441 = arith.addf %439, %440 : vector<8x16xf32>
    %442 = vector.extract_strided_slice %433 {offsets = [0, 16], sizes = [8, 16], strides = [1, 1]} : vector<8x64xf32> to vector<8x16xf32>
    %cst_176 = arith.constant 5.000000e-01 : f32
    %443 = vector.broadcast %cst_176 : f32 to vector<8x16xf32>
    %444 = arith.mulf %443, %442 : vector<8x16xf32>
    %445 = math.tanh %444 : vector<8x16xf32>
    %cst_177 = arith.constant 5.000000e-01 : f32
    %446 = vector.broadcast %cst_177 : f32 to vector<8x16xf32>
    %447 = arith.mulf %446, %445 : vector<8x16xf32>
    %cst_178 = arith.constant 5.000000e-01 : f32
    %448 = vector.broadcast %cst_178 : f32 to vector<8x16xf32>
    %449 = arith.addf %447, %448 : vector<8x16xf32>
    %450 = vector.extract_strided_slice %433 {offsets = [0, 32], sizes = [8, 16], strides = [1, 1]} : vector<8x64xf32> to vector<8x16xf32>
    %451 = math.tanh %450 : vector<8x16xf32>
    %452 = vector.extract_strided_slice %433 {offsets = [0, 48], sizes = [8, 16], strides = [1, 1]} : vector<8x64xf32> to vector<8x16xf32>
    %cst_179 = arith.constant 5.000000e-01 : f32
    %453 = vector.broadcast %cst_179 : f32 to vector<8x16xf32>
    %454 = arith.mulf %453, %452 : vector<8x16xf32>
    %455 = math.tanh %454 : vector<8x16xf32>
    %cst_180 = arith.constant 5.000000e-01 : f32
    %456 = vector.broadcast %cst_180 : f32 to vector<8x16xf32>
    %457 = arith.mulf %456, %455 : vector<8x16xf32>
    %cst_181 = arith.constant 5.000000e-01 : f32
    %458 = vector.broadcast %cst_181 : f32 to vector<8x16xf32>
    %459 = arith.addf %457, %458 : vector<8x16xf32>
    %460 = arith.mulf %449, %380 : vector<8x16xf32>
    %461 = arith.mulf %441, %451 : vector<8x16xf32>
    %462 = arith.addf %460, %461 : vector<8x16xf32>
    %463 = math.tanh %462 : vector<8x16xf32>
    %464 = arith.mulf %459, %463 : vector<8x16xf32>
    %465 = arith.truncf %464 : vector<8x16xf32> to vector<8x16xbf16>
    %c0_182 = arith.constant 0 : index
    %c0_183 = arith.constant 0 : index
    %466 = vector.load %arg5[%c0_182, %c0_183] : memref<16x512xbf16, #tpu.memory_space<vmem>>, vector<16x512xbf16>
    %cst_184 = arith.constant dense<0.000000e+00> : vector<8x512xf32>
    %467 = tpu.matmul %465, %466, %cst_184 {dimension_numbers = #tpu.dot_dimension_numbers<[1], [0], [0], [1], [0, 0, 1, 1], [], []>} : vector<8x16xbf16>, vector<16x512xbf16>, vector<8x512xf32> -> vector<8x512xf32>
    %468 = arith.addf %467, %425 : vector<8x512xf32>
    %469 = vector.extract_strided_slice %468 {offsets = [0, 0], sizes = [8, 128], strides = [1, 1]} : vector<8x512xf32> to vector<8x128xf32>
    %cst_185 = arith.constant 5.000000e-01 : f32
    %470 = vector.broadcast %cst_185 : f32 to vector<8x128xf32>
    %471 = arith.mulf %470, %469 : vector<8x128xf32>
    %472 = math.tanh %471 : vector<8x128xf32>
    %cst_186 = arith.constant 5.000000e-01 : f32
    %473 = vector.broadcast %cst_186 : f32 to vector<8x128xf32>
    %474 = arith.mulf %473, %472 : vector<8x128xf32>
    %cst_187 = arith.constant 5.000000e-01 : f32
    %475 = vector.broadcast %cst_187 : f32 to vector<8x128xf32>
    %476 = arith.addf %474, %475 : vector<8x128xf32>
    %477 = vector.extract_strided_slice %468 {offsets = [0, 128], sizes = [8, 128], strides = [1, 1]} : vector<8x512xf32> to vector<8x128xf32>
    %cst_188 = arith.constant 5.000000e-01 : f32
    %478 = vector.broadcast %cst_188 : f32 to vector<8x128xf32>
    %479 = arith.mulf %478, %477 : vector<8x128xf32>
    %480 = math.tanh %479 : vector<8x128xf32>
    %cst_189 = arith.constant 5.000000e-01 : f32
    %481 = vector.broadcast %cst_189 : f32 to vector<8x128xf32>
    %482 = arith.mulf %481, %480 : vector<8x128xf32>
    %cst_190 = arith.constant 5.000000e-01 : f32
    %483 = vector.broadcast %cst_190 : f32 to vector<8x128xf32>
    %484 = arith.addf %482, %483 : vector<8x128xf32>
    %485 = vector.extract_strided_slice %468 {offsets = [0, 256], sizes = [8, 128], strides = [1, 1]} : vector<8x512xf32> to vector<8x128xf32>
    %486 = math.tanh %485 : vector<8x128xf32>
    %487 = vector.extract_strided_slice %468 {offsets = [0, 384], sizes = [8, 128], strides = [1, 1]} : vector<8x512xf32> to vector<8x128xf32>
    %cst_191 = arith.constant 5.000000e-01 : f32
    %488 = vector.broadcast %cst_191 : f32 to vector<8x128xf32>
    %489 = arith.mulf %488, %487 : vector<8x128xf32>
    %490 = math.tanh %489 : vector<8x128xf32>
    %cst_192 = arith.constant 5.000000e-01 : f32
    %491 = vector.broadcast %cst_192 : f32 to vector<8x128xf32>
    %492 = arith.mulf %491, %490 : vector<8x128xf32>
    %cst_193 = arith.constant 5.000000e-01 : f32
    %493 = vector.broadcast %cst_193 : f32 to vector<8x128xf32>
    %494 = arith.addf %492, %493 : vector<8x128xf32>
    %495 = arith.mulf %484, %415 : vector<8x128xf32>
    %496 = arith.mulf %476, %486 : vector<8x128xf32>
    %497 = arith.addf %495, %496 : vector<8x128xf32>
    %498 = math.tanh %497 : vector<8x128xf32>
    %499 = arith.mulf %494, %498 : vector<8x128xf32>
    %500 = arith.index_cast %c5_i32 : i32 to index
    %c0_194 = arith.constant 0 : index
    %c0_195 = arith.constant 0 : index
    %501 = vector.load %arg8[%500, %c0_194, %c0_195] : memref<8x8x128xf32, #tpu.memory_space<vmem>>, vector<1x8x128xf32>
    %502 = vector.shape_cast %501 : vector<1x8x128xf32> to vector<8x128xf32>
    %503 = vector.shape_cast %499 : vector<8x128xf32> to vector<1x8x128xf32>
    tpu.vector_store %arg8[%500, %c0_194, %c0_195], %503 {strides = array<i32>} : memref<8x8x128xf32, #tpu.memory_space<vmem>>, vector<1x8x128xf32>,
    %c6_i32 = arith.constant 6 : i32
    %504 = arith.truncf %499 : vector<8x128xf32> to vector<8x128xbf16>
    %c0_196 = arith.constant 0 : index
    %c0_197 = arith.constant 0 : index
    %505 = vector.load %arg6[%c0_196, %c0_197] : memref<128x512xbf16, #tpu.memory_space<vmem>>, vector<128x512xbf16>
    %cst_198 = arith.constant dense<0.000000e+00> : vector<8x512xf32>
    %506 = tpu.matmul %504, %505, %cst_198 {dimension_numbers = #tpu.dot_dimension_numbers<[1], [0], [0], [1], [0, 0, 1, 1], [], []>} : vector<8x128xbf16>, vector<128x512xbf16>, vector<8x512xf32> -> vector<8x512xf32>
    %507 = arith.addf %506, %9 : vector<8x512xf32>
    %c8_i32_199 = arith.constant 8 : i32
    %508 = arith.muli %c6_i32, %c8_i32_199 : i32
    %509 = tpu.assume_multiple %508, 8 : i32
    %510 = arith.index_cast %509 : i32 to index
    %c0_200 = arith.constant 0 : index
    %511 = vector.load %arg9[%510, %c0_200] : memref<64x64xf32, #tpu.memory_space<vmem>>, vector<8x64xf32>
    %512 = arith.truncf %464 : vector<8x16xf32> to vector<8x16xbf16>
    %c0_201 = arith.constant 0 : index
    %c0_202 = arith.constant 0 : index
    %513 = vector.load %arg4[%c0_201, %c0_202] : memref<16x64xbf16, #tpu.memory_space<vmem>>, vector<16x64xbf16>
    %cst_203 = arith.constant dense<0.000000e+00> : vector<8x64xf32>
    %514 = tpu.matmul %512, %513, %cst_203 {dimension_numbers = #tpu.dot_dimension_numbers<[1], [0], [0], [1], [0, 0, 1, 1], [], []>} : vector<8x16xbf16>, vector<16x64xbf16>, vector<8x64xf32> -> vector<8x64xf32>
    %515 = arith.addf %511, %514 : vector<8x64xf32>
    %516 = vector.extract_strided_slice %515 {offsets = [0, 0], sizes = [8, 16], strides = [1, 1]} : vector<8x64xf32> to vector<8x16xf32>
    %cst_204 = arith.constant 5.000000e-01 : f32
    %517 = vector.broadcast %cst_204 : f32 to vector<8x16xf32>
    %518 = arith.mulf %517, %516 : vector<8x16xf32>
    %519 = math.tanh %518 : vector<8x16xf32>
    %cst_205 = arith.constant 5.000000e-01 : f32
    %520 = vector.broadcast %cst_205 : f32 to vector<8x16xf32>
    %521 = arith.mulf %520, %519 : vector<8x16xf32>
    %cst_206 = arith.constant 5.000000e-01 : f32
    %522 = vector.broadcast %cst_206 : f32 to vector<8x16xf32>
    %523 = arith.addf %521, %522 : vector<8x16xf32>
    %524 = vector.extract_strided_slice %515 {offsets = [0, 16], sizes = [8, 16], strides = [1, 1]} : vector<8x64xf32> to vector<8x16xf32>
    %cst_207 = arith.constant 5.000000e-01 : f32
    %525 = vector.broadcast %cst_207 : f32 to vector<8x16xf32>
    %526 = arith.mulf %525, %524 : vector<8x16xf32>
    %527 = math.tanh %526 : vector<8x16xf32>
    %cst_208 = arith.constant 5.000000e-01 : f32
    %528 = vector.broadcast %cst_208 : f32 to vector<8x16xf32>
    %529 = arith.mulf %528, %527 : vector<8x16xf32>
    %cst_209 = arith.constant 5.000000e-01 : f32
    %530 = vector.broadcast %cst_209 : f32 to vector<8x16xf32>
    %531 = arith.addf %529, %530 : vector<8x16xf32>
    %532 = vector.extract_strided_slice %515 {offsets = [0, 32], sizes = [8, 16], strides = [1, 1]} : vector<8x64xf32> to vector<8x16xf32>
    %533 = math.tanh %532 : vector<8x16xf32>
    %534 = vector.extract_strided_slice %515 {offsets = [0, 48], sizes = [8, 16], strides = [1, 1]} : vector<8x64xf32> to vector<8x16xf32>
    %cst_210 = arith.constant 5.000000e-01 : f32
    %535 = vector.broadcast %cst_210 : f32 to vector<8x16xf32>
    %536 = arith.mulf %535, %534 : vector<8x16xf32>
    %537 = math.tanh %536 : vector<8x16xf32>
    %cst_211 = arith.constant 5.000000e-01 : f32
    %538 = vector.broadcast %cst_211 : f32 to vector<8x16xf32>
    %539 = arith.mulf %538, %537 : vector<8x16xf32>
    %cst_212 = arith.constant 5.000000e-01 : f32
    %540 = vector.broadcast %cst_212 : f32 to vector<8x16xf32>
    %541 = arith.addf %539, %540 : vector<8x16xf32>
    %542 = arith.mulf %531, %462 : vector<8x16xf32>
    %543 = arith.mulf %523, %533 : vector<8x16xf32>
    %544 = arith.addf %542, %543 : vector<8x16xf32>
    %545 = math.tanh %544 : vector<8x16xf32>
    %546 = arith.mulf %541, %545 : vector<8x16xf32>
    %547 = arith.truncf %546 : vector<8x16xf32> to vector<8x16xbf16>
    %c0_213 = arith.constant 0 : index
    %c0_214 = arith.constant 0 : index
    %548 = vector.load %arg5[%c0_213, %c0_214] : memref<16x512xbf16, #tpu.memory_space<vmem>>, vector<16x512xbf16>
    %cst_215 = arith.constant dense<0.000000e+00> : vector<8x512xf32>
    %549 = tpu.matmul %547, %548, %cst_215 {dimension_numbers = #tpu.dot_dimension_numbers<[1], [0], [0], [1], [0, 0, 1, 1], [], []>} : vector<8x16xbf16>, vector<16x512xbf16>, vector<8x512xf32> -> vector<8x512xf32>
    %550 = arith.addf %549, %507 : vector<8x512xf32>
    %551 = vector.extract_strided_slice %550 {offsets = [0, 0], sizes = [8, 128], strides = [1, 1]} : vector<8x512xf32> to vector<8x128xf32>
    %cst_216 = arith.constant 5.000000e-01 : f32
    %552 = vector.broadcast %cst_216 : f32 to vector<8x128xf32>
    %553 = arith.mulf %552, %551 : vector<8x128xf32>
    %554 = math.tanh %553 : vector<8x128xf32>
    %cst_217 = arith.constant 5.000000e-01 : f32
    %555 = vector.broadcast %cst_217 : f32 to vector<8x128xf32>
    %556 = arith.mulf %555, %554 : vector<8x128xf32>
    %cst_218 = arith.constant 5.000000e-01 : f32
    %557 = vector.broadcast %cst_218 : f32 to vector<8x128xf32>
    %558 = arith.addf %556, %557 : vector<8x128xf32>
    %559 = vector.extract_strided_slice %550 {offsets = [0, 128], sizes = [8, 128], strides = [1, 1]} : vector<8x512xf32> to vector<8x128xf32>
    %cst_219 = arith.constant 5.000000e-01 : f32
    %560 = vector.broadcast %cst_219 : f32 to vector<8x128xf32>
    %561 = arith.mulf %560, %559 : vector<8x128xf32>
    %562 = math.tanh %561 : vector<8x128xf32>
    %cst_220 = arith.constant 5.000000e-01 : f32
    %563 = vector.broadcast %cst_220 : f32 to vector<8x128xf32>
    %564 = arith.mulf %563, %562 : vector<8x128xf32>
    %cst_221 = arith.constant 5.000000e-01 : f32
    %565 = vector.broadcast %cst_221 : f32 to vector<8x128xf32>
    %566 = arith.addf %564, %565 : vector<8x128xf32>
    %567 = vector.extract_strided_slice %550 {offsets = [0, 256], sizes = [8, 128], strides = [1, 1]} : vector<8x512xf32> to vector<8x128xf32>
    %568 = math.tanh %567 : vector<8x128xf32>
    %569 = vector.extract_strided_slice %550 {offsets = [0, 384], sizes = [8, 128], strides = [1, 1]} : vector<8x512xf32> to vector<8x128xf32>
    %cst_222 = arith.constant 5.000000e-01 : f32
    %570 = vector.broadcast %cst_222 : f32 to vector<8x128xf32>
    %571 = arith.mulf %570, %569 : vector<8x128xf32>
    %572 = math.tanh %571 : vector<8x128xf32>
    %cst_223 = arith.constant 5.000000e-01 : f32
    %573 = vector.broadcast %cst_223 : f32 to vector<8x128xf32>
    %574 = arith.mulf %573, %572 : vector<8x128xf32>
    %cst_224 = arith.constant 5.000000e-01 : f32
    %575 = vector.broadcast %cst_224 : f32 to vector<8x128xf32>
    %576 = arith.addf %574, %575 : vector<8x128xf32>
    %577 = arith.mulf %566, %497 : vector<8x128xf32>
    %578 = arith.mulf %558, %568 : vector<8x128xf32>
    %579 = arith.addf %577, %578 : vector<8x128xf32>
    %580 = math.tanh %579 : vector<8x128xf32>
    %581 = arith.mulf %576, %580 : vector<8x128xf32>
    %582 = arith.index_cast %c6_i32 : i32 to index
    %c0_225 = arith.constant 0 : index
    %c0_226 = arith.constant 0 : index
    %583 = vector.load %arg8[%582, %c0_225, %c0_226] : memref<8x8x128xf32, #tpu.memory_space<vmem>>, vector<1x8x128xf32>
    %584 = vector.shape_cast %583 : vector<1x8x128xf32> to vector<8x128xf32>
    %585 = vector.shape_cast %581 : vector<8x128xf32> to vector<1x8x128xf32>
    tpu.vector_store %arg8[%582, %c0_225, %c0_226], %585 {strides = array<i32>} : memref<8x8x128xf32, #tpu.memory_space<vmem>>, vector<1x8x128xf32>,
    %c7_i32 = arith.constant 7 : i32
    %586 = arith.truncf %581 : vector<8x128xf32> to vector<8x128xbf16>
    %c0_227 = arith.constant 0 : index
    %c0_228 = arith.constant 0 : index
    %587 = vector.load %arg6[%c0_227, %c0_228] : memref<128x512xbf16, #tpu.memory_space<vmem>>, vector<128x512xbf16>
    %cst_229 = arith.constant dense<0.000000e+00> : vector<8x512xf32>
    %588 = tpu.matmul %586, %587, %cst_229 {dimension_numbers = #tpu.dot_dimension_numbers<[1], [0], [0], [1], [0, 0, 1, 1], [], []>} : vector<8x128xbf16>, vector<128x512xbf16>, vector<8x512xf32> -> vector<8x512xf32>
    %589 = arith.addf %588, %9 : vector<8x512xf32>
    %c8_i32_230 = arith.constant 8 : i32
    %590 = arith.muli %c7_i32, %c8_i32_230 : i32
    %591 = tpu.assume_multiple %590, 8 : i32
    %592 = arith.index_cast %591 : i32 to index
    %c0_231 = arith.constant 0 : index
    %593 = vector.load %arg9[%592, %c0_231] : memref<64x64xf32, #tpu.memory_space<vmem>>, vector<8x64xf32>
    %594 = arith.truncf %546 : vector<8x16xf32> to vector<8x16xbf16>
    %c0_232 = arith.constant 0 : index
    %c0_233 = arith.constant 0 : index
    %595 = vector.load %arg4[%c0_232, %c0_233] : memref<16x64xbf16, #tpu.memory_space<vmem>>, vector<16x64xbf16>
    %cst_234 = arith.constant dense<0.000000e+00> : vector<8x64xf32>
    %596 = tpu.matmul %594, %595, %cst_234 {dimension_numbers = #tpu.dot_dimension_numbers<[1], [0], [0], [1], [0, 0, 1, 1], [], []>} : vector<8x16xbf16>, vector<16x64xbf16>, vector<8x64xf32> -> vector<8x64xf32>
    %597 = arith.addf %593, %596 : vector<8x64xf32>
    %598 = vector.extract_strided_slice %597 {offsets = [0, 0], sizes = [8, 16], strides = [1, 1]} : vector<8x64xf32> to vector<8x16xf32>
    %cst_235 = arith.constant 5.000000e-01 : f32
    %599 = vector.broadcast %cst_235 : f32 to vector<8x16xf32>
    %600 = arith.mulf %599, %598 : vector<8x16xf32>
    %601 = math.tanh %600 : vector<8x16xf32>
    %cst_236 = arith.constant 5.000000e-01 : f32
    %602 = vector.broadcast %cst_236 : f32 to vector<8x16xf32>
    %603 = arith.mulf %602, %601 : vector<8x16xf32>
    %cst_237 = arith.constant 5.000000e-01 : f32
    %604 = vector.broadcast %cst_237 : f32 to vector<8x16xf32>
    %605 = arith.addf %603, %604 : vector<8x16xf32>
    %606 = vector.extract_strided_slice %597 {offsets = [0, 16], sizes = [8, 16], strides = [1, 1]} : vector<8x64xf32> to vector<8x16xf32>
    %cst_238 = arith.constant 5.000000e-01 : f32
    %607 = vector.broadcast %cst_238 : f32 to vector<8x16xf32>
    %608 = arith.mulf %607, %606 : vector<8x16xf32>
    %609 = math.tanh %608 : vector<8x16xf32>
    %cst_239 = arith.constant 5.000000e-01 : f32
    %610 = vector.broadcast %cst_239 : f32 to vector<8x16xf32>
    %611 = arith.mulf %610, %609 : vector<8x16xf32>
    %cst_240 = arith.constant 5.000000e-01 : f32
    %612 = vector.broadcast %cst_240 : f32 to vector<8x16xf32>
    %613 = arith.addf %611, %612 : vector<8x16xf32>
    %614 = vector.extract_strided_slice %597 {offsets = [0, 32], sizes = [8, 16], strides = [1, 1]} : vector<8x64xf32> to vector<8x16xf32>
    %615 = math.tanh %614 : vector<8x16xf32>
    %616 = vector.extract_strided_slice %597 {offsets = [0, 48], sizes = [8, 16], strides = [1, 1]} : vector<8x64xf32> to vector<8x16xf32>
    %cst_241 = arith.constant 5.000000e-01 : f32
    %617 = vector.broadcast %cst_241 : f32 to vector<8x16xf32>
    %618 = arith.mulf %617, %616 : vector<8x16xf32>
    %619 = math.tanh %618 : vector<8x16xf32>
    %cst_242 = arith.constant 5.000000e-01 : f32
    %620 = vector.broadcast %cst_242 : f32 to vector<8x16xf32>
    %621 = arith.mulf %620, %619 : vector<8x16xf32>
    %cst_243 = arith.constant 5.000000e-01 : f32
    %622 = vector.broadcast %cst_243 : f32 to vector<8x16xf32>
    %623 = arith.addf %621, %622 : vector<8x16xf32>
    %624 = arith.mulf %613, %544 : vector<8x16xf32>
    %625 = arith.mulf %605, %615 : vector<8x16xf32>
    %626 = arith.addf %624, %625 : vector<8x16xf32>
    %627 = math.tanh %626 : vector<8x16xf32>
    %628 = arith.mulf %623, %627 : vector<8x16xf32>
    %629 = arith.truncf %628 : vector<8x16xf32> to vector<8x16xbf16>
    %c0_244 = arith.constant 0 : index
    %c0_245 = arith.constant 0 : index
    %630 = vector.load %arg5[%c0_244, %c0_245] : memref<16x512xbf16, #tpu.memory_space<vmem>>, vector<16x512xbf16>
    %cst_246 = arith.constant dense<0.000000e+00> : vector<8x512xf32>
    %631 = tpu.matmul %629, %630, %cst_246 {dimension_numbers = #tpu.dot_dimension_numbers<[1], [0], [0], [1], [0, 0, 1, 1], [], []>} : vector<8x16xbf16>, vector<16x512xbf16>, vector<8x512xf32> -> vector<8x512xf32>
    %632 = arith.addf %631, %589 : vector<8x512xf32>
    %633 = vector.extract_strided_slice %632 {offsets = [0, 0], sizes = [8, 128], strides = [1, 1]} : vector<8x512xf32> to vector<8x128xf32>
    %cst_247 = arith.constant 5.000000e-01 : f32
    %634 = vector.broadcast %cst_247 : f32 to vector<8x128xf32>
    %635 = arith.mulf %634, %633 : vector<8x128xf32>
    %636 = math.tanh %635 : vector<8x128xf32>
    %cst_248 = arith.constant 5.000000e-01 : f32
    %637 = vector.broadcast %cst_248 : f32 to vector<8x128xf32>
    %638 = arith.mulf %637, %636 : vector<8x128xf32>
    %cst_249 = arith.constant 5.000000e-01 : f32
    %639 = vector.broadcast %cst_249 : f32 to vector<8x128xf32>
    %640 = arith.addf %638, %639 : vector<8x128xf32>
    %641 = vector.extract_strided_slice %632 {offsets = [0, 128], sizes = [8, 128], strides = [1, 1]} : vector<8x512xf32> to vector<8x128xf32>
    %cst_250 = arith.constant 5.000000e-01 : f32
    %642 = vector.broadcast %cst_250 : f32 to vector<8x128xf32>
    %643 = arith.mulf %642, %641 : vector<8x128xf32>
    %644 = math.tanh %643 : vector<8x128xf32>
    %cst_251 = arith.constant 5.000000e-01 : f32
    %645 = vector.broadcast %cst_251 : f32 to vector<8x128xf32>
    %646 = arith.mulf %645, %644 : vector<8x128xf32>
    %cst_252 = arith.constant 5.000000e-01 : f32
    %647 = vector.broadcast %cst_252 : f32 to vector<8x128xf32>
    %648 = arith.addf %646, %647 : vector<8x128xf32>
    %649 = vector.extract_strided_slice %632 {offsets = [0, 256], sizes = [8, 128], strides = [1, 1]} : vector<8x512xf32> to vector<8x128xf32>
    %650 = math.tanh %649 : vector<8x128xf32>
    %651 = vector.extract_strided_slice %632 {offsets = [0, 384], sizes = [8, 128], strides = [1, 1]} : vector<8x512xf32> to vector<8x128xf32>
    %cst_253 = arith.constant 5.000000e-01 : f32
    %652 = vector.broadcast %cst_253 : f32 to vector<8x128xf32>
    %653 = arith.mulf %652, %651 : vector<8x128xf32>
    %654 = math.tanh %653 : vector<8x128xf32>
    %cst_254 = arith.constant 5.000000e-01 : f32
    %655 = vector.broadcast %cst_254 : f32 to vector<8x128xf32>
    %656 = arith.mulf %655, %654 : vector<8x128xf32>
    %cst_255 = arith.constant 5.000000e-01 : f32
    %657 = vector.broadcast %cst_255 : f32 to vector<8x128xf32>
    %658 = arith.addf %656, %657 : vector<8x128xf32>
    %659 = arith.mulf %648, %579 : vector<8x128xf32>
    %660 = arith.mulf %640, %650 : vector<8x128xf32>
    %661 = arith.addf %659, %660 : vector<8x128xf32>
    %662 = math.tanh %661 : vector<8x128xf32>
    %663 = arith.mulf %658, %662 : vector<8x128xf32>
    %664 = arith.index_cast %c7_i32 : i32 to index
    %c0_256 = arith.constant 0 : index
    %c0_257 = arith.constant 0 : index
    %665 = vector.load %arg8[%664, %c0_256, %c0_257] : memref<8x8x128xf32, #tpu.memory_space<vmem>>, vector<1x8x128xf32>
    %666 = vector.shape_cast %665 : vector<1x8x128xf32> to vector<8x128xf32>
    %667 = vector.shape_cast %663 : vector<8x128xf32> to vector<1x8x128xf32>
    tpu.vector_store %arg8[%664, %c0_256, %c0_257], %667 {strides = array<i32>} : memref<8x8x128xf32, #tpu.memory_space<vmem>>, vector<1x8x128xf32>,
    %c8_i32_258 = arith.constant 8 : i32
    return
  }
  func.func @transform_0(%arg0: i32) -> (i32, i32) {
    %c0_i32 = arith.constant 0 : i32
    %c0_i32_0 = arith.constant 0 : i32
    %c0_i32_1 = arith.constant 0 : i32
    return %c0_i32, %c0_i32_0 : i32, i32
  }
  func.func @transform_1(%arg0: i32) -> (i32, i32) {
    %c0_i32 = arith.constant 0 : i32
    %c0_i32_0 = arith.constant 0 : i32
    %c0_i32_1 = arith.constant 0 : i32
    return %c0_i32, %c0_i32_0 : i32, i32
  }
  func.func @transform_2(%arg0: i32) -> (i32, i32) {
    %c0_i32 = arith.constant 0 : i32
    %c0_i32_0 = arith.constant 0 : i32
    %c0_i32_1 = arith.constant 0 : i32
    return %c0_i32, %c0_i32_0 : i32, i32
  }
  func.func @transform_3(%arg0: i32) -> (i32, i32) {
    %c0_i32 = arith.constant 0 : i32
    %c0_i32_0 = arith.constant 0 : i32
    %c0_i32_1 = arith.constant 0 : i32
    return %c0_i32, %c0_i32_0 : i32, i32
  }
  func.func @transform_4(%arg0: i32) -> (i32, i32) {
    %c0_i32 = arith.constant 0 : i32
    %c0_i32_0 = arith.constant 0 : i32
    %c0_i32_1 = arith.constant 0 : i32
    return %c0_i32, %c0_i32_0 : i32, i32
  }
  func.func @transform_5(%arg0: i32) -> (i32, i32) {
    %c0_i32 = arith.constant 0 : i32
    %c0_i32_0 = arith.constant 0 : i32
    %c0_i32_1 = arith.constant 0 : i32
    return %c0_i32, %c0_i32_0 : i32, i32
  }
  func.func @transform_6(%arg0: i32) -> (i32, i32) {
    %c0_i32 = arith.constant 0 : i32
    %c0_i32_0 = arith.constant 0 : i32
    %c0_i32_1 = arith.constant 0 : i32
    return %c0_i32, %c0_i32_0 : i32, i32
  }
  func.func @transform_7(%arg0: i32) -> (i32, i32, i32) {
    %c0_i32 = arith.constant 0 : i32
    %c0_i32_0 = arith.constant 0 : i32
    %c0_i32_1 = arith.constant 0 : i32
    %c0_i32_2 = arith.constant 0 : i32
    return %c0_i32, %c0_i32_0, %c0_i32_1 : i32, i32, i32
  }
}

</mosaic_0001>

<bundles_post_ra>
// kernel: lstm_decoder_forward.1
= control target key start
LH: loop header
LB: loop body
LE: loop exit
PB: predicated region body
PF: predicated region fallthrough
CT: control target
= control target key end

     0   :  { %12 = vsyncpa [#allocation4], 0  ;;  %s4792_s24 = smov [#allocation3]   ;;  %s5798_s0 = inlined_call_operand.vmem [shape: bf16[64,4], index: 0, kind: input, shape index: {}]   ;;  %s5799_s1 = inlined_call_operand.vmem [shape: bf16[4,64], index: 1, kind: input, shape index: {}]   ;;  %s5800_s2 = inlined_call_operand.vmem [shape: f32[1,64], index: 2, kind: input, shape index: {}]   ;;  %s5801_s3 = inlined_call_operand.vmem [shape: bf16[16,64], index: 3, kind: input, shape index: {}]   ;;  %s5802_s4 = inlined_call_operand.vmem [shape: bf16[16,512], index: 4, kind: input, shape index: {}]   ;;  %s5803_s5 = inlined_call_operand.hbm [shape: bf16[128,512], index: 5, kind: input, shape index: {}]   ;;  %s5804_s6 = inlined_call_operand.vmem [shape: f32[1,512], index: 6, kind: input, shape index: {}]   ;;  %s5805_s7 = inlined_call_operand.vmem [shape: f32[8,8,128], index: 7, kind: output, shape index: {}]  }
   0x1   :  { %s28_s25 = sshll.u32 %s4792_s24, 4  ;;  %s29_s25 = int_to_ptr.vmem [resolvable:$true] %s28_s25 }
   0x2   :  { %s4778_s26 = scalar_lea.vmem %s29_s25, 4096  ;;  %p4783_p1 = scmp.lt.s32.totalorder %s29_s25, %s29_s25 }
   0x3   :  { %p4779_p0 = scmp.ne.s32.totalorder %s29_s25, %s4778_s26  ;;  %p4784_p2 = scmp.lt.s32.totalorder %s4778_s26, %s4778_s26 }
   0x5   :  { %p4785_p3 = por %p4784_p2, %p4783_p1 }
   0x7   :  { %p4786_p4 = pnand %p4785_p3, %p4779_p0 }
   0x9   :  { %4789 = shalt.err (!%p4786_p4)
}
   0xa   :  { %s4793_s27 = smov 256   ;;  %s4794_s28 = smov 16  }
   0xb   :  { %34 = dma.hbm_to_vmem [thread:$0]  %s5803_s5, 4096, %s29_s25, [#allocation4], %s4793_s27, %s4793_s27, %s4794_s28  }
   0xc   :  { %4790 = dma.done.wait [#allocation4], 4096  }
   0xd   :  { %4791 = vsyncadd [#allocation4], 4294963200  ;;  %v5806_v0 = vmov 0   ;;  %v4846_v1 = vld [vmem:[#allocation3 + $0xe4] ss:$16 sps:$4 sm:$0xff]   ;;  %vm90_vm0 = vcmask 1041408  }
   0xe   :  { %414 = vmatprep.mubr.bf16.mxu1 %v5806_v0  ;;  %v4848_v2 = vld [vmem:[#allocation3 + $0xe0] ss:$16 sps:$4 sm:$0xff]   ;;  %382 = vmatprep.subr.bf16.mxu1 %v4846_v1  ;;  %v4851_v3 = vld [vmem:[#allocation3 + $0xc4] ss:$16 sps:$4 sm:$0xff]   ;;  %vm77_vm1 = vcmask 31744   ;;  %v4487_v11 = vld [vmem:[%s5798_s0 + $0x8] sm:$0xff]  }
   0xf   :  { %383 = vmatpush1.bf16.msra.mxu1 %v4848_v2  ;;  %v4854_v4 = vld [vmem:[#allocation3 + $0xc0] ss:$16 sps:$4 sm:$0xff]   ;;  %v4857_v5 = vld [vmem:[#allocation3 + $0xa4] ss:$16 sps:$4 sm:$0xff]   ;;  %v5808_v22 = vmov 0.0   ;;  %vm4797_vm2 = vmmov 0  }
  0x10   :  { %384 = vmatprep.subr.bf16.mxu1 %v4851_v3  ;;  %v49_v6 = vld [vmem:[%s5799_s1] sm:$0x3]  ;;  %v4866_v9 = vld [vmem:[#allocation3 + $0x84] ss:$16 sps:$4 sm:$0xff]   ;;  %vm159_vm3 = vcmask 523264   ;;  %v4514_v58 = vld [vmem:[%s5798_s0 + $0x18] sm:$0xff]  }
  0x11   :  { %v4863_v7 = vld [vmem:[#allocation3 + $0xa0] ss:$16 sps:$4 sm:$0xff]   ;;  %4458 = vmatprep.subr.msk.bf16.mxu0 %vm90_vm0, %v49_v6  ;;  %v92_v8 = vsel %vm90_vm0, %v49_v6, 0  ;;  %v4879_v13 = vld [vmem:[#allocation3 + $0x64] ss:$16 sps:$4 sm:$0xff]   ;;  %s4800_s29 = smov 80  }
  0x12   :  { %4401 = vmatpush3.bf16.msra.mxu0 %v92_v8  ;;  %v4486_v10 = vld [vmem:[%s5798_s0] sm:$0xff]   ;;  %v4936_v52 = vld [vmem:[#allocation3 + $0xe8] ss:$16 sps:$4 sm:$0xff]   ;;  %v4938_v53 = vld [vmem:[#allocation3 + $0xec] ss:$16 sps:$4 sm:$0xff]   ;;  %vm473_vm4 = vcmask 130048  }
  0x13   :  { %385 = vmatpush1.bf16.msra.mxu1 %v4854_v4  ;;  %v4875_v12 = vld [vmem:[#allocation3 + $0x80] ss:$16 sps:$4 sm:$0xff]   ;;  %4402 = vmatprep.mubr.msk.bf16.mxu0 %vm77_vm1, %v4486_v10  ;;  %v4884_v15 = vld [vmem:[#allocation3 + $0x44] ss:$16 sps:$4 sm:$0xff]   ;;  %v4940_v54 = vld [vmem:[#allocation3 + $0xcc] ss:$16 sps:$4 sm:$0xff]  }
  0x14   :  { %386 = vmatprep.subr.bf16.mxu1 %v4857_v5  ;;  %v4882_v14 = vld [vmem:[#allocation3 + $0x60] ss:$16 sps:$4 sm:$0xff]   ;;  %v4890_v17 = vld [vmem:[#allocation3 + $0x24] ss:$16 sps:$4 sm:$0xff]   ;;  %423 = vmatprep.subr.bf16.mxu0 %v4938_v53  ;;  %v4944_v55 = vld [vmem:[#allocation3 + $0xc8] ss:$16 sps:$4 sm:$0xff]  }
  0x15   :  { %4403 = vmatmul.mubr.msk.bf16.vlgmr.msra.gmra.mxu0 %vm77_vm1, %v4487_v11  ;;  %v4888_v16 = vld [vmem:[#allocation3 + $0x40] ss:$16 sps:$4 sm:$0xff]   ;;  %v4896_v19 = vld [vmem:[#allocation3 + $0x4] ss:$16 sps:$4 sm:$0xff]   ;;  %v4947_v56 = vld [vmem:[#allocation3 + $0xac] ss:$16 sps:$4 sm:$0xff]  }
  0x16   :  { %v4894_v18 = vld [vmem:[#allocation3 + $0x20] ss:$16 sps:$4 sm:$0xff]   ;;  %424 = vmatpush1.bf16.msra.mxu0 %v4936_v52  ;;  %v4957_v59 = vld [vmem:[#allocation3 + $0xa8] ss:$16 sps:$4 sm:$0xff]   ;;  %v4967_v61 = vld [vmem:[%s5802_s4 + $0xc] ss:$16 sps:$4 sm:$0xff]  }
  0x17   :  { %387 = vmatpush1.bf16.msra.mxu1 %v4863_v7  ;;  %v4900_v20 = vld [vmem:[#allocation3] ss:$16 sps:$4 sm:$0xff]   ;;  %425 = vmatprep.subr.bf16.mxu0 %v4940_v54  ;;  %v4962_v60 = vld [vmem:[%s5802_s4 + $0x8] ss:$16 sps:$4 sm:$0xff]   ;;  %v4970_v63 = vld [vmem:[#allocation3 + $0x8c] ss:$16 sps:$4 sm:$0xff]  }
  0x18   :  { %388 = vmatprep.subr.bf16.mxu1 %v4866_v9  ;;  %v4494_v21 = vld [vmem:[%s5801_s3] sm:$0xff]   ;;  %v4513_v57 = vld [vmem:[%s5798_s0 + $0x10] sm:$0xff]   ;;  %s4799_s0 = smov 32   ;;  %v4977_v6 = vld [vmem:[#allocation3 + $0x88] ss:$16 sps:$4 sm:$0xff]  }
  0x19   :  { %v4917_v23 = vld [vmem:[%s5800_s2] ss:$0 sm:$0xff]  ;;  %s4798_s2 = smov 96   ;;  %4406 = vmatprep.mubr.msk.bf16.mxu0 %vm77_vm1, %v4513_v57  ;;  %v4981_v8 = vld [vmem:[#allocation3 + $0x6c] ss:$16 sps:$4 sm:$0xff]  }
  0x1a   :  { %426 = vmatpush1.bf16.msra.mxu0 %v4944_v55  ;;  %v4985_v10 = vld [vmem:[#allocation3 + $0x68] ss:$16 sps:$4 sm:$0xff]   ;;  %v4988_v11 = vld [vmem:[#allocation3 + $0x4c] ss:$16 sps:$4 sm:$0xff]  }
  0x1b   :  { %389 = vmatpush1.bf16.msra.mxu1 %v4875_v12  ;;  %427 = vmatprep.subr.bf16.mxu0 %v4947_v56 }
  0x1c   :  { %390 = vmatprep.subr.bf16.mxu1 %v4879_v13 }
  0x1d   :  { %4407 = vmatmul.mubr.msk.bf16.gmra.mxu0 %vm77_vm1, %v4514_v58 }
  0x1e   :  { %455 = vmatprep.mubr.bf16.mxu0 %v5806_v0  ;;  %428 = vmatpush1.bf16.msra.mxu0 %v4957_v59 }
  0x1f   :  { %391 = vmatpush1.bf16.msra.mxu1 %v4882_v14  ;;  %429 = vmatprep.subr.bf16.mxu0 %v4970_v63 }
  0x20   :  { %392 = vmatprep.subr.bf16.mxu1 %v4884_v15 }
  0x22   :  { %430 = vmatpush1.bf16.msra.mxu0 %v4977_v6 }
  0x23   :  { %393 = vmatpush1.bf16.msra.mxu1 %v4888_v16  ;;  %431 = vmatprep.subr.bf16.mxu0 %v4981_v8 }
  0x24   :  { %394 = vmatprep.subr.bf16.mxu1 %v4890_v17 }
  0x26   :  { %432 = vmatpush1.bf16.msra.mxu0 %v4985_v10 }
  0x27   :  { %395 = vmatpush1.bf16.msra.mxu1 %v4894_v18  ;;  %433 = vmatprep.subr.bf16.mxu0 %v4988_v11 }
  0x28   :  { %396 = vmatprep.subr.bf16.mxu1 %v4896_v19 }
  0x2b   :  { %397 = vmatpush1.bf16.msra.mxu1 %v4900_v20 }
  0x2c   :  { %4410 = vmatprep.subr.bf16.mxu1 %v5808_v22 }
  0x2e   :  { %415 = vmatmul.mubr.bf16.vlgmr.msra.gmra.mxu1 %v5806_v0 }
  0x2f   :  { %4411 = vmatpush3.bf16.msra.mxu1 %v4494_v21  ;;  %4412 = vmatprep.mubr.msk.bf16.mxu1 %vm4797_vm2, %v5808_v22  ;;  %v4991_v21 = vld [vmem:[#allocation3 + $0x48] ss:$16 sps:$4 sm:$0xff]  }
  0x30   :  { %626 = vmatprep.subr.bf16.mxu1 %v4967_v61  ;;  %434 = vmatpush1.bf16.msra.mxu0 %v4991_v21 }
  0x36   :  { %4413 = vmatmul.mubr.bf16.vlgmr.msra.gmra.mxu1 %v5806_v0 }
  0x37   :  { %644 = vmatprep.mubr.bf16.mxu1 %v5806_v0  ;;  %627 = vmatpush1.bf16.msra.mxu1 %v4962_v60 }
  0x38   :  { %906 = vmatprep.subr.bf16.mxu1 %v4938_v53 }
  0xd5   :  { %v4404_v24 = vpop.f32.mrf.mxu0 }
  0xd6   :  { %v137_v25 = vadd.f32 %v4404_v24, %v4917_v23  ;;  %v4994_v24 = vld [vmem:[#allocation3 + $0x2c] ss:$16 sps:$4 sm:$0xff]  }
  0xd7   :  { %v128_v26 = vpop.f32.mrf.mxu0  ;;  %435 = vmatprep.subr.bf16.mxu0 %v4994_v24 }
  0xd8   :  { %162 = vst.msk [vmem:[#allocation2 + $0x10] sm:$0xff] %vm159_vm3, %v137_v25  ;;  %v129_v27 = vadd.f32 %v4917_v23, %v128_v26  ;;  %v4997_v25 = vld [vmem:[#allocation3 + $0x28] ss:$16 sps:$4 sm:$0xff]   ;;  %v5000_v26 = vld [vmem:[#allocation3 + $0xc] ss:$16 sps:$4 sm:$0xff]  }
  0xd9   :  { %v4405_v28 = vpop.f32.mrf.mxu0  ;;  %436 = vmatpush1.bf16.msra.mxu0 %v4997_v25 }
  0xda   :  { %160 = vst.msk [vmem:[#allocation2] sm:$0xff] %vm159_vm3, %v129_v27  ;;  %v140_v29 = vadd.f32 %v4405_v28, %v4917_v23  ;;  %v5003_v27 = vld [vmem:[#allocation3 + $0x8] ss:$16 sps:$4 sm:$0xff]   ;;  %437 = vmatprep.subr.bf16.mxu0 %v5000_v26  ;;  %v5009_v28 = vld [vmem:[%s5802_s4 + $0x4] ss:$16 sps:$4 sm:$0xff]  }
  0xdb   :  { %v131_v30 = vpop.f32.mrf.mxu0 }
  0xdc   :  { %163 = vst.msk [vmem:[#allocation2 + $0x18] sm:$0xff] %vm159_vm3, %v140_v29  ;;  %v132_v31 = vadd.f32 %v4917_v23, %v131_v30  ;;  %v5015_v29 = vld [vmem:[%s5802_s4] ss:$16 sps:$4 sm:$0xff]  }
  0xdd   :  { %438 = vmatpush1.bf16.msra.mxu0 %v5003_v27 }
  0xde   :  { %161 = vst.msk [vmem:[#allocation2 + $0x8] sm:$0xff] %vm159_vm3, %v132_v31  ;;  %585 = vmatprep.subr.bf16.mxu0 %v5009_v28 }
  0xe0   :  { %456 = vmatmul.mubr.bf16.vlgmr.msra.gmra.mxu0 %v5806_v0 }
  0xe1   :  { %v464_v36 = vld [vmem:[#allocation2] sm:$0xff]  ;;  %586 = vmatpush1.bf16.msra.mxu0 %v5015_v29  ;;  %603 = vmatprep.mubr.bf16.mxu0 %v5806_v0 }
  0xe2   :  { %865 = vmatprep.subr.bf16.mxu0 %v4846_v1 }
  0xee   :  { %v4927_v32 = vpop.f32.mrf.mxu1 }
  0xf0   :  { %v4929_v33 = vpop.f32.mrf.mxu1 }
  0xf2   :  { %v420_v34 = vpop.f32.mrf.mxu1 }
  0xf4   :  { %v421_v35 = vpop.f32.mrf.mxu1 }
  0xf5   :  { %v4408_v35 = vpop.f32.mrf.mxu0 }
  0xf6   :  { %v511_v37 = vpop.f32.mrf.mxu1 }
  0xf7   :  { %v517_v38 = vadd.f32 %v511_v37, %v464_v36  ;;  %v153_v36 = vadd.f32 %v4408_v35, %v4917_v23  ;;  %v144_v37 = vpop.f32.mrf.mxu0 }
  0xf8   :  { %v4414_v39 = vpop.f32.mrf.mxu1 }
  0xf9   :  { %4642 = vtanh.f32 %v517_v38  ;;  %v518_v43 = vmul.f32 0.5, %v517_v38  ;;  %166 = vst.msk [vmem:[#allocation2 + $0x30] sm:$0xff] %vm159_vm3, %v153_v36  ;;  %v145_v38 = vadd.f32 %v4917_v23, %v144_v37  ;;  %v4409_v39 = vpop.f32.mrf.mxu0 }
  0xfa   :  { %v514_v40 = vpop.f32.mrf.mxu1 }
  0xfb   :  { %4644 = vtanh.f32 %v518_v43  ;;  %164 = vst.msk [vmem:[#allocation2 + $0x20] sm:$0xff] %vm159_vm3, %v145_v38  ;;  %v156_v40 = vadd.f32 %v4409_v39, %v4917_v23 }
  0xfc   :  { %v4415_v41 = vpop.f32.mrf.mxu1 }
  0xfd   :  { %v147_v41 = vpop.f32.mrf.mxu0  ;;  %167 = vst.msk [vmem:[#allocation2 + $0x38] sm:$0xff] %vm159_vm3, %v156_v40 }
 0x106   :  { %v4643_v42 = vpop.eup %4642 }
 0x107   :  { %525 = vrot.lane.b32.xlu0 %v4643_v42, %s4798_s2  ;;  %v148_v42 = vadd.f32 %v4917_v23, %v147_v41  ;;  %v170_v23 = vlaneseq }
 0x108   :  { %v4645_v44 = vpop.eup %4644 }
 0x109   :  { %v520_v45 = vmul.f32 0.5, %v4645_v44  ;;  %165 = vst.msk [vmem:[#allocation2 + $0x28] sm:$0xff] %vm159_vm3, %v148_v42 }
 0x10b   :  { %v521_v46 = vadd.f32 0.5, %v520_v45 }
 0x10d   :  { %v523_v49 = vmul.f32 0.0, %v521_v46 }
 0x179   :  { %v526_v47 = vpop.permute.xlu0 %525 }
 0x17a   :  { %v528_v48 = vmul.f32 %v526_v47, %v521_v46 }
 0x17c   :  { %530 = vrot.lane.b32.xlu0 %v528_v48, %s4794_s28  ;;  %v171_v48 = vshrl.u32 %v170_v23, 7 }
 0x17e   :  { %v176_v57 = vsub.s32 1, %v171_v48  ;;  %v184_v42 = vsub.s32 3, %v171_v48 }
 0x1a0   :  { %v457_v43 = vpop.f32.mrf.mxu0 }
 0x1a2   :  { %v5031_v44 = vpop.f32.mrf.mxu0 }
 0x1a4   :  { %v461_v45 = vpop.f32.mrf.mxu0 }
 0x1ee   :  { %v531_v50 = vpop.permute.xlu0 %530 }
 0x1ef   :  { %v4933_v51 = vadd.f32 %v531_v50, %v523_v49  ;;  %v172_v49 = vsub.s32 0, %v171_v48  ;;  %v168_v50 = vld [vmem:[%s5804_s6] sm:$0xf] }
 0x1f1   :  { %4646 = vtanh.f32 %v4933_v51  ;;  %v5076_v58 = vrot.slane %v168_v50, %v172_v49 }
 0x1f3   :  { %5815 = vst [vmem:[#allocation6_spill] sm:$0xff] %v5076_v58 }
 0x1fe   :  { %v4647_v62 = vpop.eup %4646 }
 0x1ff   :  { %536 = vrot.lane.b32.xlu1 %v4647_v62, %s4799_s0  ;;  %v180_v62 = vsub.s32 2, %v171_v48 }
 0x271   :  { %v537_v30 = vpop.permute.xlu1 %536 }
 0x272   :  { %v539_v31 = vmul.f32 %v537_v30, %v521_v46  ;;  %v462_v46 = vpop.f32.mrf.mxu0  ;;  %v5078_v30 = vrot.slane %v168_v50, %v176_v57 }
 0x274   :  { %v540_v34 = vpack.c.bf16 %v539_v31, %v539_v31  ;;  %5816 = vst [vmem:[#allocation7_spill] sm:$0xff] %v5078_v30  ;;  %v417_v31 = vadd.f32 %v4927_v32, %v5076_v58  ;;  %v419_v37 = vadd.f32 %v4929_v33, %v5078_v30 }
 0x276   :  { %546 = vrot.lane.b32.xlu1 %v540_v34, %s4800_s29  ;;  %v5082_v34 = vrot.slane %v168_v50, %v180_v62 }
 0x278   :  { %v458_v41 = vadd.f32 %v457_v43, %v5082_v34 }
 0x2e8   :  { %v5033_v47 = vpop.permute.xlu1 %546 }
 0x2e9   :  { %4090 = vmatmul.mubr.msk.bf16.vlgmr.msra.gmra.mxu0 %vm473_vm4, %v5033_v47  ;;  %4091 = vmatmul.mubr.msk.bf16.vlgmr.msra.gmra.mxu1 %vm473_vm4, %v5033_v47 }
 0x2ea   :  { %866 = vmatpush1.bf16.msra.mxu0 %v4848_v2  ;;  %907 = vmatpush1.bf16.msra.mxu1 %v4936_v52 }
 0x2eb   :  { %867 = vmatprep.subr.bf16.mxu0 %v4851_v3  ;;  %908 = vmatprep.subr.bf16.mxu1 %v4940_v54 }
 0x2ec   :  { %897 = vmatprep.mubr.bf16.mxu0 %v5806_v0  ;;  %938 = vmatprep.mubr.bf16.mxu1 %v5806_v0 }
 0x2ee   :  { %868 = vmatpush1.bf16.msra.mxu0 %v4854_v4  ;;  %909 = vmatpush1.bf16.msra.mxu1 %v4944_v55 }
 0x2ef   :  { %869 = vmatprep.subr.bf16.mxu0 %v4857_v5  ;;  %910 = vmatprep.subr.bf16.mxu1 %v4947_v56 }
 0x2f2   :  { %870 = vmatpush1.bf16.msra.mxu0 %v4863_v7  ;;  %911 = vmatpush1.bf16.msra.mxu1 %v4957_v59 }
 0x2f3   :  { %871 = vmatprep.subr.bf16.mxu0 %v4866_v9  ;;  %912 = vmatprep.subr.bf16.mxu1 %v4970_v63 }
 0x2f6   :  { %872 = vmatpush1.bf16.msra.mxu0 %v4875_v12  ;;  %913 = vmatpush1.bf16.msra.mxu1 %v4977_v6 }
 0x2f7   :  { %873 = vmatprep.subr.bf16.mxu0 %v4879_v13  ;;  %914 = vmatprep.subr.bf16.mxu1 %v4981_v8 }
 0x2fa   :  { %874 = vmatpush1.bf16.msra.mxu0 %v4882_v14  ;;  %915 = vmatpush1.bf16.msra.mxu1 %v4985_v10 }
 0x2fb   :  { %875 = vmatprep.subr.bf16.mxu0 %v4884_v15  ;;  %916 = vmatprep.subr.bf16.mxu1 %v4988_v11 }
 0x2fe   :  { %876 = vmatpush1.bf16.msra.mxu0 %v4888_v16  ;;  %917 = vmatpush1.bf16.msra.mxu1 %v4991_v21 }
 0x2ff   :  { %877 = vmatprep.subr.bf16.mxu0 %v4890_v17  ;;  %918 = vmatprep.subr.bf16.mxu1 %v4994_v24 }
 0x302   :  { %878 = vmatpush1.bf16.msra.mxu0 %v4894_v18  ;;  %919 = vmatpush1.bf16.msra.mxu1 %v4997_v25 }
 0x303   :  { %879 = vmatprep.subr.bf16.mxu0 %v4896_v19  ;;  %920 = vmatprep.subr.bf16.mxu1 %v5000_v26 }
 0x306   :  { %880 = vmatpush1.bf16.msra.mxu0 %v4900_v20  ;;  %921 = vmatpush1.bf16.msra.mxu1 %v5003_v27 }
 0x307   :  { %4416 = vmatprep.subr.bf16.mxu0 %v5808_v22  ;;  %1065 = vmatprep.subr.bf16.mxu1 %v5009_v28  ;;  %v5087_v22 = vrot.slane %v168_v50, %v184_v42 }
 0x309   :  { %v460_v33 = vadd.f32 %v5031_v44, %v5087_v22 }
 0x3a9   :  { %v605_v35 = vpop.f32.mrf.mxu0  ;;  %v646_v36 = vpop.f32.mrf.mxu1 }
 0x3aa   :  { %v606_v38 = vadd.f32 %v605_v35, %v417_v31  ;;  %v647_v57 = vadd.f32 %v646_v36, %v458_v41 }
 0x3ab   :  { %v607_v39 = vpop.f32.mrf.mxu0  ;;  %v648_v40 = vpop.f32.mrf.mxu1 }
 0x3ac   :  { %v653_v45 = vmul.f32 0.5, %v606_v38  ;;  %v608_v46 = vadd.f32 %v607_v39, %v419_v37  ;;  %v649_v31 = vadd.f32 %v648_v40, %v460_v33 }
 0x3ad   :  { %v609_v23 = vpop.f32.mrf.mxu0  ;;  %v650_v49 = vpop.f32.mrf.mxu1 }
 0x3ae   :  { %4648 = vtanh.f32 %v653_v45  ;;  %v657_v32 = vmul.f32 0.5, %v608_v46  ;;  %v662_v35 = vmul.f32 0.5, %v649_v31  ;;  %v4527_v49 = vld [vmem:[%s5801_s3] sm:$0xff]  }
 0x3af   :  { %v610_v62 = vpop.f32.mrf.mxu0  ;;  %v651_v0 = vpop.f32.mrf.mxu1 }
 0x3b0   :  { %4650 = vtanh.f32 %v657_v32  ;;  %v5817_v32 = vmov 0.0   ;;  %v5818_v62 = vmov 0  }
 0x3b1   :  { %4652 = vtanh.f32 %v647_v57 }
 0x3b2   :  { %4654 = vtanh.f32 %v662_v35 }
 0x3bb   :  { %v4649_v43 = vpop.eup %4648 }
 0x3bc   :  { %v655_v48 = vmul.f32 0.5, %v4649_v43 }
 0x3bd   :  { %v4651_v38 = vpop.eup %4650 }
 0x3be   :  { %v656_v37 = vadd.f32 0.5, %v655_v48  ;;  %v659_v39 = vmul.f32 0.5, %v4651_v38  ;;  %v4653_v45 = vpop.eup %4652 }
 0x3bf   :  { %v4655_v50 = vpop.eup %4654 }
 0x3c0   :  { %v660_v36 = vadd.f32 0.5, %v659_v39  ;;  %v667_v41 = vmul.f32 %v4653_v45, %v656_v37  ;;  %v664_v42 = vmul.f32 0.5, %v4655_v50  ;;  %v948_v39 = vld [vmem:[#allocation2 + $0x8] sm:$0xff] }
 0x3c2   :  { %v666_v46 = vmul.f32 0.0, %v660_v36  ;;  %v665_v23 = vadd.f32 0.5, %v664_v42 }
 0x3c4   :  { %v5091_v0 = vadd.f32 %v667_v41, %v666_v46 }
 0x3c6   :  { %4656 = vtanh.f32 %v5091_v0 }
 0x3d3   :  { %v4657_v44 = vpop.eup %4656 }
 0x3d4   :  { %v670_v40 = vmul.f32 %v4657_v44, %v665_v23 }
 0x3d6   :  { %671 = vst [vmem:[%s5805_s7] sm:$0xff] %v670_v40  ;;  %v672_v57 = vpack.c.bf16 %v670_v40, %v670_v40 }
 0x3d8   :  { %898 = vmatmul.mubr.bf16.vlgmr.msra.gmra.mxu0 %v672_v57  ;;  %939 = vmatmul.mubr.bf16.vlgmr.msra.gmra.mxu1 %v672_v57 }
 0x3d9   :  { %4417 = vmatpush3.bf16.msra.mxu0 %v4527_v49  ;;  %4418 = vmatprep.mubr.msk.bf16.mxu0 %vm4797_vm2, %v5817_v32 }
 0x3da   :  { %1066 = vmatpush1.bf16.msra.mxu1 %v5015_v29  ;;  %1106 = vmatprep.subr.bf16.mxu0 %v4967_v61 }
 0x3db   :  { %1083 = vmatprep.mubr.bf16.mxu1 %v5818_v62  ;;  %1346 = vmatprep.subr.bf16.mxu1 %v4846_v1 }
 0x3e0   :  { %4419 = vmatmul.mubr.msk.bf16.vlgmr.msra.gmra.mxu0 %vm473_vm4, %v5033_v47 }
 0x3e1   :  { %1107 = vmatpush1.bf16.msra.mxu0 %v4962_v60  ;;  %1124 = vmatprep.mubr.bf16.mxu0 %v5818_v62 }
 0x3e2   :  { %1387 = vmatprep.subr.bf16.mxu0 %v4938_v53 }
 0x498   :  { %v5111_v33 = vpop.f32.mrf.mxu0  ;;  %v5113_v31 = vpop.f32.mrf.mxu1 }
 0x49a   :  { %v5115_v35 = vpop.f32.mrf.mxu0  ;;  %v5117_v43 = vpop.f32.mrf.mxu1 }
 0x49c   :  { %v903_v48 = vpop.f32.mrf.mxu0  ;;  %v944_v38 = vpop.f32.mrf.mxu1 }
 0x49e   :  { %v904_v1 = vpop.f32.mrf.mxu0  ;;  %v945_v37 = vpop.f32.mrf.mxu1 }
 0x4a0   :  { %v991_v47 = vpop.f32.mrf.mxu0 }
 0x4a1   :  { %v997_v45 = vadd.f32 %v991_v47, %v948_v39 }
 0x4a2   :  { %v4420_v36 = vpop.f32.mrf.mxu0 }
 0x4a3   :  { %4658 = vtanh.f32 %v997_v45  ;;  %v998_v50 = vmul.f32 0.5, %v997_v45 }
 0x4a4   :  { %v994_v41 = vpop.f32.mrf.mxu0 }
 0x4a5   :  { %4660 = vtanh.f32 %v998_v50 }
 0x4a6   :  { %v4421_v46 = vpop.f32.mrf.mxu0 }
 0x4b0   :  { %v4659_v53 = vpop.eup %4658 }
 0x4b1   :  { %1005 = vrot.lane.b32.xlu0 %v4659_v53, %s4798_s2 }
 0x4b2   :  { %v4661_v42 = vpop.eup %4660 }
 0x4b3   :  { %v1000_v23 = vmul.f32 0.5, %v4661_v42  ;;  %v1429_v42 = vld [vmem:[#allocation2 + $0x10] sm:$0xff] }
 0x4b5   :  { %v1001_v44 = vadd.f32 0.5, %v1000_v23 }
 0x4b7   :  { %v1003_v57 = vmul.f32 %v1001_v44, %v4933_v51 }
 0x523   :  { %v1006_v40 = vpop.permute.xlu0 %1005 }
 0x524   :  { %v1008_v49 = vmul.f32 %v1006_v40, %v1001_v44 }
 0x526   :  { %1010 = vrot.lane.b32.xlu1 %v1008_v49, %s4794_s28 }
 0x598   :  { %v1011_v48 = vpop.permute.xlu1 %1010 }
 0x599   :  { %v5122_v38 = vadd.f32 %v1011_v48, %v1003_v57 }
 0x59b   :  { %4662 = vtanh.f32 %v5122_v38 }
 0x5a8   :  { %v4663_v1 = vpop.eup %4662 }
 0x5a9   :  { %1016 = vrot.lane.b32.xlu0 %v4663_v1, %s4799_s0 }
 0x61b   :  { %v1017_v37 = vpop.permute.xlu0 %1016 }
 0x61c   :  { %v1019_v39 = vmul.f32 %v1017_v37, %v1001_v44 }
 0x61e   :  { %v1020_v47 = vpack.c.bf16 %v1019_v39, %v1019_v39 }
 0x620   :  { %1026 = vrot.lane.b32.xlu1 %v1020_v47, %s4800_s29 }
 0x692   :  { %v5127_v45 = vpop.permute.xlu1 %1026 }
 0x693   :  { %4130 = vmatmul.mubr.msk.bf16.vlgmr.msra.gmra.mxu1 %vm473_vm4, %v5127_v45  ;;  %4131 = vmatmul.mubr.msk.bf16.vlgmr.msra.gmra.mxu0 %vm473_vm4, %v5127_v45 }
 0x694   :  { %1347 = vmatpush1.bf16.msra.mxu1 %v4848_v2  ;;  %1388 = vmatpush1.bf16.msra.mxu0 %v4936_v52  ;;  %v900_v2 = vadd.f32 %v5111_v33, %v5076_v58  ;;  %v943_v52 = vadd.f32 %v5117_v43, %v5087_v22 }
 0x695   :  { %1348 = vmatprep.subr.bf16.mxu1 %v4851_v3  ;;  %1389 = vmatprep.subr.bf16.mxu0 %v4940_v54 }
 0x696   :  { %1378 = vmatprep.mubr.bf16.mxu1 %v5818_v62  ;;  %1419 = vmatprep.mubr.bf16.mxu0 %v5818_v62 }
 0x698   :  { %1349 = vmatpush1.bf16.msra.mxu1 %v4854_v4  ;;  %1390 = vmatpush1.bf16.msra.mxu0 %v4944_v55 }
 0x699   :  { %1350 = vmatprep.subr.bf16.mxu1 %v4857_v5  ;;  %1391 = vmatprep.subr.bf16.mxu0 %v4947_v56  ;;  %v902_v5 = vadd.f32 %v5115_v35, %v5078_v30  ;;  %v4528_v35 = vld [vmem:[%s5801_s3] sm:$0xff]  }
 0x69c   :  { %1351 = vmatpush1.bf16.msra.mxu1 %v4863_v7  ;;  %1392 = vmatpush1.bf16.msra.mxu0 %v4957_v59 }
 0x69d   :  { %1352 = vmatprep.subr.bf16.mxu1 %v4866_v9  ;;  %1393 = vmatprep.subr.bf16.mxu0 %v4970_v63 }
 0x6a0   :  { %1353 = vmatpush1.bf16.msra.mxu1 %v4875_v12  ;;  %1394 = vmatpush1.bf16.msra.mxu0 %v4977_v6 }
 0x6a1   :  { %1354 = vmatprep.subr.bf16.mxu1 %v4879_v13  ;;  %1395 = vmatprep.subr.bf16.mxu0 %v4981_v8  ;;  %v941_v13 = vadd.f32 %v5113_v31, %v5082_v34 }
 0x6a4   :  { %1355 = vmatpush1.bf16.msra.mxu1 %v4882_v14  ;;  %1396 = vmatpush1.bf16.msra.mxu0 %v4985_v10 }
 0x6a5   :  { %1356 = vmatprep.subr.bf16.mxu1 %v4884_v15  ;;  %1397 = vmatprep.subr.bf16.mxu0 %v4988_v11 }
 0x6a8   :  { %1357 = vmatpush1.bf16.msra.mxu1 %v4888_v16  ;;  %1398 = vmatpush1.bf16.msra.mxu0 %v4991_v21 }
 0x6a9   :  { %1358 = vmatprep.subr.bf16.mxu1 %v4890_v17  ;;  %1399 = vmatprep.subr.bf16.mxu0 %v4994_v24 }
 0x6ac   :  { %1359 = vmatpush1.bf16.msra.mxu1 %v4894_v18  ;;  %1400 = vmatpush1.bf16.msra.mxu0 %v4997_v25 }
 0x6ad   :  { %1360 = vmatprep.subr.bf16.mxu1 %v4896_v19  ;;  %1401 = vmatprep.subr.bf16.mxu0 %v5000_v26 }
 0x6b0   :  { %1361 = vmatpush1.bf16.msra.mxu1 %v4900_v20  ;;  %1402 = vmatpush1.bf16.msra.mxu0 %v5003_v27 }
 0x6b1   :  { %4422 = vmatprep.subr.bf16.mxu1 %v5817_v32  ;;  %1546 = vmatprep.subr.bf16.mxu0 %v5009_v28 }
 0x753   :  { %v1085_v3 = vpop.f32.mrf.mxu1  ;;  %v1126_v4 = vpop.f32.mrf.mxu0 }
 0x754   :  { %v1086_v7 = vadd.f32 %v1085_v3, %v900_v2  ;;  %v1127_v18 = vadd.f32 %v1126_v4, %v941_v13 }
 0x755   :  { %v1087_v9 = vpop.f32.mrf.mxu1  ;;  %v1128_v12 = vpop.f32.mrf.mxu0 }
 0x756   :  { %v1133_v14 = vmul.f32 0.5, %v1086_v7  ;;  %v1088_v15 = vadd.f32 %v1087_v9, %v902_v5  ;;  %v1129_v54 = vadd.f32 %v1128_v12, %v943_v52  ;;  %v5244_v52 = vld [vmem:[#allocation3 + $0xac] ss:$16 sps:$4 sm:$0xff]  }
 0x757   :  { %v1089_v16 = vpop.f32.mrf.mxu1  ;;  %v1130_v17 = vpop.f32.mrf.mxu0 }
 0x758   :  { %4664 = vtanh.f32 %v1133_v14  ;;  %v1137_v19 = vmul.f32 0.5, %v1088_v15  ;;  %v1142_v55 = vmul.f32 0.5, %v1129_v54  ;;  %v5220_v14 = vld [vmem:[#allocation3 + $0xec] ss:$16 sps:$4 sm:$0xff]   ;;  %v5222_v15 = vld [vmem:[#allocation3 + $0xe0] ss:$16 sps:$4 sm:$0xff]  }
 0x759   :  { %v1090_v20 = vpop.f32.mrf.mxu1  ;;  %v1131_v51 = vpop.f32.mrf.mxu0  ;;  %v5224_v16 = vld [vmem:[#allocation3 + $0xe8] ss:$16 sps:$4 sm:$0xff]   ;;  %v5230_v17 = vld [vmem:[#allocation3 + $0xc4] ss:$16 sps:$4 sm:$0xff]   ;;  %v5246_v54 = vld [vmem:[#allocation3 + $0xa0] ss:$16 sps:$4 sm:$0xff]  }
 0x75a   :  { %4666 = vtanh.f32 %v1137_v19  ;;  %v5234_v19 = vld [vmem:[#allocation3 + $0xc0] ss:$16 sps:$4 sm:$0xff]   ;;  %v5236_v20 = vld [vmem:[#allocation3 + $0xc8] ss:$16 sps:$4 sm:$0xff]   ;;  %v5242_v51 = vld [vmem:[#allocation3 + $0xa4] ss:$16 sps:$4 sm:$0xff]  }
 0x75b   :  { %4668 = vtanh.f32 %v1127_v18  ;;  %v5232_v18 = vld [vmem:[#allocation3 + $0xcc] ss:$16 sps:$4 sm:$0xff]  }
 0x75c   :  { %4670 = vtanh.f32 %v1142_v55  ;;  %v5248_v55 = vld [vmem:[#allocation3 + $0xa8] ss:$16 sps:$4 sm:$0xff]  }
 0x765   :  { %v4665_v56 = vpop.eup %4664 }
 0x766   :  { %v1135_v59 = vmul.f32 0.5, %v4665_v56  ;;  %v5254_v56 = vld [vmem:[#allocation3 + $0x84] ss:$16 sps:$4 sm:$0xff]  }
 0x767   :  { %v4667_v63 = vpop.eup %4666 }
 0x768   :  { %v1136_v6 = vadd.f32 0.5, %v1135_v59  ;;  %v1139_v8 = vmul.f32 0.5, %v4667_v63  ;;  %v4669_v10 = vpop.eup %4668  ;;  %v5256_v59 = vld [vmem:[#allocation3 + $0x8c] ss:$16 sps:$4 sm:$0xff]   ;;  %v5258_v63 = vld [vmem:[#allocation3 + $0x80] ss:$16 sps:$4 sm:$0xff]  }
 0x769   :  { %v4671_v26 = vpop.eup %4670 }
 0x76a   :  { %v1140_v11 = vadd.f32 0.5, %v1139_v8  ;;  %v1147_v21 = vmul.f32 %v4669_v10, %v1136_v6  ;;  %v1144_v27 = vmul.f32 0.5, %v4671_v26  ;;  %v5260_v6 = vld [vmem:[#allocation3 + $0x88] ss:$16 sps:$4 sm:$0xff]   ;;  %v5266_v8 = vld [vmem:[#allocation3 + $0x64] ss:$16 sps:$4 sm:$0xff]  }
 0x76b   :  { %v5268_v10 = vld [vmem:[#allocation3 + $0x6c] ss:$16 sps:$4 sm:$0xff]  }
 0x76c   :  { %v1146_v24 = vmul.f32 %v1140_v11, %v5091_v0  ;;  %v1145_v28 = vadd.f32 0.5, %v1144_v27  ;;  %v5270_v11 = vld [vmem:[#allocation3 + $0x60] ss:$16 sps:$4 sm:$0xff]   ;;  %v5280_v26 = vld [vmem:[#allocation3 + $0x4c] ss:$16 sps:$4 sm:$0xff]  }
 0x76d   :  { %v5282_v27 = vld [vmem:[#allocation3 + $0x40] ss:$16 sps:$4 sm:$0xff]  }
 0x76e   :  { %v5176_v25 = vadd.f32 %v1147_v21, %v1146_v24  ;;  %v5272_v21 = vld [vmem:[#allocation3 + $0x68] ss:$16 sps:$4 sm:$0xff]   ;;  %v5278_v24 = vld [vmem:[#allocation3 + $0x44] ss:$16 sps:$4 sm:$0xff]  }
 0x770   :  { %4672 = vtanh.f32 %v5176_v25 }
 0x77d   :  { %v4673_v33 = vpop.eup %4672 }
 0x77e   :  { %v1150_v31 = vmul.f32 %v4673_v33, %v1145_v28  ;;  %v5284_v28 = vld [vmem:[#allocation3 + $0x48] ss:$16 sps:$4 sm:$0xff]   ;;  %v5290_v33 = vld [vmem:[#allocation3 + $0x24] ss:$16 sps:$4 sm:$0xff]  }
 0x780   :  { %4132 = vst [vmem:[%s5805_s7 + $0x8] sm:$0xff] %v1150_v31  ;;  %v1153_v43 = vpack.c.bf16 %v1150_v31, %v1150_v31  ;;  %v5292_v31 = vld [vmem:[#allocation3 + $0x2c] ss:$16 sps:$4 sm:$0xff]  }
 0x782   :  { %1379 = vmatmul.mubr.bf16.vlgmr.msra.gmra.mxu1 %v1153_v43  ;;  %1420 = vmatmul.mubr.bf16.vlgmr.msra.gmra.mxu0 %v1153_v43  ;;  %v5296_v43 = vld [vmem:[#allocation3 + $0x28] ss:$16 sps:$4 sm:$0xff]  }
 0x783   :  { %4423 = vmatpush3.bf16.msra.mxu1 %v4528_v35  ;;  %4424 = vmatprep.mubr.msk.bf16.mxu1 %vm4797_vm2, %v5817_v32  ;;  %v5294_v35 = vld [vmem:[#allocation3 + $0x20] ss:$16 sps:$4 sm:$0xff]  }
 0x784   :  { %1547 = vmatpush1.bf16.msra.mxu0 %v5015_v29  ;;  %1587 = vmatprep.subr.bf16.mxu1 %v4967_v61 }
 0x785   :  { %1564 = vmatprep.mubr.bf16.mxu0 %v5818_v62 }
 0x78a   :  { %4425 = vmatmul.mubr.msk.bf16.vlgmr.msra.gmra.mxu1 %vm473_vm4, %v5127_v45 }
 0x78b   :  { %1588 = vmatpush1.bf16.msra.mxu1 %v4962_v60  ;;  %1605 = vmatprep.mubr.bf16.mxu1 %v5818_v62 }
 0x78c   :  { %1868 = vmatprep.subr.bf16.mxu1 %v5220_v14 }
 0x842   :  { %v5194_v0 = vpop.f32.mrf.mxu1  ;;  %v5196_v36 = vpop.f32.mrf.mxu0 }
 0x844   :  { %v5198_v41 = vpop.f32.mrf.mxu1  ;;  %v5200_v46 = vpop.f32.mrf.mxu0 }
 0x846   :  { %v1384_v29 = vpop.f32.mrf.mxu1  ;;  %v1425_v53 = vpop.f32.mrf.mxu0 }
 0x847   :  { %v5302_v29 = vld [vmem:[#allocation3 + $0x4] ss:$16 sps:$4 sm:$0xff]   ;;  %v5304_v53 = vld [vmem:[#allocation3 + $0xc] ss:$16 sps:$4 sm:$0xff]  }
 0x848   :  { %v1385_v61 = vpop.f32.mrf.mxu1  ;;  %v1426_v50 = vpop.f32.mrf.mxu0 }
 0x849   :  { %v5306_v61 = vld [vmem:[#allocation3] ss:$16 sps:$4 sm:$0xff]   ;;  %v5308_v50 = vld [vmem:[#allocation3 + $0x8] ss:$16 sps:$4 sm:$0xff]  }
 0x84a   :  { %v1472_v23 = vpop.f32.mrf.mxu1 }
 0x84b   :  { %v1478_v44 = vadd.f32 %v1472_v23, %v1429_v42  ;;  %v1381_v42 = vadd.f32 %v5194_v0, %v5076_v58 }
 0x84c   :  { %v4426_v40 = vpop.f32.mrf.mxu1 }
 0x84d   :  { %4674 = vtanh.f32 %v1478_v44  ;;  %v1479_v48 = vmul.f32 0.5, %v1478_v44  ;;  %v1383_v40 = vadd.f32 %v5198_v41, %v5078_v30  ;;  %v1424_v41 = vadd.f32 %v5200_v46, %v5087_v22 }
 0x84e   :  { %v1475_v60 = vpop.f32.mrf.mxu1 }
 0x84f   :  { %4676 = vtanh.f32 %v1479_v48  ;;  %v1422_v48 = vadd.f32 %v5196_v36, %v5082_v34 }
 0x850   :  { %v4427_v49 = vpop.f32.mrf.mxu1 }
 0x85a   :  { %v4675_v57 = vpop.eup %4674 }
 0x85b   :  { %1486 = vrot.lane.b32.xlu0 %v4675_v57, %s4798_s2 }
 0x85c   :  { %v4677_v1 = vpop.eup %4676 }
 0x85d   :  { %v1481_v37 = vmul.f32 0.5, %v4677_v1 }
 0x85f   :  { %v1482_v39 = vadd.f32 0.5, %v1481_v37 }
 0x861   :  { %v1484_v2 = vmul.f32 %v1482_v39, %v5122_v38  ;;  %v5218_v38 = vld [vmem:[#allocation3 + $0xe4] ss:$16 sps:$4 sm:$0xff]  }
 0x862   :  { %1827 = vmatprep.subr.bf16.mxu0 %v5218_v38 }
 0x8cd   :  { %v1487_v47 = vpop.permute.xlu0 %1486 }
 0x8ce   :  { %v1489_v45 = vmul.f32 %v1487_v47, %v1482_v39 }
 0x8d0   :  { %1491 = vrot.lane.b32.xlu1 %v1489_v45, %s4794_s28 }
 0x942   :  { %v1492_v3 = vpop.permute.xlu1 %1491 }
 0x943   :  { %v5205_v4 = vadd.f32 %v1492_v3, %v1484_v2 }
 0x945   :  { %4678 = vtanh.f32 %v5205_v4 }
 0x952   :  { %v4679_v5 = vpop.eup %4678 }
 0x953   :  { %1497 = vrot.lane.b32.xlu0 %v4679_v5, %s4799_s0 }
 0x9c5   :  { %v1498_v7 = vpop.permute.xlu0 %1497 }
 0x9c6   :  { %v1500_v9 = vmul.f32 %v1498_v7, %v1482_v39 }
 0x9c8   :  { %v1501_v12 = vpack.c.bf16 %v1500_v9, %v1500_v9 }
 0x9ca   :  { %1507 = vrot.lane.b32.xlu1 %v1501_v12, %s4800_s29 }
 0xa3c   :  { %v5210_v13 = vpop.permute.xlu1 %1507 }
 0xa3d   :  { %4171 = vmatmul.mubr.msk.bf16.vlgmr.msra.gmra.mxu0 %vm473_vm4, %v5210_v13  ;;  %4172 = vmatmul.mubr.msk.bf16.vlgmr.msra.gmra.mxu1 %vm473_vm4, %v5210_v13 }
 0xa3e   :  { %1859 = vmatprep.mubr.bf16.mxu0 %v5818_v62  ;;  %1900 = vmatprep.mubr.bf16.mxu1 %v5818_v62 }
 0xa3f   :  { %1828 = vmatpush1.bf16.msra.mxu0 %v5222_v15  ;;  %1869 = vmatpush1.bf16.msra.mxu1 %v5224_v16 }
 0xa40   :  { %1829 = vmatprep.subr.bf16.mxu0 %v5230_v17  ;;  %1870 = vmatprep.subr.bf16.mxu1 %v5232_v18 }
 0xa43   :  { %1830 = vmatpush1.bf16.msra.mxu0 %v5234_v19  ;;  %1871 = vmatpush1.bf16.msra.mxu1 %v5236_v20 }
 0xa44   :  { %1831 = vmatprep.subr.bf16.mxu0 %v5242_v51  ;;  %1872 = vmatprep.subr.bf16.mxu1 %v5244_v52 }
 0xa47   :  { %1832 = vmatpush1.bf16.msra.mxu0 %v5246_v54  ;;  %1873 = vmatpush1.bf16.msra.mxu1 %v5248_v55 }
 0xa48   :  { %1833 = vmatprep.subr.bf16.mxu0 %v5254_v56  ;;  %1874 = vmatprep.subr.bf16.mxu1 %v5256_v59 }
 0xa4b   :  { %1834 = vmatpush1.bf16.msra.mxu0 %v5258_v63  ;;  %1875 = vmatpush1.bf16.msra.mxu1 %v5260_v6 }
 0xa4c   :  { %1835 = vmatprep.subr.bf16.mxu0 %v5266_v8  ;;  %1876 = vmatprep.subr.bf16.mxu1 %v5268_v10 }
 0xa4f   :  { %1836 = vmatpush1.bf16.msra.mxu0 %v5270_v11  ;;  %1877 = vmatpush1.bf16.msra.mxu1 %v5272_v21 }
 0xa50   :  { %1837 = vmatprep.subr.bf16.mxu0 %v5278_v24  ;;  %1878 = vmatprep.subr.bf16.mxu1 %v5280_v26 }
 0xa53   :  { %1838 = vmatpush1.bf16.msra.mxu0 %v5282_v27  ;;  %1879 = vmatpush1.bf16.msra.mxu1 %v5284_v28 }
 0xa54   :  { %1839 = vmatprep.subr.bf16.mxu0 %v5290_v33  ;;  %1880 = vmatprep.subr.bf16.mxu1 %v5292_v31 }
 0xa57   :  { %1840 = vmatpush1.bf16.msra.mxu0 %v5294_v35  ;;  %1881 = vmatpush1.bf16.msra.mxu1 %v5296_v43 }
 0xa58   :  { %1841 = vmatprep.subr.bf16.mxu0 %v5302_v29  ;;  %1882 = vmatprep.subr.bf16.mxu1 %v5304_v53 }
 0xa5b   :  { %1842 = vmatpush1.bf16.msra.mxu0 %v5306_v61  ;;  %1883 = vmatpush1.bf16.msra.mxu1 %v5308_v50 }
 0xa5c   :  { %4428 = vmatprep.subr.bf16.mxu0 %v5817_v32 }
 0xafd   :  { %v1566_v23 = vpop.f32.mrf.mxu0  ;;  %v1607_v44 = vpop.f32.mrf.mxu1 }
 0xafe   :  { %v1567_v60 = vadd.f32 %v1566_v23, %v1381_v42  ;;  %v1608_v45 = vadd.f32 %v1607_v44, %v1422_v48 }
 0xaff   :  { %v1568_v49 = vpop.f32.mrf.mxu0  ;;  %v1609_v57 = vpop.f32.mrf.mxu1 }
 0xb00   :  { %v1614_v1 = vmul.f32 0.5, %v1567_v60  ;;  %v1569_v37 = vadd.f32 %v1568_v49, %v1383_v40  ;;  %v1610_v5 = vadd.f32 %v1609_v57, %v1424_v41 }
 0xb01   :  { %v1570_v39 = vpop.f32.mrf.mxu0  ;;  %v1611_v47 = vpop.f32.mrf.mxu1 }
 0xb02   :  { %4680 = vtanh.f32 %v1614_v1  ;;  %v1618_v2 = vmul.f32 0.5, %v1569_v37  ;;  %v1623_v7 = vmul.f32 0.5, %v1610_v5  ;;  %v4577_v47 = vld [vmem:[%s5801_s3] sm:$0xff]  }
 0xb03   :  { %v1571_v3 = vpop.f32.mrf.mxu0  ;;  %v1612_v0 = vpop.f32.mrf.mxu1 }
 0xb04   :  { %4682 = vtanh.f32 %v1618_v2 }
 0xb05   :  { %4684 = vtanh.f32 %v1608_v45 }
 0xb06   :  { %4686 = vtanh.f32 %v1623_v7 }
 0xb0f   :  { %v4681_v9 = vpop.eup %4680 }
 0xb10   :  { %v1616_v12 = vmul.f32 0.5, %v4681_v9 }
 0xb11   :  { %v4683_v42 = vpop.eup %4682 }
 0xb12   :  { %v1617_v36 = vadd.f32 0.5, %v1616_v12  ;;  %v1620_v23 = vmul.f32 0.5, %v4683_v42  ;;  %v4685_v40 = vpop.eup %4684  ;;  %v1910_v12 = vld [vmem:[#allocation2 + $0x18] sm:$0xff] }
 0xb13   :  { %v4687_v1 = vpop.eup %4686 }
 0xb14   :  { %v1621_v60 = vadd.f32 0.5, %v1620_v23  ;;  %v1628_v49 = vmul.f32 %v4685_v40, %v1617_v36  ;;  %v1625_v37 = vmul.f32 0.5, %v4687_v1 }
 0xb16   :  { %v1627_v44 = vmul.f32 %v1621_v60, %v5176_v25  ;;  %v1626_v46 = vadd.f32 0.5, %v1625_v37 }
 0xb18   :  { %v5324_v48 = vadd.f32 %v1628_v49, %v1627_v44 }
 0xb1a   :  { %4688 = vtanh.f32 %v5324_v48 }
 0xb27   :  { %v4689_v57 = vpop.eup %4688 }
 0xb28   :  { %v1631_v39 = vmul.f32 %v4689_v57, %v1626_v46 }
 0xb2a   :  { %4173 = vst [vmem:[%s5805_s7 + $0x10] sm:$0xff] %v1631_v39  ;;  %v1634_v45 = vpack.c.bf16 %v1631_v39, %v1631_v39 }
 0xb2c   :  { %1860 = vmatmul.mubr.bf16.vlgmr.msra.gmra.mxu0 %v1634_v45  ;;  %1901 = vmatmul.mubr.bf16.vlgmr.msra.gmra.mxu1 %v1634_v45 }
 0xb2d   :  { %4429 = vmatpush3.bf16.msra.mxu0 %v4577_v47  ;;  %4430 = vmatprep.mubr.msk.bf16.mxu0 %vm4797_vm2, %v5817_v32 }
 0xb2e   :  { %2045 = vmatprep.mubr.bf16.mxu1 %v5818_v62 }
 0xb34   :  { %4431 = vmatmul.mubr.msk.bf16.vlgmr.msra.gmra.mxu0 %vm473_vm4, %v5210_v13 }
 0xb35   :  { %2086 = vmatprep.mubr.bf16.mxu0 %v5818_v62 }
 0xbec   :  { %v5339_v25 = vpop.f32.mrf.mxu0  ;;  %v5341_v2 = vpop.f32.mrf.mxu1 }
 0xbee   :  { %v5343_v3 = vpop.f32.mrf.mxu0  ;;  %v5345_v0 = vpop.f32.mrf.mxu1 }
 0xbf0   :  { %v1865_v41 = vpop.f32.mrf.mxu0  ;;  %v1906_v5 = vpop.f32.mrf.mxu1 }
 0xbf1   :  { %v5356_v41 = vld [vmem:[%s5802_s4] ss:$16 sps:$4 sm:$0xff]   ;;  %v5361_v5 = vld [vmem:[%s5802_s4 + $0x4] ss:$16 sps:$4 sm:$0xff]  }
 0xbf2   :  { %v1866_v7 = vpop.f32.mrf.mxu0  ;;  %v1907_v9 = vpop.f32.mrf.mxu1  ;;  %5819 = vst [vmem:[#allocation8_spill] sm:$0xff] %v5361_v5  ;;  %2027 = vmatprep.subr.bf16.mxu1 %v5361_v5 }
 0xbf3   :  { %v5366_v7 = vld [vmem:[%s5802_s4 + $0x8] ss:$16 sps:$4 sm:$0xff]   ;;  %2028 = vmatpush1.bf16.msra.mxu1 %v5356_v41 }
 0xbf4   :  { %v1953_v42 = vpop.f32.mrf.mxu0  ;;  %2308 = vmatprep.subr.bf16.mxu1 %v5218_v38 }
 0xbf5   :  { %v1959_v36 = vadd.f32 %v1953_v42, %v1910_v12 }
 0xbf6   :  { %v4432_v23 = vpop.f32.mrf.mxu0 }
 0xbf7   :  { %4690 = vtanh.f32 %v1959_v36  ;;  %v1960_v49 = vmul.f32 0.5, %v1959_v36 }
 0xbf8   :  { %v1956_v13 = vpop.f32.mrf.mxu0 }
 0xbf9   :  { %4692 = vtanh.f32 %v1960_v49  ;;  %v1862_v13 = vadd.f32 %v5339_v25, %v5076_v58  ;;  %v1864_v49 = vadd.f32 %v5343_v3, %v5078_v30  ;;  %v1905_v3 = vadd.f32 %v5345_v0, %v5087_v22 }
 0xbfa   :  { %v4433_v40 = vpop.f32.mrf.mxu0 }
 0xc04   :  { %v4691_v60 = vpop.eup %4690 }
 0xc05   :  { %1967 = vrot.lane.b32.xlu0 %v4691_v60, %s4798_s2 }
 0xc06   :  { %v4693_v44 = vpop.eup %4692 }
 0xc07   :  { %v1962_v1 = vmul.f32 0.5, %v4693_v44 }
 0xc09   :  { %v1963_v37 = vadd.f32 0.5, %v1962_v1 }
 0xc0b   :  { %v1965_v39 = vmul.f32 %v1963_v37, %v5205_v4  ;;  %v5371_v4 = vld [vmem:[%s5802_s4 + $0xc] ss:$16 sps:$4 sm:$0xff]  }
 0xc0c   :  { %2068 = vmatprep.subr.bf16.mxu0 %v5371_v4 }
 0xc0d   :  { %2069 = vmatpush1.bf16.msra.mxu0 %v5366_v7 }
 0xc0e   :  { %2349 = vmatprep.subr.bf16.mxu0 %v5220_v14 }
 0xc77   :  { %v1968_v46 = vpop.permute.xlu0 %1967 }
 0xc78   :  { %v1970_v57 = vmul.f32 %v1968_v46, %v1963_v37  ;;  %v1903_v46 = vadd.f32 %v5341_v2, %v5082_v34 }
 0xc7a   :  { %1972 = vrot.lane.b32.xlu1 %v1970_v57, %s4794_s28 }
 0xcec   :  { %v1973_v47 = vpop.permute.xlu1 %1972 }
 0xced   :  { %v5350_v45 = vadd.f32 %v1973_v47, %v1965_v39 }
 0xcef   :  { %4694 = vtanh.f32 %v5350_v45 }
 0xcfc   :  { %v4695_v9 = vpop.eup %4694 }
 0xcfd   :  { %1978 = vrot.lane.b32.xlu0 %v4695_v9, %s4799_s0 }
 0xd6f   :  { %v1979_v12 = vpop.permute.xlu0 %1978 }
 0xd70   :  { %v1981_v42 = vmul.f32 %v1979_v12, %v1963_v37 }
 0xd72   :  { %v1982_v36 = vpack.c.bf16 %v1981_v42, %v1981_v42 }
 0xd74   :  { %1988 = vrot.lane.b32.xlu1 %v1982_v36, %s4800_s29 }
 0xde6   :  { %v5381_v23 = vpop.permute.xlu1 %1988 }
 0xde7   :  { %4212 = vmatmul.mubr.msk.bf16.vlgmr.msra.gmra.mxu1 %vm473_vm4, %v5381_v23  ;;  %4213 = vmatmul.mubr.msk.bf16.vlgmr.msra.gmra.mxu0 %vm473_vm4, %v5381_v23 }
 0xde8   :  { %2309 = vmatpush1.bf16.msra.mxu1 %v5222_v15  ;;  %2350 = vmatpush1.bf16.msra.mxu0 %v5224_v16 }
 0xde9   :  { %2310 = vmatprep.subr.bf16.mxu1 %v5230_v17  ;;  %2351 = vmatprep.subr.bf16.mxu0 %v5232_v18 }
 0xdea   :  { %2340 = vmatprep.mubr.bf16.mxu1 %v5818_v62  ;;  %2381 = vmatprep.mubr.bf16.mxu0 %v5818_v62 }
 0xdec   :  { %2311 = vmatpush1.bf16.msra.mxu1 %v5234_v19  ;;  %2352 = vmatpush1.bf16.msra.mxu0 %v5236_v20 }
 0xded   :  { %2312 = vmatprep.subr.bf16.mxu1 %v5242_v51  ;;  %2353 = vmatprep.subr.bf16.mxu0 %v5244_v52 }
 0xdf0   :  { %2313 = vmatpush1.bf16.msra.mxu1 %v5246_v54  ;;  %2354 = vmatpush1.bf16.msra.mxu0 %v5248_v55 }
 0xdf1   :  { %2314 = vmatprep.subr.bf16.mxu1 %v5254_v56  ;;  %2355 = vmatprep.subr.bf16.mxu0 %v5256_v59 }
 0xdf4   :  { %2315 = vmatpush1.bf16.msra.mxu1 %v5258_v63  ;;  %2356 = vmatpush1.bf16.msra.mxu0 %v5260_v6 }
 0xdf5   :  { %2316 = vmatprep.subr.bf16.mxu1 %v5266_v8  ;;  %2357 = vmatprep.subr.bf16.mxu0 %v5268_v10 }
 0xdf8   :  { %2317 = vmatpush1.bf16.msra.mxu1 %v5270_v11  ;;  %2358 = vmatpush1.bf16.msra.mxu0 %v5272_v21 }
 0xdf9   :  { %2318 = vmatprep.subr.bf16.mxu1 %v5278_v24  ;;  %2359 = vmatprep.subr.bf16.mxu0 %v5280_v26 }
 0xdfc   :  { %2319 = vmatpush1.bf16.msra.mxu1 %v5282_v27  ;;  %2360 = vmatpush1.bf16.msra.mxu0 %v5284_v28 }
 0xdfd   :  { %2320 = vmatprep.subr.bf16.mxu1 %v5290_v33  ;;  %2361 = vmatprep.subr.bf16.mxu0 %v5292_v31 }
 0xe00   :  { %2321 = vmatpush1.bf16.msra.mxu1 %v5294_v35  ;;  %2362 = vmatpush1.bf16.msra.mxu0 %v5296_v43 }
 0xe01   :  { %2322 = vmatprep.subr.bf16.mxu1 %v5302_v29  ;;  %2363 = vmatprep.subr.bf16.mxu0 %v5304_v53 }
 0xe04   :  { %2323 = vmatpush1.bf16.msra.mxu1 %v5306_v61  ;;  %2364 = vmatpush1.bf16.msra.mxu0 %v5308_v50 }
 0xe05   :  { %4434 = vmatprep.subr.bf16.mxu1 %v5817_v32  ;;  %2508 = vmatprep.subr.bf16.mxu0 %v5361_v5 }
 0xea7   :  { %v2047_v40 = vpop.f32.mrf.mxu1  ;;  %v2088_v60 = vpop.f32.mrf.mxu0 }
 0xea8   :  { %v2048_v44 = vadd.f32 %v2047_v40, %v1862_v13  ;;  %v2089_v12 = vadd.f32 %v2088_v60, %v1903_v46 }
 0xea9   :  { %v2049_v1 = vpop.f32.mrf.mxu1  ;;  %v2090_v37 = vpop.f32.mrf.mxu0 }
 0xeaa   :  { %v2095_v57 = vmul.f32 0.5, %v2048_v44  ;;  %v2050_v39 = vadd.f32 %v2049_v1, %v1864_v49  ;;  %v2091_v13 = vadd.f32 %v2090_v37, %v1905_v3 }
 0xeab   :  { %v2051_v47 = vpop.f32.mrf.mxu1  ;;  %v2092_v9 = vpop.f32.mrf.mxu0 }
 0xeac   :  { %4696 = vtanh.f32 %v2095_v57  ;;  %v2099_v42 = vmul.f32 0.5, %v2050_v39  ;;  %v2104_v40 = vmul.f32 0.5, %v2091_v13  ;;  %v2391_v13 = vld [vmem:[#allocation2 + $0x20] sm:$0xff] }
 0xead   :  { %v2052_v36 = vpop.f32.mrf.mxu1  ;;  %v2093_v25 = vpop.f32.mrf.mxu0 }
 0xeae   :  { %4698 = vtanh.f32 %v2099_v42 }
 0xeaf   :  { %4700 = vtanh.f32 %v2089_v12 }
 0xeb0   :  { %4702 = vtanh.f32 %v2104_v40 }
 0xeb9   :  { %v4697_v30 = vpop.eup %4696 }
 0xeba   :  { %v2097_v58 = vmul.f32 0.5, %v4697_v30 }
 0xebb   :  { %v4699_v5 = vpop.eup %4698 }
 0xebc   :  { %v2098_v2 = vadd.f32 0.5, %v2097_v58  ;;  %v2101_v44 = vmul.f32 0.5, %v4699_v5  ;;  %v4701_v49 = vpop.eup %4700  ;;  %v4584_v58 = vld [vmem:[%s5801_s3] sm:$0xff]  }
 0xebd   :  { %v4703_v39 = vpop.eup %4702 }
 0xebe   :  { %v2102_v1 = vadd.f32 0.5, %v2101_v44  ;;  %v2109_v57 = vmul.f32 %v4701_v49, %v2098_v2  ;;  %v2106_v47 = vmul.f32 0.5, %v4703_v39 }
 0xec0   :  { %v2108_v60 = vmul.f32 %v2102_v1, %v5324_v48  ;;  %v2107_v0 = vadd.f32 0.5, %v2106_v47 }
 0xec2   :  { %v5430_v46 = vadd.f32 %v2109_v57, %v2108_v60 }
 0xec4   :  { %4704 = vtanh.f32 %v5430_v46 }
 0xed1   :  { %v4705_v37 = vpop.eup %4704 }
 0xed2   :  { %v2112_v9 = vmul.f32 %v4705_v37, %v2107_v0 }
 0xed4   :  { %4214 = vst [vmem:[%s5805_s7 + $0x18] sm:$0xff] %v2112_v9  ;;  %v2115_v30 = vpack.c.bf16 %v2112_v9, %v2112_v9 }
 0xed6   :  { %2341 = vmatmul.mubr.bf16.vlgmr.msra.gmra.mxu1 %v2115_v30  ;;  %2382 = vmatmul.mubr.bf16.vlgmr.msra.gmra.mxu0 %v2115_v30 }
 0xed7   :  { %4435 = vmatpush3.bf16.msra.mxu1 %v4584_v58  ;;  %4436 = vmatprep.mubr.msk.bf16.mxu1 %vm4797_vm2, %v5817_v32 }
 0xed8   :  { %2509 = vmatpush1.bf16.msra.mxu0 %v5356_v41  ;;  %2549 = vmatprep.subr.bf16.mxu1 %v5371_v4 }
 0xed9   :  { %2526 = vmatprep.mubr.bf16.mxu0 %v5818_v62  ;;  %2789 = vmatprep.subr.bf16.mxu0 %v5218_v38 }
 0xede   :  { %4437 = vmatmul.mubr.msk.bf16.vlgmr.msra.gmra.mxu1 %vm473_vm4, %v5381_v23 }
 0xedf   :  { %2550 = vmatpush1.bf16.msra.mxu1 %v5366_v7  ;;  %2567 = vmatprep.mubr.bf16.mxu1 %v5818_v62 }
 0xee0   :  { %2830 = vmatprep.subr.bf16.mxu1 %v5220_v14 }
 0xf96   :  { %v5450_v48 = vpop.f32.mrf.mxu1  ;;  %v5452_v5 = vpop.f32.mrf.mxu0 }
 0xf98   :  { %v5454_v12 = vpop.f32.mrf.mxu1  ;;  %v5456_v42 = vpop.f32.mrf.mxu0 }
 0xf9a   :  { %v2346_v36 = vpop.f32.mrf.mxu1  ;;  %v2387_v25 = vpop.f32.mrf.mxu0 }
 0xf9c   :  { %v2347_v38 = vpop.f32.mrf.mxu1  ;;  %v2388_v3 = vpop.f32.mrf.mxu0 }
 0xf9e   :  { %v2434_v23 = vpop.f32.mrf.mxu1 }
 0xf9f   :  { %v2440_v40 = vadd.f32 %v2434_v23, %v2391_v13 }
 0xfa0   :  { %v4438_v2 = vpop.f32.mrf.mxu1 }
 0xfa1   :  { %4706 = vtanh.f32 %v2440_v40  ;;  %v2441_v1 = vmul.f32 0.5, %v2440_v40  ;;  %v4585_v40 = vld [vmem:[%s5801_s3] sm:$0xff]  }
 0xfa2   :  { %v2437_v44 = vpop.f32.mrf.mxu1 }
 0xfa3   :  { %4708 = vtanh.f32 %v2441_v1 }
 0xfa4   :  { %v4439_v49 = vpop.f32.mrf.mxu1 }
 0xfae   :  { %v4707_v14 = vpop.eup %4706 }
 0xfaf   :  { %2448 = vrot.lane.b32.xlu0 %v4707_v14, %s4798_s2 }
 0xfb0   :  { %v4709_v57 = vpop.eup %4708 }
 0xfb1   :  { %v2443_v60 = vmul.f32 0.5, %v4709_v57 }
 0xfb3   :  { %v2444_v39 = vadd.f32 0.5, %v2443_v60  ;;  %v2872_v60 = vld [vmem:[#allocation2 + $0x28] sm:$0xff] }
 0xfb5   :  { %v2446_v37 = vmul.f32 %v2444_v39, %v5350_v45 }
0x1021   :  { %v2449_v47 = vpop.permute.xlu0 %2448 }
0x1022   :  { %v2451_v0 = vmul.f32 %v2449_v47, %v2444_v39 }
0x1024   :  { %2453 = vrot.lane.b32.xlu1 %v2451_v0, %s4794_s28 }
0x1096   :  { %v2454_v9 = vpop.permute.xlu1 %2453 }
0x1097   :  { %v5461_v58 = vadd.f32 %v2454_v9, %v2446_v37 }
0x1099   :  { %4710 = vtanh.f32 %v5461_v58 }
0x10a6   :  { %v4711_v30 = vpop.eup %4710 }
0x10a7   :  { %2459 = vrot.lane.b32.xlu0 %v4711_v30, %s4799_s0 }
0x1119   :  { %v2460_v36 = vpop.permute.xlu0 %2459 }
0x111a   :  { %v2462_v25 = vmul.f32 %v2460_v36, %v2444_v39 }
0x111c   :  { %v2463_v38 = vpack.c.bf16 %v2462_v25, %v2462_v25 }
0x111e   :  { %2469 = vrot.lane.b32.xlu1 %v2463_v38, %s4800_s29 }
0x1190   :  { %v5466_v3 = vpop.permute.xlu1 %2469 }
0x1191   :  { %4253 = vmatmul.mubr.msk.bf16.vlgmr.msra.gmra.mxu0 %vm473_vm4, %v5466_v3  ;;  %4254 = vmatmul.mubr.msk.bf16.vlgmr.msra.gmra.mxu1 %vm473_vm4, %v5466_v3 }
0x1192   :  { %2790 = vmatpush1.bf16.msra.mxu0 %v5222_v15  ;;  %2831 = vmatpush1.bf16.msra.mxu1 %v5224_v16  ;;  %v5820_v15 = vld [vmem:[#allocation8_spill] sm:$0xff]  ;;  %v5821_v16 = vld [vmem:[#allocation6_spill] sm:$0xff] }
0x1193   :  { %2791 = vmatprep.subr.bf16.mxu0 %v5230_v17  ;;  %2832 = vmatprep.subr.bf16.mxu1 %v5232_v18  ;;  %v2343_v17 = vadd.f32 %v5450_v48, %v5821_v16 }
0x1194   :  { %2821 = vmatprep.mubr.bf16.mxu0 %v5818_v62  ;;  %2862 = vmatprep.mubr.bf16.mxu1 %v5818_v62 }
0x1196   :  { %2792 = vmatpush1.bf16.msra.mxu0 %v5234_v19  ;;  %2833 = vmatpush1.bf16.msra.mxu1 %v5236_v20  ;;  %v5822_v20 = vld [vmem:[#allocation7_spill] sm:$0xff] }
0x1197   :  { %2793 = vmatprep.subr.bf16.mxu0 %v5242_v51  ;;  %2834 = vmatprep.subr.bf16.mxu1 %v5244_v52  ;;  %v2345_v51 = vadd.f32 %v5454_v12, %v5822_v20 }
0x119a   :  { %2794 = vmatpush1.bf16.msra.mxu0 %v5246_v54  ;;  %2835 = vmatpush1.bf16.msra.mxu1 %v5248_v55 }
0x119b   :  { %2795 = vmatprep.subr.bf16.mxu0 %v5254_v56  ;;  %2836 = vmatprep.subr.bf16.mxu1 %v5256_v59  ;;  %v2384_v56 = vadd.f32 %v5452_v5, %v5082_v34 }
0x119e   :  { %2796 = vmatpush1.bf16.msra.mxu0 %v5258_v63  ;;  %2837 = vmatpush1.bf16.msra.mxu1 %v5260_v6 }
0x119f   :  { %2797 = vmatprep.subr.bf16.mxu0 %v5266_v8  ;;  %2838 = vmatprep.subr.bf16.mxu1 %v5268_v10 }
0x11a2   :  { %2798 = vmatpush1.bf16.msra.mxu0 %v5270_v11  ;;  %2839 = vmatpush1.bf16.msra.mxu1 %v5272_v21 }
0x11a3   :  { %2799 = vmatprep.subr.bf16.mxu0 %v5278_v24  ;;  %2840 = vmatprep.subr.bf16.mxu1 %v5280_v26  ;;  %v2386_v26 = vadd.f32 %v5456_v42, %v5087_v22 }
0x11a6   :  { %2800 = vmatpush1.bf16.msra.mxu0 %v5282_v27  ;;  %2841 = vmatpush1.bf16.msra.mxu1 %v5284_v28 }
0x11a7   :  { %2801 = vmatprep.subr.bf16.mxu0 %v5290_v33  ;;  %2842 = vmatprep.subr.bf16.mxu1 %v5292_v31 }
0x11aa   :  { %2802 = vmatpush1.bf16.msra.mxu0 %v5294_v35  ;;  %2843 = vmatpush1.bf16.msra.mxu1 %v5296_v43 }
0x11ab   :  { %2803 = vmatprep.subr.bf16.mxu0 %v5302_v29  ;;  %2844 = vmatprep.subr.bf16.mxu1 %v5304_v53 }
0x11ae   :  { %2804 = vmatpush1.bf16.msra.mxu0 %v5306_v61  ;;  %2845 = vmatpush1.bf16.msra.mxu1 %v5308_v50 }
0x11af   :  { %4440 = vmatprep.subr.bf16.mxu0 %v5817_v32  ;;  %2989 = vmatprep.subr.bf16.mxu1 %v5820_v15 }
0x1251   :  { %v2528_v18 = vpop.f32.mrf.mxu0  ;;  %v2569_v19 = vpop.f32.mrf.mxu1 }
0x1252   :  { %v2529_v52 = vadd.f32 %v2528_v18, %v2343_v17  ;;  %v2570_v10 = vadd.f32 %v2569_v19, %v2384_v56 }
0x1253   :  { %v2530_v54 = vpop.f32.mrf.mxu0  ;;  %v2571_v55 = vpop.f32.mrf.mxu1 }
0x1254   :  { %v2576_v59 = vmul.f32 0.5, %v2529_v52  ;;  %v2531_v63 = vadd.f32 %v2530_v54, %v2345_v51  ;;  %v2572_v27 = vadd.f32 %v2571_v55, %v2386_v26  ;;  %v5583_v26 = vld [vmem:[#allocation3 + $0xac] ss:$16 sps:$4 sm:$0xff]  }
0x1255   :  { %v2532_v6 = vpop.f32.mrf.mxu0  ;;  %v2573_v8 = vpop.f32.mrf.mxu1 }
0x1256   :  { %4712 = vtanh.f32 %v2576_v59  ;;  %v2580_v11 = vmul.f32 0.5, %v2531_v63  ;;  %v2585_v28 = vmul.f32 0.5, %v2572_v27  ;;  %v5559_v59 = vld [vmem:[#allocation3 + $0xec] ss:$16 sps:$4 sm:$0xff]   ;;  %v5561_v63 = vld [vmem:[#allocation3 + $0xe0] ss:$16 sps:$4 sm:$0xff]  }
0x1257   :  { %v2533_v21 = vpop.f32.mrf.mxu0  ;;  %v2574_v24 = vpop.f32.mrf.mxu1  ;;  %v5563_v6 = vld [vmem:[#allocation3 + $0xe8] ss:$16 sps:$4 sm:$0xff]   ;;  %v5569_v8 = vld [vmem:[#allocation3 + $0xc4] ss:$16 sps:$4 sm:$0xff]   ;;  %v5585_v27 = vld [vmem:[#allocation3 + $0xa0] ss:$16 sps:$4 sm:$0xff]  }
0x1258   :  { %4714 = vtanh.f32 %v2580_v11  ;;  %v5573_v11 = vld [vmem:[#allocation3 + $0xc0] ss:$16 sps:$4 sm:$0xff]   ;;  %v5575_v21 = vld [vmem:[#allocation3 + $0xc8] ss:$16 sps:$4 sm:$0xff]   ;;  %v5581_v24 = vld [vmem:[#allocation3 + $0xa4] ss:$16 sps:$4 sm:$0xff]  }
0x1259   :  { %4716 = vtanh.f32 %v2570_v10  ;;  %v5571_v10 = vld [vmem:[#allocation3 + $0xcc] ss:$16 sps:$4 sm:$0xff]  }
0x125a   :  { %4718 = vtanh.f32 %v2585_v28  ;;  %v5587_v28 = vld [vmem:[#allocation3 + $0xa8] ss:$16 sps:$4 sm:$0xff]  }
0x1263   :  { %v4713_v33 = vpop.eup %4712 }
0x1264   :  { %v2578_v31 = vmul.f32 0.5, %v4713_v33  ;;  %v5593_v33 = vld [vmem:[#allocation3 + $0x84] ss:$16 sps:$4 sm:$0xff]  }
0x1265   :  { %v4715_v35 = vpop.eup %4714 }
0x1266   :  { %v2579_v43 = vadd.f32 0.5, %v2578_v31  ;;  %v2582_v29 = vmul.f32 0.5, %v4715_v35  ;;  %v4717_v53 = vpop.eup %4716  ;;  %v5595_v31 = vld [vmem:[#allocation3 + $0x8c] ss:$16 sps:$4 sm:$0xff]   ;;  %v5597_v35 = vld [vmem:[#allocation3 + $0x80] ss:$16 sps:$4 sm:$0xff]  }
0x1267   :  { %v4719_v5 = vpop.eup %4718 }
0x1268   :  { %v2583_v61 = vadd.f32 0.5, %v2582_v29  ;;  %v2590_v50 = vmul.f32 %v4717_v53, %v2579_v43  ;;  %v2587_v12 = vmul.f32 0.5, %v4719_v5  ;;  %v5599_v43 = vld [vmem:[#allocation3 + $0x88] ss:$16 sps:$4 sm:$0xff]   ;;  %v5605_v29 = vld [vmem:[#allocation3 + $0x64] ss:$16 sps:$4 sm:$0xff]  }
0x1269   :  { %v5607_v53 = vld [vmem:[#allocation3 + $0x6c] ss:$16 sps:$4 sm:$0xff]  }
0x126a   :  { %v2589_v45 = vmul.f32 %v2583_v61, %v5430_v46  ;;  %v2588_v42 = vadd.f32 0.5, %v2587_v12  ;;  %v5609_v61 = vld [vmem:[#allocation3 + $0x60] ss:$16 sps:$4 sm:$0xff]   ;;  %v5619_v5 = vld [vmem:[#allocation3 + $0x4c] ss:$16 sps:$4 sm:$0xff]  }
0x126b   :  { %v5621_v12 = vld [vmem:[#allocation3 + $0x40] ss:$16 sps:$4 sm:$0xff]  }
0x126c   :  { %v5515_v48 = vadd.f32 %v2590_v50, %v2589_v45  ;;  %v5611_v50 = vld [vmem:[#allocation3 + $0x68] ss:$16 sps:$4 sm:$0xff]   ;;  %v5617_v45 = vld [vmem:[#allocation3 + $0x44] ss:$16 sps:$4 sm:$0xff]  }
0x126e   :  { %4720 = vtanh.f32 %v5515_v48 }
0x127b   :  { %v4721_v13 = vpop.eup %4720 }
0x127c   :  { %v2593_v23 = vmul.f32 %v4721_v13, %v2588_v42  ;;  %v5623_v42 = vld [vmem:[#allocation3 + $0x48] ss:$16 sps:$4 sm:$0xff]   ;;  %v5629_v13 = vld [vmem:[#allocation3 + $0x24] ss:$16 sps:$4 sm:$0xff]  }
0x127e   :  { %4255 = vst [vmem:[%s5805_s7 + $0x20] sm:$0xff] %v2593_v23  ;;  %v2596_v2 = vpack.c.bf16 %v2593_v23, %v2593_v23  ;;  %v5631_v23 = vld [vmem:[#allocation3 + $0x2c] ss:$16 sps:$4 sm:$0xff]  }
0x1280   :  { %2822 = vmatmul.mubr.bf16.vlgmr.msra.gmra.mxu0 %v2596_v2  ;;  %2863 = vmatmul.mubr.bf16.vlgmr.msra.gmra.mxu1 %v2596_v2  ;;  %v5635_v2 = vld [vmem:[#allocation3 + $0x28] ss:$16 sps:$4 sm:$0xff]  }
0x1281   :  { %4441 = vmatpush3.bf16.msra.mxu0 %v4585_v40  ;;  %4442 = vmatprep.mubr.msk.bf16.mxu0 %vm4797_vm2, %v5817_v32  ;;  %v5633_v40 = vld [vmem:[#allocation3 + $0x20] ss:$16 sps:$4 sm:$0xff]  }
0x1282   :  { %2990 = vmatpush1.bf16.msra.mxu1 %v5356_v41  ;;  %3030 = vmatprep.subr.bf16.mxu0 %v5371_v4 }
0x1283   :  { %3007 = vmatprep.mubr.bf16.mxu1 %v5818_v62 }
0x1288   :  { %4443 = vmatmul.mubr.msk.bf16.vlgmr.msra.gmra.mxu0 %vm473_vm4, %v5466_v3 }
0x1289   :  { %3031 = vmatpush1.bf16.msra.mxu0 %v5366_v7  ;;  %3048 = vmatprep.mubr.bf16.mxu0 %v5818_v62 }
0x128a   :  { %3311 = vmatprep.subr.bf16.mxu0 %v5559_v59 }
0x1340   :  { %v5533_v46 = vpop.f32.mrf.mxu0  ;;  %v5535_v44 = vpop.f32.mrf.mxu1 }
0x1342   :  { %v5537_v49 = vpop.f32.mrf.mxu0  ;;  %v5539_v14 = vpop.f32.mrf.mxu1 }
0x1344   :  { %v2827_v41 = vpop.f32.mrf.mxu0  ;;  %v2868_v1 = vpop.f32.mrf.mxu1 }
0x1345   :  { %v5641_v41 = vld [vmem:[#allocation3 + $0x4] ss:$16 sps:$4 sm:$0xff]   ;;  %v5643_v1 = vld [vmem:[#allocation3 + $0xc] ss:$16 sps:$4 sm:$0xff]  }
0x1346   :  { %v2828_v4 = vpop.f32.mrf.mxu0  ;;  %v2869_v57 = vpop.f32.mrf.mxu1 }
0x1347   :  { %v5645_v4 = vld [vmem:[#allocation3] ss:$16 sps:$4 sm:$0xff]   ;;  %v5647_v57 = vld [vmem:[#allocation3 + $0x8] ss:$16 sps:$4 sm:$0xff]  }
0x1348   :  { %v2915_v39 = vpop.f32.mrf.mxu0 }
0x1349   :  { %v2921_v47 = vadd.f32 %v2915_v39, %v2872_v60  ;;  %v2824_v60 = vadd.f32 %v5533_v46, %v5821_v16 }
0x134a   :  { %v4444_v0 = vpop.f32.mrf.mxu0 }
0x134b   :  { %4722 = vtanh.f32 %v2921_v47  ;;  %v2922_v30 = vmul.f32 0.5, %v2921_v47  ;;  %v2826_v0 = vadd.f32 %v5537_v49, %v5822_v20  ;;  %v2867_v49 = vadd.f32 %v5539_v14, %v5087_v22 }
0x134c   :  { %v2918_v7 = vpop.f32.mrf.mxu0 }
0x134d   :  { %4724 = vtanh.f32 %v2922_v30  ;;  %v2865_v30 = vadd.f32 %v5535_v44, %v5082_v34 }
0x134e   :  { %v4445_v37 = vpop.f32.mrf.mxu0 }
0x1358   :  { %v4723_v9 = vpop.eup %4722 }
0x1359   :  { %2929 = vrot.lane.b32.xlu0 %v4723_v9, %s4798_s2 }
0x135a   :  { %v4725_v36 = vpop.eup %4724 }
0x135b   :  { %v2924_v25 = vmul.f32 0.5, %v4725_v36 }
0x135d   :  { %v2925_v38 = vadd.f32 0.5, %v2924_v25 }
0x135f   :  { %v2927_v17 = vmul.f32 %v2925_v38, %v5461_v58  ;;  %v5557_v58 = vld [vmem:[#allocation3 + $0xe4] ss:$16 sps:$4 sm:$0xff]  }
0x1360   :  { %3270 = vmatprep.subr.bf16.mxu1 %v5557_v58 }
0x13cb   :  { %v2930_v3 = vpop.permute.xlu0 %2929 }
0x13cc   :  { %v2932_v15 = vmul.f32 %v2930_v3, %v2925_v38 }
0x13ce   :  { %2934 = vrot.lane.b32.xlu1 %v2932_v15, %s4794_s28 }
0x1440   :  { %v2935_v18 = vpop.permute.xlu1 %2934 }
0x1441   :  { %v5544_v19 = vadd.f32 %v2935_v18, %v2927_v17 }
0x1443   :  { %4726 = vtanh.f32 %v5544_v19 }
0x1450   :  { %v4727_v51 = vpop.eup %4726 }
0x1451   :  { %2940 = vrot.lane.b32.xlu0 %v4727_v51, %s4799_s0 }
0x14c3   :  { %v2941_v52 = vpop.permute.xlu0 %2940 }
0x14c4   :  { %v2943_v54 = vmul.f32 %v2941_v52, %v2925_v38 }
0x14c6   :  { %v2944_v55 = vpack.c.bf16 %v2943_v54, %v2943_v54 }
0x14c8   :  { %2950 = vrot.lane.b32.xlu1 %v2944_v55, %s4800_s29 }
0x153a   :  { %v5549_v56 = vpop.permute.xlu1 %2950 }
0x153b   :  { %4294 = vmatmul.mubr.msk.bf16.vlgmr.msra.gmra.mxu1 %vm473_vm4, %v5549_v56  ;;  %4295 = vmatmul.mubr.msk.bf16.vlgmr.msra.gmra.mxu0 %vm473_vm4, %v5549_v56 }
0x153c   :  { %3302 = vmatprep.mubr.bf16.mxu1 %v5818_v62  ;;  %3343 = vmatprep.mubr.bf16.mxu0 %v5818_v62 }
0x153d   :  { %3271 = vmatpush1.bf16.msra.mxu1 %v5561_v63  ;;  %3312 = vmatpush1.bf16.msra.mxu0 %v5563_v6 }
0x153e   :  { %3272 = vmatprep.subr.bf16.mxu1 %v5569_v8  ;;  %3313 = vmatprep.subr.bf16.mxu0 %v5571_v10 }
0x1541   :  { %3273 = vmatpush1.bf16.msra.mxu1 %v5573_v11  ;;  %3314 = vmatpush1.bf16.msra.mxu0 %v5575_v21 }
0x1542   :  { %3274 = vmatprep.subr.bf16.mxu1 %v5581_v24  ;;  %3315 = vmatprep.subr.bf16.mxu0 %v5583_v26 }
0x1545   :  { %3275 = vmatpush1.bf16.msra.mxu1 %v5585_v27  ;;  %3316 = vmatpush1.bf16.msra.mxu0 %v5587_v28 }
0x1546   :  { %3276 = vmatprep.subr.bf16.mxu1 %v5593_v33  ;;  %3317 = vmatprep.subr.bf16.mxu0 %v5595_v31 }
0x1549   :  { %3277 = vmatpush1.bf16.msra.mxu1 %v5597_v35  ;;  %3318 = vmatpush1.bf16.msra.mxu0 %v5599_v43 }
0x154a   :  { %3278 = vmatprep.subr.bf16.mxu1 %v5605_v29  ;;  %3319 = vmatprep.subr.bf16.mxu0 %v5607_v53 }
0x154d   :  { %3279 = vmatpush1.bf16.msra.mxu1 %v5609_v61  ;;  %3320 = vmatpush1.bf16.msra.mxu0 %v5611_v50 }
0x154e   :  { %3280 = vmatprep.subr.bf16.mxu1 %v5617_v45  ;;  %3321 = vmatprep.subr.bf16.mxu0 %v5619_v5 }
0x1551   :  { %3281 = vmatpush1.bf16.msra.mxu1 %v5621_v12  ;;  %3322 = vmatpush1.bf16.msra.mxu0 %v5623_v42 }
0x1552   :  { %3282 = vmatprep.subr.bf16.mxu1 %v5629_v13  ;;  %3323 = vmatprep.subr.bf16.mxu0 %v5631_v23 }
0x1555   :  { %3283 = vmatpush1.bf16.msra.mxu1 %v5633_v40  ;;  %3324 = vmatpush1.bf16.msra.mxu0 %v5635_v2 }
0x1556   :  { %3284 = vmatprep.subr.bf16.mxu1 %v5641_v41  ;;  %3325 = vmatprep.subr.bf16.mxu0 %v5643_v1 }
0x1559   :  { %3285 = vmatpush1.bf16.msra.mxu1 %v5645_v4  ;;  %3326 = vmatpush1.bf16.msra.mxu0 %v5647_v57 }
0x155a   :  { %4446 = vmatprep.subr.bf16.mxu1 %v5817_v32 }
0x15fb   :  { %v3009_v39 = vpop.f32.mrf.mxu1  ;;  %v3050_v47 = vpop.f32.mrf.mxu0 }
0x15fc   :  { %v3010_v7 = vadd.f32 %v3009_v39, %v2824_v60  ;;  %v3051_v15 = vadd.f32 %v3050_v47, %v2865_v30 }
0x15fd   :  { %v3011_v37 = vpop.f32.mrf.mxu1  ;;  %v3052_v9 = vpop.f32.mrf.mxu0 }
0x15fe   :  { %v3057_v36 = vmul.f32 0.5, %v3010_v7  ;;  %v3012_v25 = vadd.f32 %v3011_v37, %v2826_v0  ;;  %v3053_v51 = vadd.f32 %v3052_v9, %v2867_v49 }
0x15ff   :  { %v3013_v38 = vpop.f32.mrf.mxu1  ;;  %v3054_v3 = vpop.f32.mrf.mxu0 }
0x1600   :  { %4728 = vtanh.f32 %v3057_v36  ;;  %v3061_v17 = vmul.f32 0.5, %v3012_v25  ;;  %v3066_v52 = vmul.f32 0.5, %v3053_v51  ;;  %v4634_v3 = vld [vmem:[%s5801_s3] sm:$0xff]  }
0x1601   :  { %v3014_v18 = vpop.f32.mrf.mxu1  ;;  %v3055_v46 = vpop.f32.mrf.mxu0 }
0x1602   :  { %4730 = vtanh.f32 %v3061_v17 }
0x1603   :  { %4732 = vtanh.f32 %v3051_v15 }
0x1604   :  { %4734 = vtanh.f32 %v3066_v52 }
0x160d   :  { %v4729_v54 = vpop.eup %4728 }
0x160e   :  { %v3059_v55 = vmul.f32 0.5, %v4729_v54 }
0x160f   :  { %v4731_v60 = vpop.eup %4730 }
0x1610   :  { %v3060_v44 = vadd.f32 0.5, %v3059_v55  ;;  %v3063_v39 = vmul.f32 0.5, %v4731_v60  ;;  %v4733_v0 = vpop.eup %4732  ;;  %v3353_v55 = vld [vmem:[#allocation2 + $0x30] sm:$0xff] }
0x1611   :  { %v4735_v36 = vpop.eup %4734 }
0x1612   :  { %v3064_v7 = vadd.f32 0.5, %v3063_v39  ;;  %v3071_v37 = vmul.f32 %v4733_v0, %v3060_v44  ;;  %v3068_v25 = vmul.f32 0.5, %v4735_v36 }
0x1614   :  { %v3070_v47 = vmul.f32 %v3064_v7, %v5515_v48  ;;  %v3069_v14 = vadd.f32 0.5, %v3068_v25 }
0x1616   :  { %v5663_v30 = vadd.f32 %v3071_v37, %v3070_v47 }
0x1618   :  { %4736 = vtanh.f32 %v5663_v30 }
0x1625   :  { %v4737_v9 = vpop.eup %4736 }
0x1626   :  { %v3074_v38 = vmul.f32 %v4737_v9, %v3069_v14 }
0x1628   :  { %4296 = vst [vmem:[%s5805_s7 + $0x28] sm:$0xff] %v3074_v38  ;;  %v3077_v15 = vpack.c.bf16 %v3074_v38, %v3074_v38 }
0x162a   :  { %3303 = vmatmul.mubr.bf16.vlgmr.msra.gmra.mxu1 %v3077_v15  ;;  %3344 = vmatmul.mubr.bf16.vlgmr.msra.gmra.mxu0 %v3077_v15 }
0x162b   :  { %4447 = vmatpush3.bf16.msra.mxu1 %v4634_v3  ;;  %4448 = vmatprep.mubr.msk.bf16.mxu1 %vm4797_vm2, %v5817_v32 }
0x162c   :  { %3488 = vmatprep.mubr.bf16.mxu0 %v5818_v62 }
0x1632   :  { %4449 = vmatmul.mubr.msk.bf16.vlgmr.msra.gmra.mxu1 %vm473_vm4, %v5549_v56 }
0x1633   :  { %3529 = vmatprep.mubr.bf16.mxu1 %v5818_v62 }
0x16ea   :  { %v5678_v48 = vpop.f32.mrf.mxu1  ;;  %v5680_v17 = vpop.f32.mrf.mxu0 }
0x16ec   :  { %v5682_v18 = vpop.f32.mrf.mxu1  ;;  %v5684_v46 = vpop.f32.mrf.mxu0 }
0x16ee   :  { %v3308_v49 = vpop.f32.mrf.mxu1  ;;  %v3349_v51 = vpop.f32.mrf.mxu0 }
0x16ef   :  { %v5695_v49 = vld [vmem:[%s5802_s4] ss:$16 sps:$4 sm:$0xff]   ;;  %v4637_v51 = vld [vmem:[%s5802_s4 + $0x4] ss:$16 sps:$4 sm:$0xff]  }
0x16f0   :  { %v3309_v52 = vpop.f32.mrf.mxu1  ;;  %v3350_v54 = vpop.f32.mrf.mxu0  ;;  %3470 = vmatprep.subr.bf16.mxu0 %v4637_v51 }
0x16f1   :  { %v5703_v52 = vld [vmem:[%s5802_s4 + $0x8] ss:$16 sps:$4 sm:$0xff]   ;;  %3471 = vmatpush1.bf16.msra.mxu0 %v5695_v49 }
0x16f2   :  { %v3396_v60 = vpop.f32.mrf.mxu1  ;;  %3751 = vmatprep.subr.bf16.mxu0 %v5557_v58  ;;  %v3305_v58 = vadd.f32 %v5678_v48, %v5821_v16 }
0x16f3   :  { %v3402_v44 = vadd.f32 %v3396_v60, %v3353_v55 }
0x16f4   :  { %v4450_v39 = vpop.f32.mrf.mxu1 }
0x16f5   :  { %4738 = vtanh.f32 %v3402_v44  ;;  %v3403_v37 = vmul.f32 0.5, %v3402_v44 }
0x16f6   :  { %v3399_v56 = vpop.f32.mrf.mxu1 }
0x16f7   :  { %4740 = vtanh.f32 %v3403_v37 }
0x16f8   :  { %v4451_v0 = vpop.f32.mrf.mxu1 }
0x1702   :  { %v4739_v7 = vpop.eup %4738 }
0x1703   :  { %3410 = vrot.lane.b32.xlu0 %v4739_v7, %s4798_s2 }
0x1704   :  { %v4741_v47 = vpop.eup %4740 }
0x1705   :  { %v3405_v36 = vmul.f32 0.5, %v4741_v47 }
0x1707   :  { %v3406_v25 = vadd.f32 0.5, %v3405_v36 }
0x1709   :  { %v3408_v38 = vmul.f32 %v3406_v25, %v5544_v19  ;;  %v5708_v19 = vld [vmem:[%s5802_s4 + $0xc] ss:$16 sps:$4 sm:$0xff]  }
0x170a   :  { %3511 = vmatprep.subr.bf16.mxu1 %v5708_v19 }
0x170b   :  { %3512 = vmatpush1.bf16.msra.mxu1 %v5703_v52 }
0x170c   :  { %3792 = vmatprep.subr.bf16.mxu1 %v5559_v59 }
0x1775   :  { %v3411_v14 = vpop.permute.xlu0 %3410 }
0x1776   :  { %v3413_v9 = vmul.f32 %v3411_v14, %v3406_v25 }
0x1778   :  { %3415 = vrot.lane.b32.xlu1 %v3413_v9, %s4794_s28 }
0x17ea   :  { %v3416_v3 = vpop.permute.xlu1 %3415 }
0x17eb   :  { %v5689_v15 = vadd.f32 %v3416_v3, %v3408_v38 }
0x17ed   :  { %4742 = vtanh.f32 %v5689_v15 }
0x17fa   :  { %v4743_v54 = vpop.eup %4742 }
0x17fb   :  { %3421 = vrot.lane.b32.xlu0 %v4743_v54, %s4799_s0 }
0x186d   :  { %v3422_v55 = vpop.permute.xlu0 %3421 }
0x186e   :  { %v3424_v60 = vmul.f32 %v3422_v55, %v3406_v25  ;;  %v3834_v25 = vld [vmem:[#allocation2 + $0x38] sm:$0xff] }
0x1870   :  { %v3425_v44 = vpack.c.bf16 %v3424_v60, %v3424_v60 }
0x1872   :  { %3431 = vrot.lane.b32.xlu1 %v3425_v44, %s4800_s29 }
0x18e4   :  { %v5717_v39 = vpop.permute.xlu1 %3431 }
0x18e5   :  { %4335 = vmatmul.mubr.msk.bf16.vlgmr.msra.gmra.mxu0 %vm473_vm4, %v5717_v39  ;;  %4336 = vmatmul.mubr.msk.bf16.vlgmr.msra.gmra.mxu1 %vm473_vm4, %v5717_v39 }
0x18e6   :  { %3752 = vmatpush1.bf16.msra.mxu0 %v5561_v63  ;;  %3793 = vmatpush1.bf16.msra.mxu1 %v5563_v6  ;;  %v3307_v6 = vadd.f32 %v5682_v18, %v5822_v20  ;;  %v4641_v18 = vld [vmem:[%s5801_s3] sm:$0xff]  }
0x18e7   :  { %3753 = vmatprep.subr.bf16.mxu0 %v5569_v8  ;;  %3794 = vmatprep.subr.bf16.mxu1 %v5571_v10 }
0x18e8   :  { %3783 = vmatprep.mubr.bf16.mxu0 %v5818_v62  ;;  %3824 = vmatprep.mubr.bf16.mxu1 %v5818_v62 }
0x18ea   :  { %3754 = vmatpush1.bf16.msra.mxu0 %v5573_v11  ;;  %3795 = vmatpush1.bf16.msra.mxu1 %v5575_v21  ;;  %v3346_v21 = vadd.f32 %v5680_v17, %v5082_v34 }
0x18eb   :  { %3755 = vmatprep.subr.bf16.mxu0 %v5581_v24  ;;  %3796 = vmatprep.subr.bf16.mxu1 %v5583_v26 }
0x18ee   :  { %3756 = vmatpush1.bf16.msra.mxu0 %v5585_v27  ;;  %3797 = vmatpush1.bf16.msra.mxu1 %v5587_v28 }
0x18ef   :  { %3757 = vmatprep.subr.bf16.mxu0 %v5593_v33  ;;  %3798 = vmatprep.subr.bf16.mxu1 %v5595_v31 }
0x18f2   :  { %3758 = vmatpush1.bf16.msra.mxu0 %v5597_v35  ;;  %3799 = vmatpush1.bf16.msra.mxu1 %v5599_v43 }
0x18f3   :  { %3759 = vmatprep.subr.bf16.mxu0 %v5605_v29  ;;  %3800 = vmatprep.subr.bf16.mxu1 %v5607_v53  ;;  %v3348_v29 = vadd.f32 %v5684_v46, %v5087_v22 }
0x18f6   :  { %3760 = vmatpush1.bf16.msra.mxu0 %v5609_v61  ;;  %3801 = vmatpush1.bf16.msra.mxu1 %v5611_v50 }
0x18f7   :  { %3761 = vmatprep.subr.bf16.mxu0 %v5617_v45  ;;  %3802 = vmatprep.subr.bf16.mxu1 %v5619_v5 }
0x18fa   :  { %3762 = vmatpush1.bf16.msra.mxu0 %v5621_v12  ;;  %3803 = vmatpush1.bf16.msra.mxu1 %v5623_v42 }
0x18fb   :  { %3763 = vmatprep.subr.bf16.mxu0 %v5629_v13  ;;  %3804 = vmatprep.subr.bf16.mxu1 %v5631_v23 }
0x18fe   :  { %3764 = vmatpush1.bf16.msra.mxu0 %v5633_v40  ;;  %3805 = vmatpush1.bf16.msra.mxu1 %v5635_v2 }
0x18ff   :  { %3765 = vmatprep.subr.bf16.mxu0 %v5641_v41  ;;  %3806 = vmatprep.subr.bf16.mxu1 %v5643_v1 }
0x1902   :  { %3766 = vmatpush1.bf16.msra.mxu0 %v5645_v4  ;;  %3807 = vmatpush1.bf16.msra.mxu1 %v5647_v57 }
0x1903   :  { %4452 = vmatprep.subr.bf16.mxu0 %v5817_v32  ;;  %3951 = vmatprep.subr.bf16.mxu1 %v4637_v51 }
0x19a5   :  { %v3490_v59 = vpop.f32.mrf.mxu0  ;;  %v3531_v63 = vpop.f32.mrf.mxu1 }
0x19a6   :  { %v3491_v8 = vadd.f32 %v3490_v59, %v3305_v58  ;;  %v3532_v33 = vadd.f32 %v3531_v63, %v3346_v21 }
0x19a7   :  { %v3492_v10 = vpop.f32.mrf.mxu0  ;;  %v3533_v11 = vpop.f32.mrf.mxu1 }
0x19a8   :  { %v3538_v24 = vmul.f32 0.5, %v3491_v8  ;;  %v3493_v26 = vadd.f32 %v3492_v10, %v3307_v6  ;;  %v3534_v53 = vadd.f32 %v3533_v11, %v3348_v29 }
0x19a9   :  { %v3494_v27 = vpop.f32.mrf.mxu0  ;;  %v3535_v28 = vpop.f32.mrf.mxu1 }
0x19aa   :  { %4744 = vtanh.f32 %v3538_v24  ;;  %v3542_v31 = vmul.f32 0.5, %v3493_v26  ;;  %v3547_v61 = vmul.f32 0.5, %v3534_v53 }
0x19ab   :  { %v3495_v35 = vpop.f32.mrf.mxu0  ;;  %v3536_v43 = vpop.f32.mrf.mxu1 }
0x19ac   :  { %4746 = vtanh.f32 %v3542_v31 }
0x19ad   :  { %4748 = vtanh.f32 %v3532_v33 }
0x19ae   :  { %4750 = vtanh.f32 %v3547_v61 }
0x19b7   :  { %v4745_v50 = vpop.eup %4744 }
0x19b8   :  { %v3540_v45 = vmul.f32 0.5, %v4745_v50 }
0x19b9   :  { %v4747_v5 = vpop.eup %4746 }
0x19ba   :  { %v3541_v12 = vadd.f32 0.5, %v3540_v45  ;;  %v3544_v42 = vmul.f32 0.5, %v4747_v5  ;;  %v4749_v13 = vpop.eup %4748 }
0x19bb   :  { %v4751_v1 = vpop.eup %4750 }
0x19bc   :  { %v3545_v23 = vadd.f32 0.5, %v3544_v42  ;;  %v3552_v40 = vmul.f32 %v4749_v13, %v3541_v12  ;;  %v3549_v4 = vmul.f32 0.5, %v4751_v1 }
0x19be   :  { %v3551_v2 = vmul.f32 %v3545_v23, %v5663_v30  ;;  %v3550_v57 = vadd.f32 0.5, %v3549_v4 }
0x19c0   :  { %v5765_v41 = vadd.f32 %v3552_v40, %v3551_v2 }
0x19c2   :  { %4752 = vtanh.f32 %v5765_v41 }
0x19cf   :  { %v4753_v48 = vpop.eup %4752 }
0x19d0   :  { %v3555_v17 = vmul.f32 %v4753_v48, %v3550_v57 }
0x19d2   :  { %4337 = vst [vmem:[%s5805_s7 + $0x30] sm:$0xff] %v3555_v17  ;;  %v3558_v46 = vpack.c.bf16 %v3555_v17, %v3555_v17 }
0x19d4   :  { %3784 = vmatmul.mubr.bf16.vlgmr.msra.gmra.mxu0 %v3558_v46  ;;  %3825 = vmatmul.mubr.bf16.vlgmr.msra.gmra.mxu1 %v3558_v46 }
0x19d5   :  { %4453 = vmatpush3.bf16.msra.mxu0 %v4641_v18  ;;  %4454 = vmatprep.mubr.msk.bf16.mxu0 %vm4797_vm2, %v5817_v32 }
0x19d6   :  { %3952 = vmatpush1.bf16.msra.mxu1 %v5695_v49  ;;  %3992 = vmatprep.subr.bf16.mxu0 %v5708_v19 }
0x19d7   :  { %3969 = vmatprep.mubr.bf16.mxu1 %v5818_v62 }
0x19dc   :  { %4455 = vmatmul.mubr.msk.bf16.vlgmr.msra.gmra.mxu0 %vm473_vm4, %v5717_v39 }
0x19dd   :  { %3993 = vmatpush1.bf16.msra.mxu0 %v5703_v52  ;;  %4010 = vmatprep.mubr.bf16.mxu0 %v5818_v62 }
0x1a94   :  { %v3785_v30 = vpop.f32.mrf.mxu0  ;;  %v3826_v56 = vpop.f32.mrf.mxu1 }
0x1a95   :  { %v3786_v11 = vadd.f32 %v3785_v30, %v5821_v16  ;;  %v3827_v33 = vadd.f32 %v3826_v56, %v5082_v34 }
0x1a96   :  { %v3787_v0 = vpop.f32.mrf.mxu0  ;;  %v3828_v7 = vpop.f32.mrf.mxu1 }
0x1a97   :  { %v3788_v24 = vadd.f32 %v3787_v0, %v5822_v20  ;;  %v3829_v16 = vadd.f32 %v3828_v7, %v5087_v22 }
0x1a98   :  { %v3789_v37 = vpop.f32.mrf.mxu0  ;;  %v3830_v47 = vpop.f32.mrf.mxu1 }
0x1a9a   :  { %v3790_v32 = vpop.f32.mrf.mxu0  ;;  %v3831_v36 = vpop.f32.mrf.mxu1 }
0x1a9c   :  { %v3877_v14 = vpop.f32.mrf.mxu0 }
0x1a9d   :  { %v3883_v9 = vadd.f32 %v3877_v14, %v3834_v25 }
0x1a9e   :  { %v4456_v38 = vpop.f32.mrf.mxu0 }
0x1a9f   :  { %4754 = vtanh.f32 %v3883_v9  ;;  %v3884_v52 = vmul.f32 0.5, %v3883_v9 }
0x1aa0   :  { %v3880_v3 = vpop.f32.mrf.mxu0 }
0x1aa1   :  { %4756 = vtanh.f32 %v3884_v52 }
0x1aa2   :  { %v4457_v49 = vpop.f32.mrf.mxu0 }
0x1aac   :  { %v4755_v51 = vpop.eup %4754 }
0x1aad   :  { %3891 = vrot.lane.b32.xlu0 %v4755_v51, %s4798_s2 }
0x1aae   :  { %v4757_v62 = vpop.eup %4756 }
0x1aaf   :  { %v3886_v19 = vmul.f32 0.5, %v4757_v62 }
0x1ab1   :  { %v3887_v54 = vadd.f32 0.5, %v3886_v19 }
0x1ab3   :  { %v3889_v44 = vmul.f32 %v3887_v54, %v5689_v15 }
0x1b1f   :  { %v3892_v55 = vpop.permute.xlu0 %3891 }
0x1b20   :  { %v3894_v60 = vmul.f32 %v3892_v55, %v3887_v54 }
0x1b22   :  { %3896 = vrot.lane.b32.xlu1 %v3894_v60, %s4794_s28 }
0x1b94   :  { %v3897_v39 = vpop.permute.xlu1 %3896 }
0x1b95   :  { %v3899_v58 = vadd.f32 %v3897_v39, %v3889_v44 }
0x1b97   :  { %4758 = vtanh.f32 %v3899_v58 }
0x1ba4   :  { %v4759_v59 = vpop.eup %4758 }
0x1ba5   :  { %3902 = vrot.lane.b32.xlu0 %v4759_v59, %s4799_s0 }
0x1c17   :  { %v3903_v63 = vpop.permute.xlu0 %3902 }
0x1c18   :  { %v3905_v6 = vmul.f32 %v3903_v63, %v3887_v54 }
0x1c1a   :  { %v3906_v8 = vpack.c.bf16 %v3905_v6, %v3905_v6 }
0x1c1c   :  { %3912 = vrot.lane.b32.xlu1 %v3906_v8, %s4800_s29 }
0x1c8e   :  { %v3913_v10 = vpop.permute.xlu1 %3912 }
0x1c8f   :  { %4376 = vmatmul.mubr.msk.bf16.vlgmr.msra.gmra.mxu1 %vm473_vm4, %v3913_v10  ;;  %4377 = vmatmul.mubr.msk.bf16.vlgmr.msra.gmra.mxu0 %vm473_vm4, %v3913_v10 }
0x1d4f   :  { %v3971_v21 = vpop.f32.mrf.mxu1  ;;  %v4012_v15 = vpop.f32.mrf.mxu0 }
0x1d50   :  { %v3972_v26 = vadd.f32 %v3971_v21, %v3786_v11  ;;  %v4013_v53 = vadd.f32 %v4012_v15, %v3827_v33 }
0x1d51   :  { %v3973_v27 = vpop.f32.mrf.mxu1  ;;  %v4014_v28 = vpop.f32.mrf.mxu0 }
0x1d52   :  { %v4019_v31 = vmul.f32 0.5, %v3972_v26  ;;  %v3974_v35 = vadd.f32 %v3973_v27, %v3788_v24  ;;  %v4015_v5 = vadd.f32 %v4014_v28, %v3829_v16 }
0x1d53   :  { %v3975_v43 = vpop.f32.mrf.mxu1  ;;  %v4016_v29 = vpop.f32.mrf.mxu0 }
0x1d54   :  { %4760 = vtanh.f32 %v4019_v31  ;;  %v4023_v61 = vmul.f32 0.5, %v3974_v35  ;;  %v4028_v20 = vmul.f32 0.5, %v4015_v5 }
0x1d55   :  { %v3976_v50 = vpop.f32.mrf.mxu1  ;;  %v4017_v45 = vpop.f32.mrf.mxu0 }
0x1d56   :  { %4762 = vtanh.f32 %v4023_v61 }
0x1d57   :  { %4764 = vtanh.f32 %v4013_v53 }
0x1d58   :  { %4766 = vtanh.f32 %v4028_v20 }
0x1d61   :  { %v4761_v12 = vpop.eup %4760 }
0x1d62   :  { %v4021_v42 = vmul.f32 0.5, %v4761_v12 }
0x1d63   :  { %v4763_v13 = vpop.eup %4762 }
0x1d64   :  { %v4022_v23 = vadd.f32 0.5, %v4021_v42  ;;  %v4025_v34 = vmul.f32 0.5, %v4763_v13  ;;  %v4765_v40 = vpop.eup %4764 }
0x1d65   :  { %v4767_v48 = vpop.eup %4766 }
0x1d66   :  { %v4026_v2 = vadd.f32 0.5, %v4025_v34  ;;  %v4033_v1 = vmul.f32 %v4765_v40, %v4022_v23  ;;  %v4030_v17 = vmul.f32 0.5, %v4767_v48 }
0x1d68   :  { %v4032_v4 = vmul.f32 %v4026_v2, %v5765_v41  ;;  %v4031_v18 = vadd.f32 0.5, %v4030_v17 }
0x1d6a   :  { %v4034_v57 = vadd.f32 %v4033_v1, %v4032_v4 }
0x1d6c   :  { %4768 = vtanh.f32 %v4034_v57 }
0x1d79   :  { %v4769_v46 = vpop.eup %4768 }
0x1d7a   :  { %v4036_v22 = vmul.f32 %v4769_v46, %v4031_v18 }
0x1d7c   :  { %4378 = vst [vmem:[%s5805_s7 + $0x38] sm:$0xff] %v4036_v22 }
0x1d7d   :  { %4043 = vsyncpa [#allocation4], 1 }

</bundles_post_ra>
